<compile_context>
chip_gen: v7x
topology: tpu7x:2x2x1
jax: 0.10.0
libtpu: 0.0.40
codegen_flags: <defaults>
</compile_context>

<pallas_src>
import jax
import jax.numpy as jnp
from jax.experimental import pallas as pl
from jax.experimental.pallas import tpu as pltpu

_LANE = 128
_VMEM_LIMIT = 32 * 1024 * 1024


# ---------------------------- small helpers ----------------------------

def _round_up(x, m):
    return (x + m - 1) // m * m


def _pad_axis(a, target, axis):
    pad = target - a.shape[axis]
    if pad == 0:
        return a
    widths = [(0, 0)] * a.ndim
    widths[axis] = (0, pad)
    return jnp.pad(a, widths)


def _pick_row_tile(dim, pref=512):
    t = min(pref, dim)
    t -= t % 8
    while t >= 8:
        if dim % t == 0:
            return t
        t -= 8
    return dim           # full-dim escape hatch


def _pick_lane_tile(dim, pref=256):
    t = min(pref, dim)
    t -= t % _LANE
    while t >= _LANE:
        if dim % t == 0:
            return t
        t -= _LANE
    return dim


def _fold_bn(gamma, beta, mean, var, eps=1e-5):
    scale = gamma / jnp.sqrt(var + eps)
    return scale, beta - mean * scale


# ---------------------------- fused tiled matmul (1x1 convs) ----------------------------

def _make_fused_matmul_kernel(nk, has_pro, has_epi):
    def kernel(*refs):
        idx = 0
        x_ref = refs[idx]; idx += 1
        w_ref = refs[idx]; idx += 1
        ps_ref = pb_ref = es_ref = eb_ref = None
        if has_pro:
            ps_ref, pb_ref = refs[idx], refs[idx + 1]; idx += 2
        if has_epi:
            es_ref, eb_ref = refs[idx], refs[idx + 1]; idx += 2
        o_ref = refs[idx]; idx += 1
        acc_ref = refs[idx]

        k = pl.program_id(2)

        @pl.when(k == 0)
        def _():
            acc_ref[...] = jnp.zeros_like(acc_ref)

        x = x_ref[...]
        if has_pro:                                    # folded BN + ReLU prologue (f32, VPU)
            x = jnp.maximum(x * ps_ref[...] + pb_ref[...], 0.0)
        acc_ref[...] += jnp.dot(x.astype(jnp.bfloat16), w_ref[...],
                                preferred_element_type=jnp.float32)

        @pl.when(k == nk - 1)
        def _():
            r = acc_ref[...]
            if has_epi:                                # folded BN + ReLU epilogue
                r = jnp.maximum(r * es_ref[...] + eb_ref[...], 0.0)
            o_ref[...] = r.astype(o_ref.dtype)
    return kernel


def fused_matmul(x, w, pro=None, epi=None):
    """out = [bn_epi_relu]( [bn_pro_relu](x) @ w ).  x f32 (M,K), w bf16 (K,N)."""
    m, k = x.shape
    kk_, n = w.shape
    assert k == kk_
    tm = 256 if m >= 256 else _round_up(m, 8)
    mp = _round_up(m, tm)
    if mp != m:
        x = jnp.pad(x, ((0, mp - m), (0, 0)))
    tk = _pick_lane_tile(k, 512)
    tn = _pick_lane_tile(n, 256)
    gm, gn, gk = mp // tm, n // tn, k // tk

    in_specs = [
        pl.BlockSpec((tm, tk), lambda i, j, kk: (i, kk)),
        pl.BlockSpec((tk, tn), lambda i, j, kk: (kk, j)),
    ]
    args = [x, w]
    if pro is not None:
        ps, pb = pro
        in_specs += [pl.BlockSpec((1, tk), lambda i, j, kk: (0, kk)),
                     pl.BlockSpec((1, tk), lambda i, j, kk: (0, kk))]
        args += [ps.reshape(1, k).astype(jnp.float32),
                 pb.reshape(1, k).astype(jnp.float32)]
    if epi is not None:
        es, eb = epi
        in_specs += [pl.BlockSpec((1, tn), lambda i, j, kk: (0, j)),
                     pl.BlockSpec((1, tn), lambda i, j, kk: (0, j))]
        args += [es.reshape(1, n).astype(jnp.float32),
                 eb.reshape(1, n).astype(jnp.float32)]

    out = pl.pallas_call(
        _make_fused_matmul_kernel(gk, pro is not None, epi is not None),
        out_shape=jax.ShapeDtypeStruct((mp, n), jnp.float32),
        grid=(gm, gn, gk),
        in_specs=in_specs,
        out_specs=pl.BlockSpec((tm, tn), lambda i, j, kk: (i, j)),
        scratch_shapes=[pltpu.VMEM((tm, tn), jnp.float32)],
        compiler_params=pltpu.CompilerParams(
            dimension_semantics=("parallel", "parallel", "arbitrary"),
            vmem_limit_bytes=_VMEM_LIMIT),
    )(*args)
    return out[:m] if mp != m else out


# ------------ conv2 (3x3, 9-tap) + relu(bn3) + conv3 (1x1) + SE pool/FC/sigmoid ------------

def _make_conv2_conv3_se_kernel(ho, wo, stride, inv_hw):
    def kernel(x_ref, w2_ref, s3_ref, b3_ref, w3_ref, fc1_ref, fc2_ref,
               c3_ref, gate_ref, acc_ref):
        # 3x3 conv via 9 shifted 1x1 matmuls accumulated in f32
        acc_ref[...] = jnp.zeros_like(acc_ref)
        for kh in range(3):
            for kw in range(3):
                if stride == 1:
                    tap = x_ref[0, pl.ds(kh, ho), pl.ds(kw, wo), :]
                else:
                    tap = x_ref[0, pl.ds(kh, ho, stride), pl.ds(kw, wo, stride), :]
                acc_ref[...] += jnp.dot(
                    tap.reshape(ho * wo, tap.shape[-1]).astype(jnp.bfloat16),
                    w2_ref[kh * 3 + kw],
                    preferred_element_type=jnp.float32)

        # relu(bn3) + 1x1 conv3, entirely in VMEM (c2 never touches HBM)
        h3 = jnp.maximum(acc_ref[...] * s3_ref[...] + b3_ref[...], 0.0)
        c3 = jnp.dot(h3.astype(jnp.bfloat16), w3_ref[...],
                     preferred_element_type=jnp.float32)
        c3_ref[0] = c3

        # SE: global average pool over spatial + tiny FC1/ReLU/FC2/sigmoid
        mean = jnp.sum(c3, axis=0, keepdims=True) * inv_hw                 # (1, Co)
        h = jnp.maximum(jnp.dot(mean.astype(jnp.bfloat16), fc1_ref[...],
                                preferred_element_type=jnp.float32), 0.0)
        gate_ref[0] = jax.nn.sigmoid(
            jnp.dot(h.astype(jnp.bfloat16), fc2_ref[...],
                    preferred_element_type=jnp.float32))
    return kernel


def conv2_conv3_se(h2_padded, w2_taps, s3, b3, w3, fc1, fc2, stride):
    """h2_padded: (B, H+2, W+2, P_p) f32; returns c3 (B, Ho*Wo, Co_p), gate (B, 1, Co_p)."""
    # TODO(synk): for very large images, tile spatially with halo blocks instead of one
    # padded image per grid step (and move the zero-padding in-kernel).
    b, hp, wp, cp = h2_padded.shape
    co = w3.shape[-1]
    hid = fc1.shape[-1]
    ho = (hp - 3) // stride + 1
    wo = (wp - 3) // stride + 1
    c3, gate = pl.pallas_call(
        _make_conv2_conv3_se_kernel(ho, wo, stride, 1.0 / (ho * wo)),
        out_shape=(jax.ShapeDtypeStruct((b, ho * wo, co), jnp.float32),
                   jax.ShapeDtypeStruct((b, 1, co), jnp.float32)),
        grid=(b,),
        in_specs=[
            pl.BlockSpec((1, hp, wp, cp), lambda bi: (bi, 0, 0, 0)),
            pl.BlockSpec((9, cp, cp), lambda bi: (0, 0, 0)),
            pl.BlockSpec((1, cp), lambda bi: (0, 0)),
            pl.BlockSpec((1, cp), lambda bi: (0, 0)),
            pl.BlockSpec((cp, co), lambda bi: (0, 0)),
            pl.BlockSpec((co, hid), lambda bi: (0, 0)),
            pl.BlockSpec((hid, co), lambda bi: (0, 0)),
        ],
        out_specs=(pl.BlockSpec((1, ho * wo, co), lambda bi: (bi, 0, 0)),
                   pl.BlockSpec((1, 1, co), lambda bi: (bi, 0, 0))),
        scratch_shapes=[pltpu.VMEM((ho * wo, cp), jnp.float32)],
        compiler_params=pltpu.CompilerParams(
            dimension_semantics=("parallel",),
            vmem_limit_bytes=_VMEM_LIMIT),
    )(h2_padded, w2_taps, s3, b3, w3, fc1, fc2)
    return c3, gate, ho, wo


# ---------------------------- strided shortcut (stride > 1 only) ----------------------------

def _make_shortcut_kernel(ho, wo, stride):
    def kernel(x_ref, w_ref, s_ref, b_ref, o_ref):
        if stride == 1:
            xs = x_ref[0]
        else:
            xs = x_ref[0, pl.ds(0, ho, stride), pl.ds(0, wo, stride), :]
        h1 = jnp.maximum(xs * s_ref[...] + b_ref[...], 0.0)
        o_ref[0] = jnp.dot(h1.reshape(ho * wo, h1.shape[-1]).astype(jnp.bfloat16),
                           w_ref[...], preferred_element_type=jnp.float32)
    return kernel


def shortcut_conv_strided(x_img, wsc, scale1, bias1, stride):
    b, h, w, cp = x_img.shape
    co = wsc.shape[-1]
    ho = (h - 1) // stride + 1
    wo = (w - 1) // stride + 1
    return pl.pallas_call(
        _make_shortcut_kernel(ho, wo, stride),
        out_shape=jax.ShapeDtypeStruct((b, ho * wo, co), jnp.float32),
        grid=(b,),
        in_specs=[
            pl.BlockSpec((1, h, w, cp), lambda bi: (bi, 0, 0, 0)),
            pl.BlockSpec((cp, co), lambda bi: (0, 0)),
            pl.BlockSpec((1, cp), lambda bi: (0, 0)),
            pl.BlockSpec((1, cp), lambda bi: (0, 0)),
        ],
        out_specs=pl.BlockSpec((1, ho * wo, co), lambda bi: (bi, 0, 0)),
        compiler_params=pltpu.CompilerParams(
            dimension_semantics=("parallel",),
            vmem_limit_bytes=_VMEM_LIMIT),
    )(x_img, wsc, scale1.reshape(1, cp).astype(jnp.float32),
      bias1.reshape(1, cp).astype(jnp.float32))


# ---------------------------- out = c3 * gate[b] + shortcut ----------------------------

def _gate_add_kernel(c3_ref, sc_ref, gate_ref, o_ref):
    o_ref[0] = c3_ref[0] * gate_ref[0] + sc_ref[0]


def gate_add(c3_3d, shortcut_3d, gate):
    bsz, sp, cp = c3_3d.shape
    tq = _pick_row_tile(sp)
    n_sp = sp // tq
    return pl.pallas_call(
        _gate_add_kernel,
        out_shape=jax.ShapeDtypeStruct((bsz, sp, cp), jnp.float32),
        grid=(bsz, n_sp),
        in_specs=[
            pl.BlockSpec((1, tq, cp), lambda bi, si: (bi, si, 0)),
            pl.BlockSpec((1, tq, cp), lambda bi, si: (bi, si, 0)),
            pl.BlockSpec((1, 1, cp), lambda bi, si: (bi, 0, 0)),
        ],
        out_specs=pl.BlockSpec((1, tq, cp), lambda bi, si: (bi, si, 0)),
        compiler_params=pltpu.CompilerParams(
            dimension_semantics=("parallel", "parallel"),
            vmem_limit_bytes=_VMEM_LIMIT),
    )(c3_3d, shortcut_3d, gate)


# ---------------------------- full block (glue is plain JAX) ----------------------------

def se_preact_bottleneck(x_nchw, params, stride=1):
    b, cin, h, w = x_nchw.shape
    planes = params["w1"].shape[0]
    cout = params["w3"].shape[0]
    hid = params["fc1"].shape[0]

    cin_p = _round_up(cin, _LANE)
    p_p = _round_up(planes, _LANE)
    co_p = _round_up(cout, _LANE)
    hid_p = _round_up(hid, _LANE)

    # channels-last, lane-padded activations
    x_img = _pad_axis(jnp.transpose(x_nchw, (0, 2, 3, 1)), cin_p, axis=-1)    # (B,H,W,Cin_p)
    x2d = x_img.reshape(b * h * w, cin_p)

    # folded BN params (zero scale/bias on padded channels keeps them at 0)
    s1, b1 = _fold_bn(*params["bn1"]); s1 = _pad_axis(s1, cin_p, 0); b1 = _pad_axis(b1, cin_p, 0)
    s2, b2 = _fold_bn(*params["bn2"]); s2 = _pad_axis(s2, p_p, 0);   b2 = _pad_axis(b2, p_p, 0)
    s3, b3 = _fold_bn(*params["bn3"]); s3 = _pad_axis(s3, p_p, 0);   b3 = _pad_axis(b3, p_p, 0)

    # bf16 weights (lane-padded)
    w1m = _pad_axis(_pad_axis(params["w1"][:, :, 0, 0].T, cin_p, 0), p_p, 1).astype(jnp.bfloat16)
    w3m = _pad_axis(_pad_axis(params["w3"][:, :, 0, 0].T, p_p, 0), co_p, 1).astype(jnp.bfloat16)
    w2_taps = jnp.transpose(params["w2"], (2, 3, 1, 0))                        # (3,3,ci,co)
    w2_taps = _pad_axis(_pad_axis(w2_taps, p_p, 2), p_p, 3)
    w2_taps = w2_taps.reshape(9, p_p, p_p).astype(jnp.bfloat16)
    fc1m = _pad_axis(_pad_axis(params["fc1"].T, co_p, 0), hid_p, 1).astype(jnp.bfloat16)
    fc2m = _pad_axis(_pad_axis(params["fc2"].T, hid_p, 0), co_p, 1).astype(jnp.bfloat16)

    # conv1 (1x1): relu(bn1) prologue + relu(bn2) epilogue fused
    h2 = fused_matmul(x2d, w1m, pro=(s1, b1), epi=(s2, b2))                    # (B*H*W, P_p)

    # conv2 (3x3, pad=1, stride) + relu(bn3) + conv3 (1x1) + SE pool/FC/sigmoid, one pass
    h2_pad = jnp.pad(h2.reshape(b, h, w, p_p), ((0, 0), (1, 1), (1, 1), (0, 0)))
    c3_3d, gate, ho, wo = conv2_conv3_se(
        h2_pad, w2_taps,
        s3.reshape(1, p_p).astype(jnp.float32), b3.reshape(1, p_p).astype(jnp.float32),
        w3m, fc1m, fc2m, stride)                                               # c3: (B,Ho*Wo,Co_p)

    # shortcut
    # TODO(synk): fuse the stride-1 projection matmul into the conv1 pass (shares relu(bn1(x))).
    if "w_sc" in params:
        wscm = _pad_axis(_pad_axis(params["w_sc"][:, :, 0, 0].T, cin_p, 0),
                         co_p, 1).astype(jnp.bfloat16)
        if stride == 1:
            sc = fused_matmul(x2d, wscm, pro=(s1, b1)).reshape(b, ho * wo, co_p)
        else:
            sc = shortcut_conv_strided(x_img, wscm, s1, b1, stride)
    else:
        sc = x2d.reshape(b, ho * wo, co_p)        # identity (cin == cout, stride == 1)

    # SE gate * c3 + residual add
    out = gate_add(c3_3d, sc, gate)                                            # (B, Ho*Wo, Co_p)

    out = out.reshape(b, ho, wo, co_p)[..., :cout]
    return jnp.transpose(out, (0, 3, 1, 2))                                    # NCHW


# ---------------------------- pure-JAX reference ----------------------------

def reference_forward(x, params, stride=1):
    def bn(x, g, bta, m, v, eps=1e-5):
        inv = 1.0 / jnp.sqrt(v + eps)
        return ((x - m[None, :, None, None]) * inv[None, :, None, None]
                * g[None, :, None, None] + bta[None, :, None, None])

    def conv(x, w, s=1, p=0):
        return jax.lax.conv_general_dilated(
            x, w, (s, s), [(p, p), (p, p)],
            dimension_numbers=("NCHW", "OIHW", "NCHW"),
            precision=jax.lax.Precision.HIGHEST)

    out = jax.nn.relu(bn(x, *params["bn1"]))
    shortcut = conv(out, params["w_sc"], stride) if "w_sc" in params else x
    out = conv(out, params["w1"])
    out = conv(jax.nn.relu(bn(out, *params["bn2"])), params["w2"], stride, 1)
    out = conv(jax.nn.relu(bn(out, *params["bn3"])), params["w3"])
    y = out.mean(axis=(2, 3))
    y = jax.nn.sigmoid(jax.nn.relu(y @ params["fc1"].T) @ params["fc2"].T)
    return out * y[:, :, None, None] + shortcut


# ---------------------------- parameter init ----------------------------

def init_params(key, in_planes, planes, stride, reduction):
    expansion = 4
    cout = expansion * planes
    ks = jax.random.split(key, 9)

    def bn_params(k, c):
        k1, k2, k3, k4 = jax.random.split(k, 4)
        gamma = jax.random.uniform(k1, (c,), jnp.float32, 0.5, 1.5)
        beta = 0.1 * jax.random.normal(k2, (c,), jnp.float32)
        mean = 0.1 * jax.random.normal(k3, (c,), jnp.float32)
        var = jax.random.uniform(k4, (c,), jnp.float32, 0.5, 1.5)
        return gamma, beta, mean, var

    def conv_w(k, co, ci, kh, kw):
        fan_in = ci * kh * kw
        return jax.random.normal(k, (co, ci, kh, kw), jnp.float32) / jnp.sqrt(fan_in)

    params = {
        "bn1": bn_params(ks[0], in_planes),
        "w1": conv_w(ks[1], planes, in_planes, 1, 1),
        "bn2": bn_params(ks[2], planes),
        "w2": conv_w(ks[3], planes, planes, 3, 3),
        "bn3": bn_params(ks[4], planes),
        "w3": conv_w(ks[5], cout, planes, 1, 1),
        # PyTorch nn.Linear weight layout: (out_features, in_features)
        "fc1": jax.random.normal(ks[6], (cout // reduction, cout), jnp.float32) / jnp.sqrt(cout),
        "fc2": jax.random.normal(ks[7], (cout, cout // reduction), jnp.float32)
               / jnp.sqrt(max(cout // reduction, 1)),
    }
    if stride != 1 or in_planes != cout:
        params["w_sc"] = conv_w(ks[8], cout, in_planes, 1, 1)
    return params


if __name__ == "__main__":
    B, in_planes, planes, H, W = 2, 4, 4, 16, 16
    stride, reduction = 1, 4              # expansion*planes = 16, SE hidden = 4

    key = jax.random.PRNGKey(0)
    kx, kp = jax.random.split(key)
    x = jax.random.normal(kx, (B, in_planes, H, W), jnp.float32)
    params = init_params(kp, in_planes, planes, stride, reduction)

    fwd = jax.jit(lambda xx, pp: se_preact_bottleneck(xx, pp, stride))
    out = jax.block_until_ready(fwd(x, params))

    ref = reference_forward(x, params, stride)
    assert out.shape == ref.shape == (B, 4 * planes, H, W)
    max_err = float(jnp.max(jnp.abs(out - ref)))
    ref_mag = float(jnp.max(jnp.abs(ref)))
    # tolerance accounts for bf16 MXU inputs (f32 accumulation) through a 3-matmul chain
    assert max_err <= 3e-2 * max(ref_mag, 1.0), f"max abs err {max_err} (ref max {ref_mag})"
    print("KERNEL_OK")
</pallas_src>

<mosaic_0001>
module attributes {stable_mosaic.version = 11 : i64} {
  func.func @kernel(%arg0: i32, %arg1: i32, %arg2: i32, %arg3: memref<256x128xf32, #tpu.memory_space<vmem>>, %arg4: memref<128x128xbf16, #tpu.memory_space<vmem>>, %arg5: memref<1x128xf32, #tpu.memory_space<vmem>>, %arg6: memref<1x128xf32, #tpu.memory_space<vmem>>, %arg7: memref<256x128xf32, #tpu.memory_space<vmem>>, %arg8: memref<256x128xf32, #tpu.memory_space<vmem>>) attributes {dimension_semantics = [#tpu.dimension_semantics<parallel>, #tpu.dimension_semantics<parallel>, #tpu.dimension_semantics<arbitrary>], iteration_bounds = array<i64: 2, 1, 1>, scalar_prefetch = 0 : i64, scratch_operands = 1 : i64, tpu.core_type = #tpu.core_type<tc>, window_params = [{transform_indices = @transform_0, window_bounds = array<i64: 256, 128>}, {transform_indices = @transform_1, window_bounds = array<i64: 128, 128>}, {transform_indices = @transform_2, window_bounds = array<i64: 1, 128>}, {transform_indices = @transform_3, window_bounds = array<i64: 1, 128>}, {transform_indices = @transform_4, window_bounds = array<i64: 256, 128>}]} {
    %c0_i32 = arith.constant 0 : i32
    %0 = arith.cmpi eq, %arg2, %c0_i32 : i32
    %1 = arith.extui %0 : i1 to i32
    %c0_i32_0 = arith.constant 0 : i32
    %2 = arith.cmpi ne, %1, %c0_i32_0 : i32
    scf.if %2 {
      %cst_15 = arith.constant 0.000000e+00 : f32
      %21 = vector.broadcast %cst_15 : f32 to vector<256x128xf32>
      %c0_16 = arith.constant 0 : index
      %c0_17 = arith.constant 0 : index
      %22 = vector.load %arg8[%c0_16, %c0_17] : memref<256x128xf32, #tpu.memory_space<vmem>>, vector<256x128xf32>
      tpu.vector_store %arg8[%c0_16, %c0_17], %21 {strides = array<i32>} : memref<256x128xf32, #tpu.memory_space<vmem>>, vector<256x128xf32>,
    } else {
    }
    %c0 = arith.constant 0 : index
    %c0_1 = arith.constant 0 : index
    %3 = vector.load %arg3[%c0, %c0_1] : memref<256x128xf32, #tpu.memory_space<vmem>>, vector<256x128xf32>
    %c0_2 = arith.constant 0 : index
    %c0_3 = arith.constant 0 : index
    %4 = vector.load %arg5[%c0_2, %c0_3] : memref<1x128xf32, #tpu.memory_space<vmem>>, vector<1x128xf32>
    %5 = vector.broadcast %4 : vector<1x128xf32> to vector<256x128xf32>
    %6 = arith.mulf %3, %5 : vector<256x128xf32>
    %c0_4 = arith.constant 0 : index
    %c0_5 = arith.constant 0 : index
    %7 = vector.load %arg6[%c0_4, %c0_5] : memref<1x128xf32, #tpu.memory_space<vmem>>, vector<1x128xf32>
    %8 = vector.broadcast %7 : vector<1x128xf32> to vector<256x128xf32>
    %9 = arith.addf %6, %8 : vector<256x128xf32>
    %cst = arith.constant 0.000000e+00 : f32
    %10 = vector.broadcast %cst : f32 to vector<256x128xf32>
    %11 = arith.maximumf %9, %10 : vector<256x128xf32>
    %c0_6 = arith.constant 0 : index
    %c0_7 = arith.constant 0 : index
    %12 = vector.load %arg8[%c0_6, %c0_7] : memref<256x128xf32, #tpu.memory_space<vmem>>, vector<256x128xf32>
    %13 = arith.truncf %11 : vector<256x128xf32> to vector<256x128xbf16>
    %c0_8 = arith.constant 0 : index
    %c0_9 = arith.constant 0 : index
    %14 = vector.load %arg4[%c0_8, %c0_9] : memref<128x128xbf16, #tpu.memory_space<vmem>>, vector<128x128xbf16>
    %cst_10 = arith.constant dense<0.000000e+00> : vector<256x128xf32>
    %15 = tpu.matmul %13, %14, %cst_10 {dimension_numbers = #tpu.dot_dimension_numbers<[1], [0], [0], [1], [0, 0, 1, 1], [], []>} : vector<256x128xbf16>, vector<128x128xbf16>, vector<256x128xf32> -> vector<256x128xf32>
    %16 = arith.addf %12, %15 : vector<256x128xf32>
    %c0_11 = arith.constant 0 : index
    %c0_12 = arith.constant 0 : index
    %17 = vector.load %arg8[%c0_11, %c0_12] : memref<256x128xf32, #tpu.memory_space<vmem>>, vector<256x128xf32>
    tpu.vector_store %arg8[%c0_11, %c0_12], %16 {strides = array<i32>} : memref<256x128xf32, #tpu.memory_space<vmem>>, vector<256x128xf32>,
    %c0_i32_13 = arith.constant 0 : i32
    %18 = arith.cmpi eq, %arg2, %c0_i32_13 : i32
    %19 = arith.extui %18 : i1 to i32
    %c0_i32_14 = arith.constant 0 : i32
    %20 = arith.cmpi ne, %19, %c0_i32_14 : i32
    scf.if %20 {
      %c0_15 = arith.constant 0 : index
      %c0_16 = arith.constant 0 : index
      %21 = vector.load %arg8[%c0_15, %c0_16] : memref<256x128xf32, #tpu.memory_space<vmem>>, vector<256x128xf32>
      %c0_17 = arith.constant 0 : index
      %c0_18 = arith.constant 0 : index
      %22 = vector.load %arg7[%c0_17, %c0_18] : memref<256x128xf32, #tpu.memory_space<vmem>>, vector<256x128xf32>
      tpu.vector_store %arg7[%c0_17, %c0_18], %21 {strides = array<i32>} : memref<256x128xf32, #tpu.memory_space<vmem>>, vector<256x128xf32>,
    } else {
    }
    return
  }
  func.func @transform_0(%arg0: i32, %arg1: i32, %arg2: i32) -> (i32, i32) {
    %c0_i32 = arith.constant 0 : i32
    return %arg0, %arg2 : i32, i32
  }
  func.func @transform_1(%arg0: i32, %arg1: i32, %arg2: i32) -> (i32, i32) {
    %c0_i32 = arith.constant 0 : i32
    return %arg2, %arg1 : i32, i32
  }
  func.func @transform_2(%arg0: i32, %arg1: i32, %arg2: i32) -> (i32, i32) {
    %c0_i32 = arith.constant 0 : i32
    %c0_i32_0 = arith.constant 0 : i32
    return %c0_i32, %arg2 : i32, i32
  }
  func.func @transform_3(%arg0: i32, %arg1: i32, %arg2: i32) -> (i32, i32) {
    %c0_i32 = arith.constant 0 : i32
    %c0_i32_0 = arith.constant 0 : i32
    return %c0_i32, %arg2 : i32, i32
  }
  func.func @transform_4(%arg0: i32, %arg1: i32, %arg2: i32) -> (i32, i32) {
    %c0_i32 = arith.constant 0 : i32
    return %arg0, %arg1 : i32, i32
  }
}

module attributes {stable_mosaic.version = 11 : i64} {
  func.func @kernel(%arg0: i32, %arg1: i32, %arg2: i32, %arg3: memref<256x128xf32, #tpu.memory_space<vmem>>, %arg4: memref<128x128xbf16, #tpu.memory_space<vmem>>, %arg5: memref<1x128xf32, #tpu.memory_space<vmem>>, %arg6: memref<1x128xf32, #tpu.memory_space<vmem>>, %arg7: memref<1x128xf32, #tpu.memory_space<vmem>>, %arg8: memref<1x128xf32, #tpu.memory_space<vmem>>, %arg9: memref<256x128xf32, #tpu.memory_space<vmem>>, %arg10: memref<256x128xf32, #tpu.memory_space<vmem>>) attributes {dimension_semantics = [#tpu.dimension_semantics<parallel>, #tpu.dimension_semantics<parallel>, #tpu.dimension_semantics<arbitrary>], iteration_bounds = array<i64: 2, 1, 1>, scalar_prefetch = 0 : i64, scratch_operands = 1 : i64, tpu.core_type = #tpu.core_type<tc>, window_params = [{transform_indices = @transform_0, window_bounds = array<i64: 256, 128>}, {transform_indices = @transform_1, window_bounds = array<i64: 128, 128>}, {transform_indices = @transform_2, window_bounds = array<i64: 1, 128>}, {transform_indices = @transform_3, window_bounds = array<i64: 1, 128>}, {transform_indices = @transform_4, window_bounds = array<i64: 1, 128>}, {transform_indices = @transform_5, window_bounds = array<i64: 1, 128>}, {transform_indices = @transform_6, window_bounds = array<i64: 256, 128>}]} {
    %c0_i32 = arith.constant 0 : i32
    %0 = arith.cmpi eq, %arg2, %c0_i32 : i32
    %1 = arith.extui %0 : i1 to i32
    %c0_i32_0 = arith.constant 0 : i32
    %2 = arith.cmpi ne, %1, %c0_i32_0 : i32
    scf.if %2 {
      %cst_15 = arith.constant 0.000000e+00 : f32
      %21 = vector.broadcast %cst_15 : f32 to vector<256x128xf32>
      %c0_16 = arith.constant 0 : index
      %c0_17 = arith.constant 0 : index
      %22 = vector.load %arg10[%c0_16, %c0_17] : memref<256x128xf32, #tpu.memory_space<vmem>>, vector<256x128xf32>
      tpu.vector_store %arg10[%c0_16, %c0_17], %21 {strides = array<i32>} : memref<256x128xf32, #tpu.memory_space<vmem>>, vector<256x128xf32>,
    } else {
    }
    %c0 = arith.constant 0 : index
    %c0_1 = arith.constant 0 : index
    %3 = vector.load %arg3[%c0, %c0_1] : memref<256x128xf32, #tpu.memory_space<vmem>>, vector<256x128xf32>
    %c0_2 = arith.constant 0 : index
    %c0_3 = arith.constant 0 : index
    %4 = vector.load %arg5[%c0_2, %c0_3] : memref<1x128xf32, #tpu.memory_space<vmem>>, vector<1x128xf32>
    %5 = vector.broadcast %4 : vector<1x128xf32> to vector<256x128xf32>
    %6 = arith.mulf %3, %5 : vector<256x128xf32>
    %c0_4 = arith.constant 0 : index
    %c0_5 = arith.constant 0 : index
    %7 = vector.load %arg6[%c0_4, %c0_5] : memref<1x128xf32, #tpu.memory_space<vmem>>, vector<1x128xf32>
    %8 = vector.broadcast %7 : vector<1x128xf32> to vector<256x128xf32>
    %9 = arith.addf %6, %8 : vector<256x128xf32>
    %cst = arith.constant 0.000000e+00 : f32
    %10 = vector.broadcast %cst : f32 to vector<256x128xf32>
    %11 = arith.maximumf %9, %10 : vector<256x128xf32>
    %c0_6 = arith.constant 0 : index
    %c0_7 = arith.constant 0 : index
    %12 = vector.load %arg10[%c0_6, %c0_7] : memref<256x128xf32, #tpu.memory_space<vmem>>, vector<256x128xf32>
    %13 = arith.truncf %11 : vector<256x128xf32> to vector<256x128xbf16>
    %c0_8 = arith.constant 0 : index
    %c0_9 = arith.constant 0 : index
    %14 = vector.load %arg4[%c0_8, %c0_9] : memref<128x128xbf16, #tpu.memory_space<vmem>>, vector<128x128xbf16>
    %cst_10 = arith.constant dense<0.000000e+00> : vector<256x128xf32>
    %15 = tpu.matmul %13, %14, %cst_10 {dimension_numbers = #tpu.dot_dimension_numbers<[1], [0], [0], [1], [0, 0, 1, 1], [], []>} : vector<256x128xbf16>, vector<128x128xbf16>, vector<256x128xf32> -> vector<256x128xf32>
    %16 = arith.addf %12, %15 : vector<256x128xf32>
    %c0_11 = arith.constant 0 : index
    %c0_12 = arith.constant 0 : index
    %17 = vector.load %arg10[%c0_11, %c0_12] : memref<256x128xf32, #tpu.memory_space<vmem>>, vector<256x128xf32>
    tpu.vector_store %arg10[%c0_11, %c0_12], %16 {strides = array<i32>} : memref<256x128xf32, #tpu.memory_space<vmem>>, vector<256x128xf32>,
    %c0_i32_13 = arith.constant 0 : i32
    %18 = arith.cmpi eq, %arg2, %c0_i32_13 : i32
    %19 = arith.extui %18 : i1 to i32
    %c0_i32_14 = arith.constant 0 : i32
    %20 = arith.cmpi ne, %19, %c0_i32_14 : i32
    scf.if %20 {
      %c0_15 = arith.constant 0 : index
      %c0_16 = arith.constant 0 : index
      %21 = vector.load %arg10[%c0_15, %c0_16] : memref<256x128xf32, #tpu.memory_space<vmem>>, vector<256x128xf32>
      %c0_17 = arith.constant 0 : index
      %c0_18 = arith.constant 0 : index
      %22 = vector.load %arg7[%c0_17, %c0_18] : memref<1x128xf32, #tpu.memory_space<vmem>>, vector<1x128xf32>
      %23 = vector.broadcast %22 : vector<1x128xf32> to vector<256x128xf32>
      %24 = arith.mulf %21, %23 : vector<256x128xf32>
      %c0_19 = arith.constant 0 : index
      %c0_20 = arith.constant 0 : index
      %25 = vector.load %arg8[%c0_19, %c0_20] : memref<1x128xf32, #tpu.memory_space<vmem>>, vector<1x128xf32>
      %26 = vector.broadcast %25 : vector<1x128xf32> to vector<256x128xf32>
      %27 = arith.addf %24, %26 : vector<256x128xf32>
      %cst_21 = arith.constant 0.000000e+00 : f32
      %28 = vector.broadcast %cst_21 : f32 to vector<256x128xf32>
      %29 = arith.maximumf %27, %28 : vector<256x128xf32>
      %c0_22 = arith.constant 0 : index
      %c0_23 = arith.constant 0 : index
      %30 = vector.load %arg9[%c0_22, %c0_23] : memref<256x128xf32, #tpu.memory_space<vmem>>, vector<256x128xf32>
      tpu.vector_store %arg9[%c0_22, %c0_23], %29 {strides = array<i32>} : memref<256x128xf32, #tpu.memory_space<vmem>>, vector<256x128xf32>,
    } else {
    }
    return
  }
  func.func @transform_0(%arg0: i32, %arg1: i32, %arg2: i32) -> (i32, i32) {
    %c0_i32 = arith.constant 0 : i32
    return %arg0, %arg2 : i32, i32
  }
  func.func @transform_1(%arg0: i32, %arg1: i32, %arg2: i32) -> (i32, i32) {
    %c0_i32 = arith.constant 0 : i32
    return %arg2, %arg1 : i32, i32
  }
  func.func @transform_2(%arg0: i32, %arg1: i32, %arg2: i32) -> (i32, i32) {
    %c0_i32 = arith.constant 0 : i32
    %c0_i32_0 = arith.constant 0 : i32
    return %c0_i32, %arg2 : i32, i32
  }
  func.func @transform_3(%arg0: i32, %arg1: i32, %arg2: i32) -> (i32, i32) {
    %c0_i32 = arith.constant 0 : i32
    %c0_i32_0 = arith.constant 0 : i32
    return %c0_i32, %arg2 : i32, i32
  }
  func.func @transform_4(%arg0: i32, %arg1: i32, %arg2: i32) -> (i32, i32) {
    %c0_i32 = arith.constant 0 : i32
    %c0_i32_0 = arith.constant 0 : i32
    return %c0_i32, %arg1 : i32, i32
  }
  func.func @transform_5(%arg0: i32, %arg1: i32, %arg2: i32) -> (i32, i32) {
    %c0_i32 = arith.constant 0 : i32
    %c0_i32_0 = arith.constant 0 : i32
    return %c0_i32, %arg1 : i32, i32
  }
  func.func @transform_6(%arg0: i32, %arg1: i32, %arg2: i32) -> (i32, i32) {
    %c0_i32 = arith.constant 0 : i32
    return %arg0, %arg1 : i32, i32
  }
}

module attributes {stable_mosaic.version = 11 : i64} {
  func.func @_gate_add_kernel(%arg0: i32, %arg1: i32, %arg2: memref<1x256x128xf32, #tpu.memory_space<vmem>>, %arg3: memref<1x256x128xf32, #tpu.memory_space<vmem>>, %arg4: memref<1x1x128xf32, #tpu.memory_space<vmem>>, %arg5: memref<1x256x128xf32, #tpu.memory_space<vmem>>) attributes {dimension_semantics = [#tpu.dimension_semantics<parallel>, #tpu.dimension_semantics<parallel>], iteration_bounds = array<i64: 2, 1>, scalar_prefetch = 0 : i64, scratch_operands = 0 : i64, tpu.core_type = #tpu.core_type<tc>, window_params = [{transform_indices = @transform_0, window_bounds = array<i64: 1, 256, 128>}, {transform_indices = @transform_1, window_bounds = array<i64: 1, 256, 128>}, {transform_indices = @transform_2, window_bounds = array<i64: 1, 1, 128>}, {transform_indices = @transform_3, window_bounds = array<i64: 1, 256, 128>}]} {
    %c0 = arith.constant 0 : index
    %c0_0 = arith.constant 0 : index
    %c0_1 = arith.constant 0 : index
    %0 = vector.load %arg2[%c0, %c0_0, %c0_1] : memref<1x256x128xf32, #tpu.memory_space<vmem>>, vector<1x256x128xf32>
    %1 = vector.shape_cast %0 : vector<1x256x128xf32> to vector<256x128xf32>
    %c0_2 = arith.constant 0 : index
    %c0_3 = arith.constant 0 : index
    %c0_4 = arith.constant 0 : index
    %2 = vector.load %arg4[%c0_2, %c0_3, %c0_4] : memref<1x1x128xf32, #tpu.memory_space<vmem>>, vector<1x1x128xf32>
    %3 = vector.shape_cast %2 : vector<1x1x128xf32> to vector<1x128xf32>
    %4 = vector.broadcast %3 : vector<1x128xf32> to vector<256x128xf32>
    %5 = arith.mulf %1, %4 : vector<256x128xf32>
    %c0_5 = arith.constant 0 : index
    %c0_6 = arith.constant 0 : index
    %c0_7 = arith.constant 0 : index
    %6 = vector.load %arg3[%c0_5, %c0_6, %c0_7] : memref<1x256x128xf32, #tpu.memory_space<vmem>>, vector<1x256x128xf32>
    %7 = vector.shape_cast %6 : vector<1x256x128xf32> to vector<256x128xf32>
    %8 = arith.addf %5, %7 : vector<256x128xf32>
    %c0_8 = arith.constant 0 : index
    %c0_9 = arith.constant 0 : index
    %c0_10 = arith.constant 0 : index
    %9 = vector.load %arg5[%c0_8, %c0_9, %c0_10] : memref<1x256x128xf32, #tpu.memory_space<vmem>>, vector<1x256x128xf32>
    %10 = vector.shape_cast %9 : vector<1x256x128xf32> to vector<256x128xf32>
    %11 = vector.shape_cast %8 : vector<256x128xf32> to vector<1x256x128xf32>
    tpu.vector_store %arg5[%c0_8, %c0_9, %c0_10], %11 {strides = array<i32>} : memref<1x256x128xf32, #tpu.memory_space<vmem>>, vector<1x256x128xf32>,
    return
  }
  func.func @transform_0(%arg0: i32, %arg1: i32) -> (i32, i32, i32) {
    %c0_i32 = arith.constant 0 : i32
    %c0_i32_0 = arith.constant 0 : i32
    return %arg0, %arg1, %c0_i32 : i32, i32, i32
  }
  func.func @transform_1(%arg0: i32, %arg1: i32) -> (i32, i32, i32) {
    %c0_i32 = arith.constant 0 : i32
    %c0_i32_0 = arith.constant 0 : i32
    return %arg0, %arg1, %c0_i32 : i32, i32, i32
  }
  func.func @transform_2(%arg0: i32, %arg1: i32) -> (i32, i32, i32) {
    %c0_i32 = arith.constant 0 : i32
    %c0_i32_0 = arith.constant 0 : i32
    %c0_i32_1 = arith.constant 0 : i32
    return %arg0, %c0_i32, %c0_i32_0 : i32, i32, i32
  }
  func.func @transform_3(%arg0: i32, %arg1: i32) -> (i32, i32, i32) {
    %c0_i32 = arith.constant 0 : i32
    %c0_i32_0 = arith.constant 0 : i32
    return %arg0, %arg1, %c0_i32 : i32, i32, i32
  }
}

module attributes {stable_mosaic.version = 11 : i64} {
  func.func @kernel(%arg0: i32, %arg1: memref<1x18x18x128xf32, #tpu.memory_space<vmem>>, %arg2: memref<9x128x128xbf16, #tpu.memory_space<vmem>>, %arg3: memref<1x128xf32, #tpu.memory_space<vmem>>, %arg4: memref<1x128xf32, #tpu.memory_space<vmem>>, %arg5: memref<128x128xbf16, #tpu.memory_space<vmem>>, %arg6: memref<128x128xbf16, #tpu.memory_space<vmem>>, %arg7: memref<128x128xbf16, #tpu.memory_space<vmem>>, %arg8: memref<1x256x128xf32, #tpu.memory_space<vmem>>, %arg9: memref<1x1x128xf32, #tpu.memory_space<vmem>>, %arg10: memref<256x128xf32, #tpu.memory_space<vmem>>) attributes {dimension_semantics = [#tpu.dimension_semantics<parallel>], iteration_bounds = array<i64: 2>, scalar_prefetch = 0 : i64, scratch_operands = 1 : i64, tpu.core_type = #tpu.core_type<tc>, window_params = [{transform_indices = @transform_0, window_bounds = array<i64: 1, 18, 18, 128>}, {pipeline_mode = #tpu.pipeline_mode<synchronous>, transform_indices = @transform_1, window_bounds = array<i64: 9, 128, 128>}, {pipeline_mode = #tpu.pipeline_mode<synchronous>, transform_indices = @transform_2, window_bounds = array<i64: 1, 128>}, {pipeline_mode = #tpu.pipeline_mode<synchronous>, transform_indices = @transform_3, window_bounds = array<i64: 1, 128>}, {pipeline_mode = #tpu.pipeline_mode<synchronous>, transform_indices = @transform_4, window_bounds = array<i64: 128, 128>}, {pipeline_mode = #tpu.pipeline_mode<synchronous>, transform_indices = @transform_5, window_bounds = array<i64: 128, 128>}, {pipeline_mode = #tpu.pipeline_mode<synchronous>, transform_indices = @transform_6, window_bounds = array<i64: 128, 128>}, {transform_indices = @transform_7, window_bounds = array<i64: 1, 256, 128>}, {transform_indices = @transform_8, window_bounds = array<i64: 1, 1, 128>}]} {
    %cst = arith.constant 0.000000e+00 : f32
    %0 = vector.broadcast %cst : f32 to vector<256x128xf32>
    %c0 = arith.constant 0 : index
    %c0_0 = arith.constant 0 : index
    %1 = vector.load %arg10[%c0, %c0_0] : memref<256x128xf32, #tpu.memory_space<vmem>>, vector<256x128xf32>
    tpu.vector_store %arg10[%c0, %c0_0], %0 {strides = array<i32>} : memref<256x128xf32, #tpu.memory_space<vmem>>, vector<256x128xf32>,
    %c0_1 = arith.constant 0 : index
    %c0_2 = arith.constant 0 : index
    %c0_3 = arith.constant 0 : index
    %c0_4 = arith.constant 0 : index
    %2 = vector.load %arg1[%c0_1, %c0_2, %c0_3, %c0_4] : memref<1x18x18x128xf32, #tpu.memory_space<vmem>>, vector<1x16x16x128xf32>
    %3 = vector.shape_cast %2 : vector<1x16x16x128xf32> to vector<16x16x128xf32>
    %c0_5 = arith.constant 0 : index
    %c0_6 = arith.constant 0 : index
    %4 = vector.load %arg10[%c0_5, %c0_6] : memref<256x128xf32, #tpu.memory_space<vmem>>, vector<256x128xf32>
    %5 = vector.shape_cast %3 : vector<16x16x128xf32> to vector<256x128xf32>
    %6 = arith.truncf %5 : vector<256x128xf32> to vector<256x128xbf16>
    %c0_7 = arith.constant 0 : index
    %c0_8 = arith.constant 0 : index
    %c0_9 = arith.constant 0 : index
    %7 = vector.load %arg2[%c0_7, %c0_8, %c0_9] : memref<9x128x128xbf16, #tpu.memory_space<vmem>>, vector<1x128x128xbf16>
    %8 = vector.shape_cast %7 : vector<1x128x128xbf16> to vector<128x128xbf16>
    %cst_10 = arith.constant dense<0.000000e+00> : vector<256x128xf32>
    %9 = tpu.matmul %6, %8, %cst_10 {dimension_numbers = #tpu.dot_dimension_numbers<[1], [0], [0], [1], [0, 0, 1, 1], [], []>} : vector<256x128xbf16>, vector<128x128xbf16>, vector<256x128xf32> -> vector<256x128xf32>
    %10 = arith.addf %4, %9 : vector<256x128xf32>
    %c0_11 = arith.constant 0 : index
    %c0_12 = arith.constant 0 : index
    %11 = vector.load %arg10[%c0_11, %c0_12] : memref<256x128xf32, #tpu.memory_space<vmem>>, vector<256x128xf32>
    tpu.vector_store %arg10[%c0_11, %c0_12], %10 {strides = array<i32>} : memref<256x128xf32, #tpu.memory_space<vmem>>, vector<256x128xf32>,
    %c0_13 = arith.constant 0 : index
    %c0_14 = arith.constant 0 : index
    %c1 = arith.constant 1 : index
    %c0_15 = arith.constant 0 : index
    %12 = vector.load %arg1[%c0_13, %c0_14, %c1, %c0_15] : memref<1x18x18x128xf32, #tpu.memory_space<vmem>>, vector<1x16x16x128xf32>
    %13 = vector.shape_cast %12 : vector<1x16x16x128xf32> to vector<16x16x128xf32>
    %c0_16 = arith.constant 0 : index
    %c0_17 = arith.constant 0 : index
    %14 = vector.load %arg10[%c0_16, %c0_17] : memref<256x128xf32, #tpu.memory_space<vmem>>, vector<256x128xf32>
    %15 = vector.shape_cast %13 : vector<16x16x128xf32> to vector<256x128xf32>
    %16 = arith.truncf %15 : vector<256x128xf32> to vector<256x128xbf16>
    %c1_18 = arith.constant 1 : index
    %c0_19 = arith.constant 0 : index
    %c0_20 = arith.constant 0 : index
    %17 = vector.load %arg2[%c1_18, %c0_19, %c0_20] : memref<9x128x128xbf16, #tpu.memory_space<vmem>>, vector<1x128x128xbf16>
    %18 = vector.shape_cast %17 : vector<1x128x128xbf16> to vector<128x128xbf16>
    %cst_21 = arith.constant dense<0.000000e+00> : vector<256x128xf32>
    %19 = tpu.matmul %16, %18, %cst_21 {dimension_numbers = #tpu.dot_dimension_numbers<[1], [0], [0], [1], [0, 0, 1, 1], [], []>} : vector<256x128xbf16>, vector<128x128xbf16>, vector<256x128xf32> -> vector<256x128xf32>
    %20 = arith.addf %14, %19 : vector<256x128xf32>
    %c0_22 = arith.constant 0 : index
    %c0_23 = arith.constant 0 : index
    %21 = vector.load %arg10[%c0_22, %c0_23] : memref<256x128xf32, #tpu.memory_space<vmem>>, vector<256x128xf32>
    tpu.vector_store %arg10[%c0_22, %c0_23], %20 {strides = array<i32>} : memref<256x128xf32, #tpu.memory_space<vmem>>, vector<256x128xf32>,
    %c0_24 = arith.constant 0 : index
    %c0_25 = arith.constant 0 : index
    %c2 = arith.constant 2 : index
    %c0_26 = arith.constant 0 : index
    %22 = vector.load %arg1[%c0_24, %c0_25, %c2, %c0_26] : memref<1x18x18x128xf32, #tpu.memory_space<vmem>>, vector<1x16x16x128xf32>
    %23 = vector.shape_cast %22 : vector<1x16x16x128xf32> to vector<16x16x128xf32>
    %c0_27 = arith.constant 0 : index
    %c0_28 = arith.constant 0 : index
    %24 = vector.load %arg10[%c0_27, %c0_28] : memref<256x128xf32, #tpu.memory_space<vmem>>, vector<256x128xf32>
    %25 = vector.shape_cast %23 : vector<16x16x128xf32> to vector<256x128xf32>
    %26 = arith.truncf %25 : vector<256x128xf32> to vector<256x128xbf16>
    %c2_29 = arith.constant 2 : index
    %c0_30 = arith.constant 0 : index
    %c0_31 = arith.constant 0 : index
    %27 = vector.load %arg2[%c2_29, %c0_30, %c0_31] : memref<9x128x128xbf16, #tpu.memory_space<vmem>>, vector<1x128x128xbf16>
    %28 = vector.shape_cast %27 : vector<1x128x128xbf16> to vector<128x128xbf16>
    %cst_32 = arith.constant dense<0.000000e+00> : vector<256x128xf32>
    %29 = tpu.matmul %26, %28, %cst_32 {dimension_numbers = #tpu.dot_dimension_numbers<[1], [0], [0], [1], [0, 0, 1, 1], [], []>} : vector<256x128xbf16>, vector<128x128xbf16>, vector<256x128xf32> -> vector<256x128xf32>
    %30 = arith.addf %24, %29 : vector<256x128xf32>
    %c0_33 = arith.constant 0 : index
    %c0_34 = arith.constant 0 : index
    %31 = vector.load %arg10[%c0_33, %c0_34] : memref<256x128xf32, #tpu.memory_space<vmem>>, vector<256x128xf32>
    tpu.vector_store %arg10[%c0_33, %c0_34], %30 {strides = array<i32>} : memref<256x128xf32, #tpu.memory_space<vmem>>, vector<256x128xf32>,
    %c0_35 = arith.constant 0 : index
    %c1_36 = arith.constant 1 : index
    %c0_37 = arith.constant 0 : index
    %c0_38 = arith.constant 0 : index
    %32 = vector.load %arg1[%c0_35, %c1_36, %c0_37, %c0_38] : memref<1x18x18x128xf32, #tpu.memory_space<vmem>>, vector<1x16x16x128xf32>
    %33 = vector.shape_cast %32 : vector<1x16x16x128xf32> to vector<16x16x128xf32>
    %c0_39 = arith.constant 0 : index
    %c0_40 = arith.constant 0 : index
    %34 = vector.load %arg10[%c0_39, %c0_40] : memref<256x128xf32, #tpu.memory_space<vmem>>, vector<256x128xf32>
    %35 = vector.shape_cast %33 : vector<16x16x128xf32> to vector<256x128xf32>
    %36 = arith.truncf %35 : vector<256x128xf32> to vector<256x128xbf16>
    %c3 = arith.constant 3 : index
    %c0_41 = arith.constant 0 : index
    %c0_42 = arith.constant 0 : index
    %37 = vector.load %arg2[%c3, %c0_41, %c0_42] : memref<9x128x128xbf16, #tpu.memory_space<vmem>>, vector<1x128x128xbf16>
    %38 = vector.shape_cast %37 : vector<1x128x128xbf16> to vector<128x128xbf16>
    %cst_43 = arith.constant dense<0.000000e+00> : vector<256x128xf32>
    %39 = tpu.matmul %36, %38, %cst_43 {dimension_numbers = #tpu.dot_dimension_numbers<[1], [0], [0], [1], [0, 0, 1, 1], [], []>} : vector<256x128xbf16>, vector<128x128xbf16>, vector<256x128xf32> -> vector<256x128xf32>
    %40 = arith.addf %34, %39 : vector<256x128xf32>
    %c0_44 = arith.constant 0 : index
    %c0_45 = arith.constant 0 : index
    %41 = vector.load %arg10[%c0_44, %c0_45] : memref<256x128xf32, #tpu.memory_space<vmem>>, vector<256x128xf32>
    tpu.vector_store %arg10[%c0_44, %c0_45], %40 {strides = array<i32>} : memref<256x128xf32, #tpu.memory_space<vmem>>, vector<256x128xf32>,
    %c0_46 = arith.constant 0 : index
    %c1_47 = arith.constant 1 : index
    %c1_48 = arith.constant 1 : index
    %c0_49 = arith.constant 0 : index
    %42 = vector.load %arg1[%c0_46, %c1_47, %c1_48, %c0_49] : memref<1x18x18x128xf32, #tpu.memory_space<vmem>>, vector<1x16x16x128xf32>
    %43 = vector.shape_cast %42 : vector<1x16x16x128xf32> to vector<16x16x128xf32>
    %c0_50 = arith.constant 0 : index
    %c0_51 = arith.constant 0 : index
    %44 = vector.load %arg10[%c0_50, %c0_51] : memref<256x128xf32, #tpu.memory_space<vmem>>, vector<256x128xf32>
    %45 = vector.shape_cast %43 : vector<16x16x128xf32> to vector<256x128xf32>
    %46 = arith.truncf %45 : vector<256x128xf32> to vector<256x128xbf16>
    %c4 = arith.constant 4 : index
    %c0_52 = arith.constant 0 : index
    %c0_53 = arith.constant 0 : index
    %47 = vector.load %arg2[%c4, %c0_52, %c0_53] : memref<9x128x128xbf16, #tpu.memory_space<vmem>>, vector<1x128x128xbf16>
    %48 = vector.shape_cast %47 : vector<1x128x128xbf16> to vector<128x128xbf16>
    %cst_54 = arith.constant dense<0.000000e+00> : vector<256x128xf32>
    %49 = tpu.matmul %46, %48, %cst_54 {dimension_numbers = #tpu.dot_dimension_numbers<[1], [0], [0], [1], [0, 0, 1, 1], [], []>} : vector<256x128xbf16>, vector<128x128xbf16>, vector<256x128xf32> -> vector<256x128xf32>
    %50 = arith.addf %44, %49 : vector<256x128xf32>
    %c0_55 = arith.constant 0 : index
    %c0_56 = arith.constant 0 : index
    %51 = vector.load %arg10[%c0_55, %c0_56] : memref<256x128xf32, #tpu.memory_space<vmem>>, vector<256x128xf32>
    tpu.vector_store %arg10[%c0_55, %c0_56], %50 {strides = array<i32>} : memref<256x128xf32, #tpu.memory_space<vmem>>, vector<256x128xf32>,
    %c0_57 = arith.constant 0 : index
    %c1_58 = arith.constant 1 : index
    %c2_59 = arith.constant 2 : index
    %c0_60 = arith.constant 0 : index
    %52 = vector.load %arg1[%c0_57, %c1_58, %c2_59, %c0_60] : memref<1x18x18x128xf32, #tpu.memory_space<vmem>>, vector<1x16x16x128xf32>
    %53 = vector.shape_cast %52 : vector<1x16x16x128xf32> to vector<16x16x128xf32>
    %c0_61 = arith.constant 0 : index
    %c0_62 = arith.constant 0 : index
    %54 = vector.load %arg10[%c0_61, %c0_62] : memref<256x128xf32, #tpu.memory_space<vmem>>, vector<256x128xf32>
    %55 = vector.shape_cast %53 : vector<16x16x128xf32> to vector<256x128xf32>
    %56 = arith.truncf %55 : vector<256x128xf32> to vector<256x128xbf16>
    %c5 = arith.constant 5 : index
    %c0_63 = arith.constant 0 : index
    %c0_64 = arith.constant 0 : index
    %57 = vector.load %arg2[%c5, %c0_63, %c0_64] : memref<9x128x128xbf16, #tpu.memory_space<vmem>>, vector<1x128x128xbf16>
    %58 = vector.shape_cast %57 : vector<1x128x128xbf16> to vector<128x128xbf16>
    %cst_65 = arith.constant dense<0.000000e+00> : vector<256x128xf32>
    %59 = tpu.matmul %56, %58, %cst_65 {dimension_numbers = #tpu.dot_dimension_numbers<[1], [0], [0], [1], [0, 0, 1, 1], [], []>} : vector<256x128xbf16>, vector<128x128xbf16>, vector<256x128xf32> -> vector<256x128xf32>
    %60 = arith.addf %54, %59 : vector<256x128xf32>
    %c0_66 = arith.constant 0 : index
    %c0_67 = arith.constant 0 : index
    %61 = vector.load %arg10[%c0_66, %c0_67] : memref<256x128xf32, #tpu.memory_space<vmem>>, vector<256x128xf32>
    tpu.vector_store %arg10[%c0_66, %c0_67], %60 {strides = array<i32>} : memref<256x128xf32, #tpu.memory_space<vmem>>, vector<256x128xf32>,
    %c0_68 = arith.constant 0 : index
    %c2_69 = arith.constant 2 : index
    %c0_70 = arith.constant 0 : index
    %c0_71 = arith.constant 0 : index
    %62 = vector.load %arg1[%c0_68, %c2_69, %c0_70, %c0_71] : memref<1x18x18x128xf32, #tpu.memory_space<vmem>>, vector<1x16x16x128xf32>
    %63 = vector.shape_cast %62 : vector<1x16x16x128xf32> to vector<16x16x128xf32>
    %c0_72 = arith.constant 0 : index
    %c0_73 = arith.constant 0 : index
    %64 = vector.load %arg10[%c0_72, %c0_73] : memref<256x128xf32, #tpu.memory_space<vmem>>, vector<256x128xf32>
    %65 = vector.shape_cast %63 : vector<16x16x128xf32> to vector<256x128xf32>
    %66 = arith.truncf %65 : vector<256x128xf32> to vector<256x128xbf16>
    %c6 = arith.constant 6 : index
    %c0_74 = arith.constant 0 : index
    %c0_75 = arith.constant 0 : index
    %67 = vector.load %arg2[%c6, %c0_74, %c0_75] : memref<9x128x128xbf16, #tpu.memory_space<vmem>>, vector<1x128x128xbf16>
    %68 = vector.shape_cast %67 : vector<1x128x128xbf16> to vector<128x128xbf16>
    %cst_76 = arith.constant dense<0.000000e+00> : vector<256x128xf32>
    %69 = tpu.matmul %66, %68, %cst_76 {dimension_numbers = #tpu.dot_dimension_numbers<[1], [0], [0], [1], [0, 0, 1, 1], [], []>} : vector<256x128xbf16>, vector<128x128xbf16>, vector<256x128xf32> -> vector<256x128xf32>
    %70 = arith.addf %64, %69 : vector<256x128xf32>
    %c0_77 = arith.constant 0 : index
    %c0_78 = arith.constant 0 : index
    %71 = vector.load %arg10[%c0_77, %c0_78] : memref<256x128xf32, #tpu.memory_space<vmem>>, vector<256x128xf32>
    tpu.vector_store %arg10[%c0_77, %c0_78], %70 {strides = array<i32>} : memref<256x128xf32, #tpu.memory_space<vmem>>, vector<256x128xf32>,
    %c0_79 = arith.constant 0 : index
    %c2_80 = arith.constant 2 : index
    %c1_81 = arith.constant 1 : index
    %c0_82 = arith.constant 0 : index
    %72 = vector.load %arg1[%c0_79, %c2_80, %c1_81, %c0_82] : memref<1x18x18x128xf32, #tpu.memory_space<vmem>>, vector<1x16x16x128xf32>
    %73 = vector.shape_cast %72 : vector<1x16x16x128xf32> to vector<16x16x128xf32>
    %c0_83 = arith.constant 0 : index
    %c0_84 = arith.constant 0 : index
    %74 = vector.load %arg10[%c0_83, %c0_84] : memref<256x128xf32, #tpu.memory_space<vmem>>, vector<256x128xf32>
    %75 = vector.shape_cast %73 : vector<16x16x128xf32> to vector<256x128xf32>
    %76 = arith.truncf %75 : vector<256x128xf32> to vector<256x128xbf16>
    %c7 = arith.constant 7 : index
    %c0_85 = arith.constant 0 : index
    %c0_86 = arith.constant 0 : index
    %77 = vector.load %arg2[%c7, %c0_85, %c0_86] : memref<9x128x128xbf16, #tpu.memory_space<vmem>>, vector<1x128x128xbf16>
    %78 = vector.shape_cast %77 : vector<1x128x128xbf16> to vector<128x128xbf16>
    %cst_87 = arith.constant dense<0.000000e+00> : vector<256x128xf32>
    %79 = tpu.matmul %76, %78, %cst_87 {dimension_numbers = #tpu.dot_dimension_numbers<[1], [0], [0], [1], [0, 0, 1, 1], [], []>} : vector<256x128xbf16>, vector<128x128xbf16>, vector<256x128xf32> -> vector<256x128xf32>
    %80 = arith.addf %74, %79 : vector<256x128xf32>
    %c0_88 = arith.constant 0 : index
    %c0_89 = arith.constant 0 : index
    %81 = vector.load %arg10[%c0_88, %c0_89] : memref<256x128xf32, #tpu.memory_space<vmem>>, vector<256x128xf32>
    tpu.vector_store %arg10[%c0_88, %c0_89], %80 {strides = array<i32>} : memref<256x128xf32, #tpu.memory_space<vmem>>, vector<256x128xf32>,
    %c0_90 = arith.constant 0 : index
    %c2_91 = arith.constant 2 : index
    %c2_92 = arith.constant 2 : index
    %c0_93 = arith.constant 0 : index
    %82 = vector.load %arg1[%c0_90, %c2_91, %c2_92, %c0_93] : memref<1x18x18x128xf32, #tpu.memory_space<vmem>>, vector<1x16x16x128xf32>
    %83 = vector.shape_cast %82 : vector<1x16x16x128xf32> to vector<16x16x128xf32>
    %c0_94 = arith.constant 0 : index
    %c0_95 = arith.constant 0 : index
    %84 = vector.load %arg10[%c0_94, %c0_95] : memref<256x128xf32, #tpu.memory_space<vmem>>, vector<256x128xf32>
    %85 = vector.shape_cast %83 : vector<16x16x128xf32> to vector<256x128xf32>
    %86 = arith.truncf %85 : vector<256x128xf32> to vector<256x128xbf16>
    %c8 = arith.constant 8 : index
    %c0_96 = arith.constant 0 : index
    %c0_97 = arith.constant 0 : index
    %87 = vector.load %arg2[%c8, %c0_96, %c0_97] : memref<9x128x128xbf16, #tpu.memory_space<vmem>>, vector<1x128x128xbf16>
    %88 = vector.shape_cast %87 : vector<1x128x128xbf16> to vector<128x128xbf16>
    %cst_98 = arith.constant dense<0.000000e+00> : vector<256x128xf32>
    %89 = tpu.matmul %86, %88, %cst_98 {dimension_numbers = #tpu.dot_dimension_numbers<[1], [0], [0], [1], [0, 0, 1, 1], [], []>} : vector<256x128xbf16>, vector<128x128xbf16>, vector<256x128xf32> -> vector<256x128xf32>
    %90 = arith.addf %84, %89 : vector<256x128xf32>
    %c0_99 = arith.constant 0 : index
    %c0_100 = arith.constant 0 : index
    %91 = vector.load %arg10[%c0_99, %c0_100] : memref<256x128xf32, #tpu.memory_space<vmem>>, vector<256x128xf32>
    tpu.vector_store %arg10[%c0_99, %c0_100], %90 {strides = array<i32>} : memref<256x128xf32, #tpu.memory_space<vmem>>, vector<256x128xf32>,
    %c0_101 = arith.constant 0 : index
    %c0_102 = arith.constant 0 : index
    %92 = vector.load %arg10[%c0_101, %c0_102] : memref<256x128xf32, #tpu.memory_space<vmem>>, vector<256x128xf32>
    %c0_103 = arith.constant 0 : index
    %c0_104 = arith.constant 0 : index
    %93 = vector.load %arg3[%c0_103, %c0_104] : memref<1x128xf32, #tpu.memory_space<vmem>>, vector<1x128xf32>
    %94 = vector.broadcast %93 : vector<1x128xf32> to vector<256x128xf32>
    %95 = arith.mulf %92, %94 : vector<256x128xf32>
    %c0_105 = arith.constant 0 : index
    %c0_106 = arith.constant 0 : index
    %96 = vector.load %arg4[%c0_105, %c0_106] : memref<1x128xf32, #tpu.memory_space<vmem>>, vector<1x128xf32>
    %97 = vector.broadcast %96 : vector<1x128xf32> to vector<256x128xf32>
    %98 = arith.addf %95, %97 : vector<256x128xf32>
    %cst_107 = arith.constant 0.000000e+00 : f32
    %99 = vector.broadcast %cst_107 : f32 to vector<256x128xf32>
    %100 = arith.maximumf %98, %99 : vector<256x128xf32>
    %101 = arith.truncf %100 : vector<256x128xf32> to vector<256x128xbf16>
    %c0_108 = arith.constant 0 : index
    %c0_109 = arith.constant 0 : index
    %102 = vector.load %arg5[%c0_108, %c0_109] : memref<128x128xbf16, #tpu.memory_space<vmem>>, vector<128x128xbf16>
    %cst_110 = arith.constant dense<0.000000e+00> : vector<256x128xf32>
    %103 = tpu.matmul %101, %102, %cst_110 {dimension_numbers = #tpu.dot_dimension_numbers<[1], [0], [0], [1], [0, 0, 1, 1], [], []>} : vector<256x128xbf16>, vector<128x128xbf16>, vector<256x128xf32> -> vector<256x128xf32>
    %c0_111 = arith.constant 0 : index
    %c0_112 = arith.constant 0 : index
    %c0_113 = arith.constant 0 : index
    %104 = vector.load %arg8[%c0_111, %c0_112, %c0_113] : memref<1x256x128xf32, #tpu.memory_space<vmem>>, vector<1x256x128xf32>
    %105 = vector.shape_cast %104 : vector<1x256x128xf32> to vector<256x128xf32>
    %106 = vector.shape_cast %103 : vector<256x128xf32> to vector<1x256x128xf32>
    tpu.vector_store %arg8[%c0_111, %c0_112, %c0_113], %106 {strides = array<i32>} : memref<1x256x128xf32, #tpu.memory_space<vmem>>, vector<1x256x128xf32>,
    %cst_114 = arith.constant dense<0.000000e+00> : vector<128xf32>
    %107 = vector.multi_reduction <add>, %103, %cst_114 [0] : vector<256x128xf32> to vector<128xf32>
    %108 = vector.shape_cast %107 : vector<128xf32> to vector<1x128xf32>
    %cst_115 = arith.constant 3.906250e-03 : f32
    %109 = vector.broadcast %cst_115 : f32 to vector<1x128xf32>
    %110 = arith.mulf %108, %109 : vector<1x128xf32>
    %111 = arith.truncf %110 : vector<1x128xf32> to vector<1x128xbf16>
    %c0_116 = arith.constant 0 : index
    %c0_117 = arith.constant 0 : index
    %112 = vector.load %arg6[%c0_116, %c0_117] : memref<128x128xbf16, #tpu.memory_space<vmem>>, vector<128x128xbf16>
    %cst_118 = arith.constant dense<0.000000e+00> : vector<1x128xf32>
    %113 = tpu.matmul %111, %112, %cst_118 {dimension_numbers = #tpu.dot_dimension_numbers<[1], [0], [0], [1], [0, 0, 1, 1], [], []>} : vector<1x128xbf16>, vector<128x128xbf16>, vector<1x128xf32> -> vector<1x128xf32>
    %cst_119 = arith.constant 0.000000e+00 : f32
    %114 = vector.broadcast %cst_119 : f32 to vector<1x128xf32>
    %115 = arith.maximumf %113, %114 : vector<1x128xf32>
    %116 = arith.truncf %115 : vector<1x128xf32> to vector<1x128xbf16>
    %c0_120 = arith.constant 0 : index
    %c0_121 = arith.constant 0 : index
    %117 = vector.load %arg7[%c0_120, %c0_121] : memref<128x128xbf16, #tpu.memory_space<vmem>>, vector<128x128xbf16>
    %cst_122 = arith.constant dense<0.000000e+00> : vector<1x128xf32>
    %118 = tpu.matmul %116, %117, %cst_122 {dimension_numbers = #tpu.dot_dimension_numbers<[1], [0], [0], [1], [0, 0, 1, 1], [], []>} : vector<1x128xbf16>, vector<128x128xbf16>, vector<1x128xf32> -> vector<1x128xf32>
    %119 = arith.negf %118 : vector<1x128xf32>
    %120 = math.exp %119 : vector<1x128xf32>
    %cst_123 = arith.constant 1.000000e+00 : f32
    %121 = vector.broadcast %cst_123 : f32 to vector<1x128xf32>
    %122 = arith.addf %121, %120 : vector<1x128xf32>
    %123 = arith.divf %121, %122 : vector<1x128xf32>
    %c0_124 = arith.constant 0 : index
    %c0_125 = arith.constant 0 : index
    %c0_126 = arith.constant 0 : index
    %124 = vector.load %arg9[%c0_124, %c0_125, %c0_126] : memref<1x1x128xf32, #tpu.memory_space<vmem>>, vector<1x1x128xf32>
    %125 = vector.shape_cast %124 : vector<1x1x128xf32> to vector<1x128xf32>
    %126 = vector.shape_cast %123 : vector<1x128xf32> to vector<1x1x128xf32>
    tpu.vector_store %arg9[%c0_124, %c0_125, %c0_126], %126 {strides = array<i32>} : memref<1x1x128xf32, #tpu.memory_space<vmem>>, vector<1x1x128xf32>,
    return
  }
  func.func @transform_0(%arg0: i32) -> (i32, i32, i32, i32) {
    %c0_i32 = arith.constant 0 : i32
    %c0_i32_0 = arith.constant 0 : i32
    %c0_i32_1 = arith.constant 0 : i32
    %c0_i32_2 = arith.constant 0 : i32
    return %arg0, %c0_i32, %c0_i32_0, %c0_i32_1 : i32, i32, i32, i32
  }
  func.func @transform_1(%arg0: i32) -> (i32, i32, i32) {
    %c0_i32 = arith.constant 0 : i32
    %c0_i32_0 = arith.constant 0 : i32
    %c0_i32_1 = arith.constant 0 : i32
    %c0_i32_2 = arith.constant 0 : i32
    return %c0_i32, %c0_i32_0, %c0_i32_1 : i32, i32, i32
  }
  func.func @transform_2(%arg0: i32) -> (i32, i32) {
    %c0_i32 = arith.constant 0 : i32
    %c0_i32_0 = arith.constant 0 : i32
    %c0_i32_1 = arith.constant 0 : i32
    return %c0_i32, %c0_i32_0 : i32, i32
  }
  func.func @transform_3(%arg0: i32) -> (i32, i32) {
    %c0_i32 = arith.constant 0 : i32
    %c0_i32_0 = arith.constant 0 : i32
    %c0_i32_1 = arith.constant 0 : i32
    return %c0_i32, %c0_i32_0 : i32, i32
  }
  func.func @transform_4(%arg0: i32) -> (i32, i32) {
    %c0_i32 = arith.constant 0 : i32
    %c0_i32_0 = arith.constant 0 : i32
    %c0_i32_1 = arith.constant 0 : i32
    return %c0_i32, %c0_i32_0 : i32, i32
  }
  func.func @transform_5(%arg0: i32) -> (i32, i32) {
    %c0_i32 = arith.constant 0 : i32
    %c0_i32_0 = arith.constant 0 : i32
    %c0_i32_1 = arith.constant 0 : i32
    return %c0_i32, %c0_i32_0 : i32, i32
  }
  func.func @transform_6(%arg0: i32) -> (i32, i32) {
    %c0_i32 = arith.constant 0 : i32
    %c0_i32_0 = arith.constant 0 : i32
    %c0_i32_1 = arith.constant 0 : i32
    return %c0_i32, %c0_i32_0 : i32, i32
  }
  func.func @transform_7(%arg0: i32) -> (i32, i32, i32) {
    %c0_i32 = arith.constant 0 : i32
    %c0_i32_0 = arith.constant 0 : i32
    %c0_i32_1 = arith.constant 0 : i32
    return %arg0, %c0_i32, %c0_i32_0 : i32, i32, i32
  }
  func.func @transform_8(%arg0: i32) -> (i32, i32, i32) {
    %c0_i32 = arith.constant 0 : i32
    %c0_i32_0 = arith.constant 0 : i32
    %c0_i32_1 = arith.constant 0 : i32
    return %arg0, %c0_i32, %c0_i32_0 : i32, i32, i32
  }
}

</mosaic_0001>

<bundles_post_ra>
// kernel: _lambda_.6
= control target key start
LH: loop header
LB: loop body
LE: loop exit
PB: predicated region body
PF: predicated region fallthrough
CT: control target
= control target key end

     0   :  { %s1199_s15 = smov 0   ;;  %s1201_s16 = smov 0   ;;  %s1405_s0 = inlined_call_operand.vmem [shape: f32[512,128], index: 0, kind: input, shape index: {}]   ;;  %s1406_s1 = inlined_call_operand.vmem [shape: bf16[128,128], index: 1, kind: input, shape index: {}]   ;;  %s1407_s2 = inlined_call_operand.vmem [shape: f32[1,128], index: 2, kind: input, shape index: {}]   ;;  %s1408_s3 = inlined_call_operand.vmem [shape: f32[1,128], index: 3, kind: input, shape index: {}]   ;;  %s1409_s4 = inlined_call_operand.vmem [shape: f32[512,128], index: 4, kind: output, shape index: {}]  }
   0x1   :  { %s1203_s17 = smov 0  }
   0x2 LB: > { %s33_s18 = sadd.s32 1, %s1168_s16  ;;  %p1013_p0 = scmp.ge.s32.totalorder %s1172_s17, 1  ;;  %s1172_s17 = sphi %s1203_s17, %s14_s17   ;;  %s1168_s16 = sphi %s1201_s16, %s1411_s16   ;;  %s1164_s15 = sphi %s1199_s15, %s1410_s15  }
   0x3   : > { %p35_p1 = scmp.ge.s32.totalorder %s33_s18, 2  ;;  %p221_p2 = scmp.lt.s32.totalorder %s1172_s17, 3 }
   0x5   : > { %s1413_s18 = smov (%p35_p1, %s33_s18), 0  ;;  %p222_p3 = pnand %p1013_p0, %p221_p2 }
   0x6   : > { %v1142_v0 = vld [vmem:[%s1406_s1] sm:$0xff] (!%p222_p3)   ;;  %s1014_s21 = sshll.u32 (!%p222_p3), %s1164_s15, 5  ;;  %v1143_v1 = vld [vmem:[%s1406_s1 + $0x8] sm:$0xff] (!%p222_p3)   ;;  %v1144_v2 = vld [vmem:[%s1406_s1 + $0x10] sm:$0xff] (!%p222_p3)  }
   0x7   : > { %225 = sbr.rel (%p222_p3) target bundleno = 279 (0x117), region = 36  ;;  %p268_p4 = scmp.lt.s32.totalorder (!%p222_p3), %s1014_s21, 63  ;;  %1054 = vmatprep.subr.bf16.mxu0 (!%p222_p3), %v1142_v0  ;;  %1102 = vmatprep.subr.bf16.mxu1 (!%p222_p3), %v1142_v0  ;;  %v1145_v3 = vld [vmem:[%s1406_s1 + $0x18] sm:$0xff] (!%p222_p3)   ;;  %v1244_v6 = vld [vmem:[%s1407_s2] ss:$0 sm:$0xff] (!%p222_p3)  ;;  %v1147_v30 = vld [vmem:[%s1406_s1 + $0x28] sm:$0xff] (!%p222_p3)  }
   0x8   : > { %1055 = vmatpush3.bf16.msra.mxu0 (!%p222_p3), %v1142_v0  ;;  %1110 = vmatpush3.bf16.msra.mxu1 (!%p222_p3), %v1142_v0  ;;  %v1251_v9 = vld [vmem:[%s1408_s3] ss:$0 sm:$0xff] (!%p222_p3)  ;;  %v1148_v42 = vld [vmem:[%s1406_s1 + $0x30] sm:$0xff] (!%p222_p3)   ;;  %v1149_v60 = vld [vmem:[%s1406_s1 + $0x38] sm:$0xff] (!%p222_p3)  }
   0x9   : > { %1056 = vmatprep.subr.bf16.mxu0 (!%p222_p3), %v1143_v1  ;;  %1103 = vmatprep.subr.bf16.mxu1 (!%p222_p3), %v1143_v1  ;;  %v1146_v16 = vld [vmem:[%s1406_s1 + $0x20] sm:$0xff] (!%p222_p3)  }
   0xc   : > { %1057 = vmatpush3.bf16.msra.mxu0 (!%p222_p3), %v1143_v1  ;;  %1111 = vmatpush3.bf16.msra.mxu1 (!%p222_p3), %v1143_v1 }
   0xd   : > { %1058 = vmatprep.subr.bf16.mxu0 (!%p222_p3), %v1144_v2  ;;  %1104 = vmatprep.subr.bf16.mxu1 (!%p222_p3), %v1144_v2 }
   0xe   : > { %s1415_s21 = smov (!%p268_p4, %s1014_s21), 63 }
   0xf   : > { %s1015_s26 = sshll.u32 %s1415_s21, 3 }
  0x10   : > { %s1234_s29 = scalar_lea.vmem %s1405_s0, %s1015_s26  ;;  %1059 = vmatpush3.bf16.msra.mxu0 %v1144_v2  ;;  %1112 = vmatpush3.bf16.msra.mxu1 %v1144_v2  ;;  %s1362_s24 = scalar_lea.vmem %s1409_s4, %s1015_s26 }
  0x11   : > { %v337_v4 = vld [vmem:[%s1234_s29] sm:$0xff]  ;;  %v338_v5 = vld [vmem:[%s1234_s29 + $0x8] sm:$0xff]  ;;  %1060 = vmatprep.subr.bf16.mxu0 %v1145_v3  ;;  %1105 = vmatprep.subr.bf16.mxu1 %v1145_v3  ;;  %v339_v21 = vld [vmem:[%s1234_s29 + $0x10] sm:$0xff] }
  0x12   : > { %v376_v7 = vmul.f32 %v1244_v6, %v337_v4  ;;  %v377_v8 = vmul.f32 %v1244_v6, %v338_v5  ;;  %v353_v10 = vld [vmem:[%s1234_s29 + $0x80] sm:$0xff]  ;;  %v354_v11 = vld [vmem:[%s1234_s29 + $0x88] sm:$0xff]  ;;  %v340_v24 = vld [vmem:[%s1234_s29 + $0x18] sm:$0xff]  ;;  %v378_v32 = vmul.f32 %v1244_v6, %v339_v21 }
  0x13   : > { %v392_v12 = vmul.f32 %v1244_v6, %v353_v10  ;;  %v393_v13 = vmul.f32 %v1244_v6, %v354_v11  ;;  %v355_v25 = vld [vmem:[%s1234_s29 + $0x90] sm:$0xff]  ;;  %v356_v26 = vld [vmem:[%s1234_s29 + $0x98] sm:$0xff]  ;;  %v341_v28 = vld [vmem:[%s1234_s29 + $0x20] sm:$0xff]  ;;  %v379_v35 = vmul.f32 %v1244_v6, %v340_v24 }
  0x14   : > { %v415_v14 = vadd.f32 %v1251_v9, %v376_v7  ;;  %v416_v15 = vadd.f32 %v1251_v9, %v377_v8  ;;  %1061 = vmatpush3.bf16.msra.mxu0 %v1145_v3  ;;  %1113 = vmatpush3.bf16.msra.mxu1 %v1145_v3  ;;  %v342_v29 = vld [vmem:[%s1234_s29 + $0x28] sm:$0xff]  ;;  %v357_v33 = vld [vmem:[%s1234_s29 + $0xa0] sm:$0xff]  ;;  %v394_v36 = vmul.f32 %v1244_v6, %v355_v25  ;;  %v343_v44 = vld [vmem:[%s1234_s29 + $0x30] sm:$0xff] }
  0x15   : > { %v431_v17 = vadd.f32 %v1251_v9, %v392_v12  ;;  %v432_v18 = vadd.f32 %v1251_v9, %v393_v13  ;;  %1062 = vmatprep.subr.bf16.mxu0 %v1146_v16  ;;  %1106 = vmatprep.subr.bf16.mxu1 %v1146_v16  ;;  %v358_v34 = vld [vmem:[%s1234_s29 + $0xa8] sm:$0xff]  ;;  %v395_v37 = vmul.f32 %v1244_v6, %v356_v26  ;;  %v344_v48 = vld [vmem:[%s1234_s29 + $0x38] sm:$0xff]  ;;  %v359_v49 = vld [vmem:[%s1234_s29 + $0xb0] sm:$0xff] }
  0x16   : > { %v447_v19 = vmax.f32 %v415_v14, 0.0  ;;  %v448_v20 = vmax.f32 %v416_v15, 0.0  ;;  %v380_v38 = vmul.f32 %v1244_v6, %v341_v28  ;;  %v381_v39 = vmul.f32 %v1244_v6, %v342_v29  ;;  %v360_v50 = vld [vmem:[%s1234_s29 + $0xb8] sm:$0xff]  ;;  %v345_v53 = vld [vmem:[%s1234_s29 + $0x40] sm:$0xff]  ;;  %v346_v57 = vld [vmem:[%s1234_s29 + $0x48] sm:$0xff] }
  0x17   : > { %v463_v22 = vmax.f32 %v431_v17, 0.0  ;;  %v464_v23 = vmax.f32 %v432_v18, 0.0  ;;  %v396_v40 = vmul.f32 %v1244_v6, %v357_v33  ;;  %v397_v41 = vmul.f32 %v1244_v6, %v358_v34  ;;  %v361_v58 = vld [vmem:[%s1234_s29 + $0xc0] sm:$0xff]  ;;  %v362_v59 = vld [vmem:[%s1234_s29 + $0xc8] sm:$0xff]  ;;  %v348_v25 = vld [vmem:[%s1234_s29 + $0x58] sm:$0xff] }
  0x18   : > { %v511_v27 = vpack.c.bf16 %v448_v20, %v447_v19  ;;  %1063 = vmatpush3.bf16.msra.mxu0 %v1146_v16  ;;  %1114 = vmatpush3.bf16.msra.mxu1 %v1146_v16  ;;  %v417_v43 = vadd.f32 %v1251_v9, %v378_v32  ;;  %v418_v45 = vadd.f32 %v1251_v9, %v379_v35  ;;  %v347_v20 = vld [vmem:[%s1234_s29 + $0x50] sm:$0xff] }
  0x19   : > { %v519_v31 = vpack.c.bf16 %v464_v23, %v463_v22  ;;  %1064 = vmatprep.subr.bf16.mxu0 %v1147_v30  ;;  %1107 = vmatprep.subr.bf16.mxu1 %v1147_v30  ;;  %v433_v46 = vadd.f32 %v1251_v9, %v394_v36  ;;  %v434_v47 = vadd.f32 %v1251_v9, %v395_v37  ;;  %v363_v26 = vld [vmem:[%s1234_s29 + $0xd0] sm:$0xff]  ;;  %v350_v36 = vld [vmem:[%s1234_s29 + $0x68] sm:$0xff]  ;;  %v365_v37 = vld [vmem:[%s1234_s29 + $0xe0] sm:$0xff] }
  0x1a   : > { %1070 = vmatprep.mubr.bf16.mxu0 %v511_v27  ;;  %v419_v51 = vadd.f32 %v1251_v9, %v380_v38  ;;  %v420_v52 = vadd.f32 %v1251_v9, %v381_v39  ;;  %v435_v54 = vadd.f32 %v1251_v9, %v396_v40  ;;  %v436_v55 = vadd.f32 %v1251_v9, %v397_v41  ;;  %v364_v27 = vld [vmem:[%s1234_s29 + $0xd8] sm:$0xff]  ;;  %v366_v38 = vld [vmem:[%s1234_s29 + $0xe8] sm:$0xff] }
  0x1b   : > { %1086 = vmatprep.mubr.bf16.mxu1 %v519_v31  ;;  %v382_v56 = vmul.f32 %v1244_v6, %v343_v44  ;;  %v449_v61 = vmax.f32 %v417_v43, 0.0  ;;  %v383_v62 = vmul.f32 %v1244_v6, %v344_v48  ;;  %v398_v63 = vmul.f32 %v1244_v6, %v359_v49  ;;  %v349_v31 = vld [vmem:[%s1234_s29 + $0x60] sm:$0xff] }
  0x1c   : > { %1065 = vmatpush3.bf16.msra.mxu0 %v1147_v30  ;;  %1115 = vmatpush3.bf16.msra.mxu1 %v1147_v30  ;;  %v399_v0 = vmul.f32 %v1244_v6, %v360_v50  ;;  %v450_v1 = vmax.f32 %v418_v45, 0.0  ;;  %v465_v2 = vmax.f32 %v433_v46, 0.0  ;;  %v466_v3 = vmax.f32 %v434_v47, 0.0 }
  0x1d   : > { %1066 = vmatprep.subr.bf16.mxu0 %v1148_v42  ;;  %1108 = vmatprep.subr.bf16.mxu1 %v1148_v42  ;;  %v384_v4 = vmul.f32 %v1244_v6, %v345_v53  ;;  %v451_v5 = vmax.f32 %v419_v51, 0.0  ;;  %v385_v7 = vmul.f32 %v1244_v6, %v346_v57  ;;  %v400_v8 = vmul.f32 %v1244_v6, %v361_v58  ;;  %v351_v58 = vld [vmem:[%s1234_s29 + $0x70] sm:$0xff] }
  0x1e   : > { %v401_v10 = vmul.f32 %v1244_v6, %v362_v59  ;;  %v452_v11 = vmax.f32 %v420_v52, 0.0  ;;  %v467_v12 = vmax.f32 %v435_v54, 0.0  ;;  %v468_v13 = vmax.f32 %v436_v55, 0.0 }
  0x1f   : > { %v421_v14 = vadd.f32 %v1251_v9, %v382_v56  ;;  %v422_v15 = vadd.f32 %v1251_v9, %v383_v62  ;;  %v437_v16 = vadd.f32 %v1251_v9, %v398_v63  ;;  %v438_v17 = vadd.f32 %v1251_v9, %v399_v0  ;;  %v352_v63 = vld [vmem:[%s1234_s29 + $0x78] sm:$0xff]  ;;  %v367_v0 = vld [vmem:[%s1234_s29 + $0xf0] sm:$0xff] }
  0x20   : > { %1067 = vmatpush3.bf16.msra.mxu0 %v1148_v42  ;;  %1116 = vmatpush3.bf16.msra.mxu1 %v1148_v42  ;;  %v512_v18 = vpack.c.bf16 %v450_v1, %v449_v61  ;;  %v423_v19 = vadd.f32 %v1251_v9, %v384_v4  ;;  %v520_v21 = vpack.c.bf16 %v466_v3, %v465_v2  ;;  %v368_v1 = vld [vmem:[%s1234_s29 + $0xf8] sm:$0xff] }
  0x21   : > { %1068 = vmatprep.subr.bf16.mxu0 %v1149_v60  ;;  %1109 = vmatprep.subr.bf16.mxu1 %v1149_v60  ;;  %v424_v22 = vadd.f32 %v1251_v9, %v385_v7  ;;  %v439_v23 = vadd.f32 %v1251_v9, %v400_v8  ;;  %v440_v24 = vadd.f32 %v1251_v9, %v401_v10  ;;  %v453_v30 = vmax.f32 %v421_v14, 0.0 }
  0x22   : > { %v513_v28 = vpack.c.bf16 %v452_v11, %v451_v5  ;;  %v521_v29 = vpack.c.bf16 %v468_v13, %v467_v12  ;;  %v454_v32 = vmax.f32 %v422_v15, 0.0  ;;  %v469_v33 = vmax.f32 %v437_v16, 0.0 }
  0x23   : > { %v470_v34 = vmax.f32 %v438_v17, 0.0  ;;  %v386_v35 = vmul.f32 %v1244_v6, %v347_v20  ;;  %v455_v39 = vmax.f32 %v423_v19, 0.0  ;;  %v387_v40 = vmul.f32 %v1244_v6, %v348_v25 }
  0x24   : > { %1069 = vmatpush3.bf16.msra.mxu0 %v1149_v60  ;;  %1117 = vmatpush3.bf16.msra.mxu1 %v1149_v60  ;;  %v402_v41 = vmul.f32 %v1244_v6, %v363_v26  ;;  %v403_v42 = vmul.f32 %v1244_v6, %v364_v27  ;;  %v456_v43 = vmax.f32 %v424_v22, 0.0  ;;  %v471_v44 = vmax.f32 %v439_v23, 0.0 }
  0x25   : > { %v472_v45 = vmax.f32 %v440_v24, 0.0  ;;  %v388_v46 = vmul.f32 %v1244_v6, %v349_v31  ;;  %v389_v47 = vmul.f32 %v1244_v6, %v350_v36  ;;  %v404_v48 = vmul.f32 %v1244_v6, %v365_v37 }
  0x26   : > { %v405_v49 = vmul.f32 %v1244_v6, %v366_v38  ;;  %v425_v50 = vadd.f32 %v1251_v9, %v386_v35  ;;  %v426_v51 = vadd.f32 %v1251_v9, %v387_v40  ;;  %v441_v52 = vadd.f32 %v1251_v9, %v402_v41 }
  0x27   : > { %1071 = vmatmul.mubr.bf16.vlgmr.msra.gmra.mrb[0].mxu0 %v512_v18  ;;  %1087 = vmatmul.mubr.bf16.vlgmr.msra.gmra.mrb[0].mxu1 %v520_v21  ;;  %v442_v53 = vadd.f32 %v1251_v9, %v403_v42  ;;  %v514_v54 = vpack.c.bf16 %v454_v32, %v453_v30  ;;  %v522_v55 = vpack.c.bf16 %v470_v34, %v469_v33 }
  0x28   : > { %1074 = vmatprep.mubr.bf16.mxu0 %v513_v28  ;;  %1090 = vmatprep.mubr.bf16.mxu1 %v521_v29  ;;  %v515_v56 = vpack.c.bf16 %v456_v43, %v455_v39  ;;  %v523_v57 = vpack.c.bf16 %v472_v45, %v471_v44  ;;  %v427_v59 = vadd.f32 %v1251_v9, %v388_v46  ;;  %v457_v2 = vmax.f32 %v425_v50, 0.0 }
  0x29   : > { %v428_v60 = vadd.f32 %v1251_v9, %v389_v47  ;;  %v443_v61 = vadd.f32 %v1251_v9, %v404_v48  ;;  %v444_v62 = vadd.f32 %v1251_v9, %v405_v49  ;;  %v458_v3 = vmax.f32 %v426_v51, 0.0 }
  0x2a   : > { %v473_v4 = vmax.f32 %v441_v52, 0.0  ;;  %v474_v5 = vmax.f32 %v442_v53, 0.0  ;;  %v390_v7 = vmul.f32 %v1244_v6, %v351_v58  ;;  %v391_v8 = vmul.f32 %v1244_v6, %v352_v63 }
  0x2b   : > { %v406_v10 = vmul.f32 %v1244_v6, %v367_v0  ;;  %v407_v11 = vmul.f32 %v1244_v6, %v368_v1  ;;  %v459_v12 = vmax.f32 %v427_v59, 0.0  ;;  %v460_v13 = vmax.f32 %v428_v60, 0.0 }
  0x2c   : > { %v475_v14 = vmax.f32 %v443_v61, 0.0  ;;  %v476_v15 = vmax.f32 %v444_v62, 0.0  ;;  %v516_v16 = vpack.c.bf16 %v458_v3, %v457_v2  ;;  %v524_v17 = vpack.c.bf16 %v474_v5, %v473_v4 }
  0x2d   : > { %v429_v18 = vadd.f32 %v1251_v9, %v390_v7  ;;  %v430_v19 = vadd.f32 %v1251_v9, %v391_v8  ;;  %v445_v20 = vadd.f32 %v1251_v9, %v406_v10  ;;  %v446_v21 = vadd.f32 %v1251_v9, %v407_v11 }
  0x2e   : > { %v517_v22 = vpack.c.bf16 %v460_v13, %v459_v12  ;;  %v525_v23 = vpack.c.bf16 %v476_v15, %v475_v14 }
  0x2f   : > { %1075 = vmatmul.mubr.bf16.gmra.mrb[4].mxu0 %v514_v54  ;;  %1091 = vmatmul.mubr.bf16.gmra.mrb[4].mxu1 %v522_v55  ;;  %v461_v6 = vmax.f32 %v429_v18, 0.0  ;;  %v462_v24 = vmax.f32 %v430_v19, 0.0  ;;  %v477_v25 = vmax.f32 %v445_v20, 0.0  ;;  %v478_v26 = vmax.f32 %v446_v21, 0.0 }
  0x30   : > { %1078 = vmatprep.mubr.bf16.mxu0 %v515_v56  ;;  %1094 = vmatprep.mubr.bf16.mxu1 %v523_v57 }
  0x31   : > { %v518_v27 = vpack.c.bf16 %v462_v24, %v461_v6  ;;  %v526_v28 = vpack.c.bf16 %v478_v26, %v477_v25 }
  0x37   : > { %1079 = vmatmul.mubr.bf16.gmra.mrb[8].mxu0 %v516_v16  ;;  %1095 = vmatmul.mubr.bf16.gmra.mrb[8].mxu1 %v524_v17 }
  0x38   : > { %1082 = vmatprep.mubr.bf16.mxu0 %v517_v22  ;;  %1098 = vmatprep.mubr.bf16.mxu1 %v525_v23 }
  0x3f   : > { %1083 = vmatmul.mubr.bf16.gmra.mrb[12].mxu0 %v518_v27  ;;  %1099 = vmatmul.mubr.bf16.gmra.mrb[12].mxu1 %v526_v28 }
  0xfa   : > { %v1072_v9 = vpop.f32.mrb[0].mxu0  ;;  %v1088_v29 = vpop.f32.mrb[0].mxu1 }
  0xfb   : > { %853 = vst [vmem:[%s1362_s24 + $0x10] sm:$0xff] %v1072_v9  ;;  %869 = vst [vmem:[%s1362_s24 + $0x90] sm:$0xff] %v1088_v29  ;;  %v625_v30 = vpop.f32.mrb[1].mxu0  ;;  %v689_v31 = vpop.f32.mrb[1].mxu1 }
  0xfc   : > { %851 = vst [vmem:[%s1362_s24] sm:$0xff] %v625_v30  ;;  %867 = vst [vmem:[%s1362_s24 + $0x80] sm:$0xff] %v689_v31  ;;  %v1073_v32 = vpop.f32.mrb[2].mxu0  ;;  %v1089_v33 = vpop.f32.mrb[2].mxu1 }
  0xfd   : > { %854 = vst [vmem:[%s1362_s24 + $0x18] sm:$0xff] %v1073_v32  ;;  %870 = vst [vmem:[%s1362_s24 + $0x98] sm:$0xff] %v1089_v33  ;;  %v628_v34 = vpop.f32.mrb[3].mxu0  ;;  %v692_v35 = vpop.f32.mrb[3].mxu1 }
  0xfe   : > { %852 = vst [vmem:[%s1362_s24 + $0x8] sm:$0xff] %v628_v34  ;;  %868 = vst [vmem:[%s1362_s24 + $0x88] sm:$0xff] %v692_v35 }
 0x102   : > { %v1076_v36 = vpop.f32.mrb[4].mxu0  ;;  %v1092_v37 = vpop.f32.mrb[4].mxu1 }
 0x103   : > { %857 = vst [vmem:[%s1362_s24 + $0x30] sm:$0xff] %v1076_v36  ;;  %873 = vst [vmem:[%s1362_s24 + $0xb0] sm:$0xff] %v1092_v37  ;;  %v641_v38 = vpop.f32.mrb[5].mxu0  ;;  %v705_v39 = vpop.f32.mrb[5].mxu1 }
 0x104   : > { %855 = vst [vmem:[%s1362_s24 + $0x20] sm:$0xff] %v641_v38  ;;  %871 = vst [vmem:[%s1362_s24 + $0xa0] sm:$0xff] %v705_v39  ;;  %v1077_v40 = vpop.f32.mrb[6].mxu0  ;;  %v1093_v41 = vpop.f32.mrb[6].mxu1 }
 0x105   : > { %858 = vst [vmem:[%s1362_s24 + $0x38] sm:$0xff] %v1077_v40  ;;  %874 = vst [vmem:[%s1362_s24 + $0xb8] sm:$0xff] %v1093_v41  ;;  %v644_v42 = vpop.f32.mrb[7].mxu0  ;;  %v708_v43 = vpop.f32.mrb[7].mxu1 }
 0x106   : > { %856 = vst [vmem:[%s1362_s24 + $0x28] sm:$0xff] %v644_v42  ;;  %872 = vst [vmem:[%s1362_s24 + $0xa8] sm:$0xff] %v708_v43 }
 0x10a   : > { %v1080_v44 = vpop.f32.mrb[8].mxu0  ;;  %v1096_v45 = vpop.f32.mrb[8].mxu1 }
 0x10b   : > { %861 = vst [vmem:[%s1362_s24 + $0x50] sm:$0xff] %v1080_v44  ;;  %877 = vst [vmem:[%s1362_s24 + $0xd0] sm:$0xff] %v1096_v45  ;;  %v657_v46 = vpop.f32.mrb[9].mxu0  ;;  %v721_v47 = vpop.f32.mrb[9].mxu1 }
 0x10c   : > { %859 = vst [vmem:[%s1362_s24 + $0x40] sm:$0xff] %v657_v46  ;;  %875 = vst [vmem:[%s1362_s24 + $0xc0] sm:$0xff] %v721_v47  ;;  %v1081_v48 = vpop.f32.mrb[10].mxu0  ;;  %v1097_v49 = vpop.f32.mrb[10].mxu1 }
 0x10d   : > { %862 = vst [vmem:[%s1362_s24 + $0x58] sm:$0xff] %v1081_v48  ;;  %878 = vst [vmem:[%s1362_s24 + $0xd8] sm:$0xff] %v1097_v49  ;;  %v660_v50 = vpop.f32.mrb[11].mxu0  ;;  %v724_v51 = vpop.f32.mrb[11].mxu1 }
 0x10e   : > { %860 = vst [vmem:[%s1362_s24 + $0x48] sm:$0xff] %v660_v50  ;;  %876 = vst [vmem:[%s1362_s24 + $0xc8] sm:$0xff] %v724_v51 }
 0x112   : > { %v1084_v52 = vpop.f32.mrb[12].mxu0  ;;  %v1100_v53 = vpop.f32.mrb[12].mxu1 }
 0x113   : > { %865 = vst [vmem:[%s1362_s24 + $0x70] sm:$0xff] %v1084_v52  ;;  %881 = vst [vmem:[%s1362_s24 + $0xf0] sm:$0xff] %v1100_v53  ;;  %v673_v54 = vpop.f32.mrb[13].mxu0  ;;  %v737_v55 = vpop.f32.mrb[13].mxu1 }
 0x114   : > { %863 = vst [vmem:[%s1362_s24 + $0x60] sm:$0xff] %v673_v54  ;;  %879 = vst [vmem:[%s1362_s24 + $0xe0] sm:$0xff] %v737_v55  ;;  %v1085_v56 = vpop.f32.mrb[14].mxu0  ;;  %v1101_v57 = vpop.f32.mrb[14].mxu1 }
 0x115   : > { %866 = vst [vmem:[%s1362_s24 + $0x78] sm:$0xff] %v1085_v56  ;;  %882 = vst [vmem:[%s1362_s24 + $0xf8] sm:$0xff] %v1101_v57  ;;  %v676_v58 = vpop.f32.mrb[15].mxu0  ;;  %v740_v59 = vpop.f32.mrb[15].mxu1 }
 0x116   : > { %864 = vst [vmem:[%s1362_s24 + $0x68] sm:$0xff] %v676_v58  ;;  %880 = vst [vmem:[%s1362_s24 + $0xe8] sm:$0xff] %v740_v59 }
 0x117 PF: > { %s14_s17 = sadd.s32 1, %s1172_s17   ;;  %s1410_s15 = smov %s1168_s16 }
 0x118   : > { %p11_p5 = scmp.ge.s32.totalorder %s14_s17, 4   ;;  %s1411_s16 = smov %s1413_s18 }
 0x11a   :  { %13 = sbr.rel (!%p11_p5) target bundleno = 2 (0x2), region = 83 }

// kernel: _lambda_.7
= control target key start
LH: loop header
LB: loop body
LE: loop exit
PB: predicated region body
PF: predicated region fallthrough
CT: control target
= control target key end

     0   :  { %s626_s12 = smov 0   ;;  %s628_s13 = smov 0   ;;  %s801_s0 = inlined_call_operand.vmem [shape: f32[2,256,128], index: 0, kind: input, shape index: {}]   ;;  %s802_s1 = inlined_call_operand.vmem [shape: f32[2,256,128], index: 1, kind: input, shape index: {}]   ;;  %s803_s2 = inlined_call_operand.vmem [shape: f32[2,1,128], index: 2, kind: input, shape index: {}]   ;;  %s804_s3 = inlined_call_operand.vmem [shape: f32[2,256,128], index: 3, kind: output, shape index: {}]  }
   0x1   :  { %s630_s14 = smov 0  }
   0x2 LB: > { %s25_s15 = sadd.s32 1, %s600_s13  ;;  %p545_p0 = scmp.ge.s32.totalorder %s604_s14, 1  ;;  %s604_s14 = sphi %s630_s14, %s13_s14   ;;  %s600_s13 = sphi %s628_s13, %s806_s13   ;;  %s596_s12 = sphi %s626_s12, %s805_s12  }
   0x3   : > { %p27_p1 = scmp.ge.s32.totalorder %s25_s15, 2  ;;  %p183_p2 = scmp.lt.s32.totalorder %s604_s14, 3 }
   0x5   : > { %s808_s15 = smov (%p27_p1, %s25_s15), 0  ;;  %p184_p3 = pnand %p545_p0, %p183_p2 }
   0x6   : > { %p228_p4 = scmp.lt.s32.totalorder (!%p184_p3), %s596_s12, 1 }
   0x7   : > { %187 = sbr.rel (%p184_p3) target bundleno = 45 (0x2d), region = 32 }
   0xe   : > { %s810_s12 = smov (!%p228_p4, %s596_s12), 1 }
   0xf   : > { %s555_s16 = sshll.u32 %s810_s12, 8  ;;  %s249_s19 = scalar_lea.vmem %s803_s2, %s810_s12 }
  0x10   : > { %s650_s22 = scalar_lea.vmem %s801_s0, %s555_s16  ;;  %s655_s25 = scalar_lea.vmem %s802_s1, %s555_s16  ;;  %v657_v0 = vld [vmem:[%s249_s19] ss:$0 sm:$0xff] }
  0x11   : > { %v260_v1 = vld [vmem:[%s650_s22] sm:$0xff]  ;;  %v261_v3 = vld [vmem:[%s650_s22 + $0x8] sm:$0xff]  ;;  %v262_v7 = vld [vmem:[%s650_s22 + $0x10] sm:$0xff]  ;;  %s670_s28 = scalar_lea.vmem %s804_s3, %s555_s16 }
  0x12   : > { %v331_v2 = vld [vmem:[%s655_s25] sm:$0xff]  ;;  %v299_v4 = vmul.f32 %v657_v0, %v260_v1  ;;  %v300_v5 = vmul.f32 %v657_v0, %v261_v3  ;;  %v332_v6 = vld [vmem:[%s655_s25 + $0x8] sm:$0xff]  ;;  %v333_v8 = vld [vmem:[%s655_s25 + $0x10] sm:$0xff]  ;;  %v301_v9 = vmul.f32 %v657_v0, %v262_v7 }
  0x13   : > { %v263_v10 = vld [vmem:[%s650_s22 + $0x18] sm:$0xff]  ;;  %v264_v12 = vld [vmem:[%s650_s22 + $0x20] sm:$0xff]  ;;  %v265_v18 = vld [vmem:[%s650_s22 + $0x28] sm:$0xff] }
  0x14   : > { %v334_v11 = vld [vmem:[%s655_s25 + $0x18] sm:$0xff]  ;;  %v363_v13 = vadd.f32 %v331_v2, %v299_v4  ;;  %v364_v14 = vadd.f32 %v332_v6, %v300_v5  ;;  %v302_v15 = vmul.f32 %v657_v0, %v263_v10  ;;  %v303_v16 = vmul.f32 %v657_v0, %v264_v12  ;;  %v335_v17 = vld [vmem:[%s655_s25 + $0x20] sm:$0xff]  ;;  %v336_v19 = vld [vmem:[%s655_s25 + $0x28] sm:$0xff] }
  0x15   : > { %v365_v20 = vadd.f32 %v333_v8, %v301_v9  ;;  %v304_v21 = vmul.f32 %v657_v0, %v265_v18  ;;  %v266_v22 = vld [vmem:[%s650_s22 + $0x30] sm:$0xff]  ;;  %v267_v24 = vld [vmem:[%s650_s22 + $0x38] sm:$0xff]  ;;  %v268_v30 = vld [vmem:[%s650_s22 + $0x40] sm:$0xff] }
  0x16   : > { %v337_v23 = vld [vmem:[%s655_s25 + $0x30] sm:$0xff]  ;;  %395 = vst [vmem:[%s670_s28] sm:$0xff] %v363_v13  ;;  %396 = vst [vmem:[%s670_s28 + $0x8] sm:$0xff] %v364_v14  ;;  %v366_v25 = vadd.f32 %v334_v11, %v302_v15  ;;  %v367_v26 = vadd.f32 %v335_v17, %v303_v16  ;;  %v305_v27 = vmul.f32 %v657_v0, %v266_v22  ;;  %v338_v29 = vld [vmem:[%s655_s25 + $0x38] sm:$0xff] }
  0x17   : > { %v306_v28 = vmul.f32 %v657_v0, %v267_v24  ;;  %v339_v31 = vld [vmem:[%s655_s25 + $0x40] sm:$0xff]  ;;  %397 = vst [vmem:[%s670_s28 + $0x10] sm:$0xff] %v365_v20  ;;  %v368_v32 = vadd.f32 %v336_v19, %v304_v21  ;;  %v307_v33 = vmul.f32 %v657_v0, %v268_v30  ;;  %v269_v34 = vld [vmem:[%s650_s22 + $0x48] sm:$0xff]  ;;  %v270_v36 = vld [vmem:[%s650_s22 + $0x50] sm:$0xff] }
  0x18   : > { %v340_v35 = vld [vmem:[%s655_s25 + $0x48] sm:$0xff]  ;;  %398 = vst [vmem:[%s670_s28 + $0x18] sm:$0xff] %v366_v25  ;;  %399 = vst [vmem:[%s670_s28 + $0x20] sm:$0xff] %v367_v26  ;;  %v369_v37 = vadd.f32 %v337_v23, %v305_v27  ;;  %v308_v39 = vmul.f32 %v657_v0, %v269_v34  ;;  %v309_v40 = vmul.f32 %v657_v0, %v270_v36  ;;  %v341_v41 = vld [vmem:[%s655_s25 + $0x50] sm:$0xff] }
  0x19   : > { %v370_v38 = vadd.f32 %v338_v29, %v306_v28  ;;  %v271_v42 = vld [vmem:[%s650_s22 + $0x58] sm:$0xff]  ;;  %400 = vst [vmem:[%s670_s28 + $0x28] sm:$0xff] %v368_v32  ;;  %v371_v44 = vadd.f32 %v339_v31, %v307_v33  ;;  %v272_v46 = vld [vmem:[%s650_s22 + $0x60] sm:$0xff]  ;;  %v273_v48 = vld [vmem:[%s650_s22 + $0x68] sm:$0xff] }
  0x1a   : > { %v342_v43 = vld [vmem:[%s655_s25 + $0x58] sm:$0xff]  ;;  %v310_v45 = vmul.f32 %v657_v0, %v271_v42  ;;  %v343_v47 = vld [vmem:[%s655_s25 + $0x60] sm:$0xff]  ;;  %401 = vst [vmem:[%s670_s28 + $0x30] sm:$0xff] %v369_v37  ;;  %v372_v49 = vadd.f32 %v340_v35, %v308_v39  ;;  %v373_v50 = vadd.f32 %v341_v41, %v309_v40  ;;  %v311_v51 = vmul.f32 %v657_v0, %v272_v46  ;;  %v344_v53 = vld [vmem:[%s655_s25 + $0x68] sm:$0xff] }
  0x1b   : > { %402 = vst [vmem:[%s670_s28 + $0x38] sm:$0xff] %v370_v38  ;;  %v312_v52 = vmul.f32 %v657_v0, %v273_v48  ;;  %v274_v54 = vld [vmem:[%s650_s22 + $0x70] sm:$0xff]  ;;  %403 = vst [vmem:[%s670_s28 + $0x40] sm:$0xff] %v371_v44  ;;  %v275_v58 = vld [vmem:[%s650_s22 + $0x78] sm:$0xff] }
  0x1c   : > { %v345_v55 = vld [vmem:[%s655_s25 + $0x70] sm:$0xff]  ;;  %v374_v56 = vadd.f32 %v342_v43, %v310_v45  ;;  %v313_v57 = vmul.f32 %v657_v0, %v274_v54  ;;  %v346_v59 = vld [vmem:[%s655_s25 + $0x78] sm:$0xff]  ;;  %v276_v60 = vld [vmem:[%s650_s22 + $0x80] sm:$0xff]  ;;  %404 = vst [vmem:[%s670_s28 + $0x48] sm:$0xff] %v372_v49  ;;  %v375_v61 = vadd.f32 %v343_v47, %v311_v51  ;;  %v314_v63 = vmul.f32 %v657_v0, %v275_v58 }
  0x1d   : > { %405 = vst [vmem:[%s670_s28 + $0x50] sm:$0xff] %v373_v50  ;;  %v376_v62 = vadd.f32 %v344_v53, %v312_v52  ;;  %v315_v1 = vmul.f32 %v657_v0, %v276_v60  ;;  %v347_v2 = vld [vmem:[%s655_s25 + $0x80] sm:$0xff]  ;;  %v277_v3 = vld [vmem:[%s650_s22 + $0x88] sm:$0xff]  ;;  %v278_v7 = vld [vmem:[%s650_s22 + $0x90] sm:$0xff] }
  0x1e   : > { %v348_v4 = vld [vmem:[%s655_s25 + $0x88] sm:$0xff]  ;;  %406 = vst [vmem:[%s670_s28 + $0x58] sm:$0xff] %v374_v56  ;;  %v377_v5 = vadd.f32 %v345_v55, %v313_v57  ;;  %v316_v6 = vmul.f32 %v657_v0, %v277_v3  ;;  %v349_v8 = vld [vmem:[%s655_s25 + $0x90] sm:$0xff]  ;;  %v279_v9 = vld [vmem:[%s650_s22 + $0x98] sm:$0xff]  ;;  %v378_v10 = vadd.f32 %v346_v59, %v314_v63  ;;  %v317_v12 = vmul.f32 %v657_v0, %v278_v7 }
  0x1f   : > { %407 = vst [vmem:[%s670_s28 + $0x60] sm:$0xff] %v375_v61  ;;  %408 = vst [vmem:[%s670_s28 + $0x68] sm:$0xff] %v376_v62  ;;  %v379_v11 = vadd.f32 %v347_v2, %v315_v1  ;;  %v318_v13 = vmul.f32 %v657_v0, %v279_v9  ;;  %v350_v14 = vld [vmem:[%s655_s25 + $0x98] sm:$0xff]  ;;  %v280_v15 = vld [vmem:[%s650_s22 + $0xa0] sm:$0xff] }
  0x20   : > { %v351_v16 = vld [vmem:[%s655_s25 + $0xa0] sm:$0xff]  ;;  %409 = vst [vmem:[%s670_s28 + $0x70] sm:$0xff] %v377_v5  ;;  %v380_v17 = vadd.f32 %v348_v4, %v316_v6  ;;  %v319_v18 = vmul.f32 %v657_v0, %v280_v15  ;;  %v281_v19 = vld [vmem:[%s650_s22 + $0xa8] sm:$0xff]  ;;  %v282_v21 = vld [vmem:[%s650_s22 + $0xb0] sm:$0xff]  ;;  %v381_v22 = vadd.f32 %v349_v8, %v317_v12 }
  0x21   : > { %v352_v20 = vld [vmem:[%s655_s25 + $0xa8] sm:$0xff]  ;;  %410 = vst [vmem:[%s670_s28 + $0x78] sm:$0xff] %v378_v10  ;;  %411 = vst [vmem:[%s670_s28 + $0x80] sm:$0xff] %v379_v11  ;;  %v382_v23 = vadd.f32 %v350_v14, %v318_v13  ;;  %v320_v24 = vmul.f32 %v657_v0, %v281_v19  ;;  %v321_v25 = vmul.f32 %v657_v0, %v282_v21  ;;  %v353_v26 = vld [vmem:[%s655_s25 + $0xb0] sm:$0xff] }
  0x22   : > { %v283_v27 = vld [vmem:[%s650_s22 + $0xb8] sm:$0xff]  ;;  %412 = vst [vmem:[%s670_s28 + $0x88] sm:$0xff] %v380_v17  ;;  %v383_v29 = vadd.f32 %v351_v16, %v319_v18  ;;  %v284_v31 = vld [vmem:[%s650_s22 + $0xc0] sm:$0xff]  ;;  %v285_v33 = vld [vmem:[%s650_s22 + $0xc8] sm:$0xff] }
  0x23   : > { %v354_v28 = vld [vmem:[%s655_s25 + $0xb8] sm:$0xff]  ;;  %v322_v30 = vmul.f32 %v657_v0, %v283_v27  ;;  %v355_v32 = vld [vmem:[%s655_s25 + $0xc0] sm:$0xff]  ;;  %413 = vst [vmem:[%s670_s28 + $0x90] sm:$0xff] %v381_v22  ;;  %414 = vst [vmem:[%s670_s28 + $0x98] sm:$0xff] %v382_v23  ;;  %v384_v34 = vadd.f32 %v352_v20, %v320_v24  ;;  %v385_v35 = vadd.f32 %v353_v26, %v321_v25 }
  0x24   : > { %v323_v36 = vmul.f32 %v657_v0, %v284_v31  ;;  %v324_v37 = vmul.f32 %v657_v0, %v285_v33  ;;  %v356_v38 = vld [vmem:[%s655_s25 + $0xc8] sm:$0xff]  ;;  %v286_v39 = vld [vmem:[%s650_s22 + $0xd0] sm:$0xff]  ;;  %415 = vst [vmem:[%s670_s28 + $0xa0] sm:$0xff] %v383_v29  ;;  %v287_v43 = vld [vmem:[%s650_s22 + $0xd8] sm:$0xff] }
  0x25   : > { %v357_v40 = vld [vmem:[%s655_s25 + $0xd0] sm:$0xff]  ;;  %v386_v41 = vadd.f32 %v354_v28, %v322_v30  ;;  %v325_v42 = vmul.f32 %v657_v0, %v286_v39  ;;  %v358_v44 = vld [vmem:[%s655_s25 + $0xd8] sm:$0xff]  ;;  %v288_v45 = vld [vmem:[%s650_s22 + $0xe0] sm:$0xff]  ;;  %416 = vst [vmem:[%s670_s28 + $0xa8] sm:$0xff] %v384_v34  ;;  %v326_v48 = vmul.f32 %v657_v0, %v287_v43 }
  0x26   : > { %417 = vst [vmem:[%s670_s28 + $0xb0] sm:$0xff] %v385_v35  ;;  %v387_v46 = vadd.f32 %v355_v32, %v323_v36  ;;  %v388_v47 = vadd.f32 %v356_v38, %v324_v37  ;;  %v327_v49 = vmul.f32 %v657_v0, %v288_v45  ;;  %v359_v50 = vld [vmem:[%s655_s25 + $0xe0] sm:$0xff]  ;;  %v289_v51 = vld [vmem:[%s650_s22 + $0xe8] sm:$0xff]  ;;  %v290_v55 = vld [vmem:[%s650_s22 + $0xf0] sm:$0xff] }
  0x27   : > { %v360_v52 = vld [vmem:[%s655_s25 + $0xe8] sm:$0xff]  ;;  %418 = vst [vmem:[%s670_s28 + $0xb8] sm:$0xff] %v386_v41  ;;  %v389_v53 = vadd.f32 %v357_v40, %v325_v42  ;;  %v328_v54 = vmul.f32 %v657_v0, %v289_v51  ;;  %v361_v56 = vld [vmem:[%s655_s25 + $0xf0] sm:$0xff]  ;;  %v291_v57 = vld [vmem:[%s650_s22 + $0xf8] sm:$0xff]  ;;  %v390_v58 = vadd.f32 %v358_v44, %v326_v48  ;;  %v329_v60 = vmul.f32 %v657_v0, %v290_v55 }
  0x28   : > { %419 = vst [vmem:[%s670_s28 + $0xc0] sm:$0xff] %v387_v46  ;;  %420 = vst [vmem:[%s670_s28 + $0xc8] sm:$0xff] %v388_v47  ;;  %v391_v59 = vadd.f32 %v359_v50, %v327_v49  ;;  %v330_v61 = vmul.f32 %v657_v0, %v291_v57  ;;  %v362_v62 = vld [vmem:[%s655_s25 + $0xf8] sm:$0xff] }
  0x29   : > { %421 = vst [vmem:[%s670_s28 + $0xd0] sm:$0xff] %v389_v53  ;;  %v392_v63 = vadd.f32 %v360_v52, %v328_v54  ;;  %422 = vst [vmem:[%s670_s28 + $0xd8] sm:$0xff] %v390_v58  ;;  %v393_v1 = vadd.f32 %v361_v56, %v329_v60 }
  0x2a   : > { %423 = vst [vmem:[%s670_s28 + $0xe0] sm:$0xff] %v391_v59  ;;  %v394_v2 = vadd.f32 %v362_v62, %v330_v61 }
  0x2b   : > { %424 = vst [vmem:[%s670_s28 + $0xe8] sm:$0xff] %v392_v63  ;;  %425 = vst [vmem:[%s670_s28 + $0xf0] sm:$0xff] %v393_v1 }
  0x2c   : > { %426 = vst [vmem:[%s670_s28 + $0xf8] sm:$0xff] %v394_v2 }
  0x2d PF: > { %s13_s14 = sadd.s32 1, %s604_s14   ;;  %s805_s12 = smov %s600_s13 }
  0x2e   : > { %p10_p5 = scmp.ge.s32.totalorder %s13_s14, 4   ;;  %s806_s13 = smov %s808_s15 }
  0x30   :  { %12 = sbr.rel (!%p10_p5) target bundleno = 2 (0x2), region = 68 }

// kernel: _lambda_.4
= control target key start
LH: loop header
LB: loop body
LE: loop exit
PB: predicated region body
PF: predicated region fallthrough
CT: control target
= control target key end

     0   :  { %s1429_s21 = smov 0   ;;  %s1431_s22 = smov 0   ;;  %s1709_s0 = inlined_call_operand.vmem [shape: f32[512,128], index: 0, kind: input, shape index: {}]   ;;  %s1710_s1 = inlined_call_operand.vmem [shape: bf16[128,128], index: 1, kind: input, shape index: {}]   ;;  %s1711_s2 = inlined_call_operand.vmem [shape: f32[1,128], index: 2, kind: input, shape index: {}]   ;;  %s1712_s3 = inlined_call_operand.vmem [shape: f32[1,128], index: 3, kind: input, shape index: {}]   ;;  %s1713_s4 = inlined_call_operand.vmem [shape: f32[1,128], index: 4, kind: input, shape index: {}]   ;;  %s1714_s5 = inlined_call_operand.vmem [shape: f32[1,128], index: 5, kind: input, shape index: {}]   ;;  %s1715_s6 = inlined_call_operand.vmem [shape: f32[512,128], index: 6, kind: output, shape index: {}]  }
   0x1   :  { %s1433_s23 = smov 0  }
   0x2 LB: > { %s35_s24 = sadd.s32 1, %s1388_s22  ;;  %p1231_p0 = scmp.ge.s32.totalorder %s1392_s23, 1  ;;  %s1392_s23 = sphi %s1433_s23, %s16_s23   ;;  %s1388_s22 = sphi %s1431_s22, %s1717_s22   ;;  %s1384_s21 = sphi %s1429_s21, %s1716_s21  }
   0x3   : > { %p37_p1 = scmp.ge.s32.totalorder %s35_s24, 2  ;;  %p287_p2 = scmp.lt.s32.totalorder %s1392_s23, 3 }
   0x5   : > { %s1719_s24 = smov (%p37_p1, %s35_s24), 0  ;;  %p288_p3 = pnand %p1231_p0, %p287_p2 }
   0x6   : > { %v1362_v0 = vld [vmem:[%s1710_s1] sm:$0xff] (!%p288_p3)   ;;  %s1232_s27 = sshll.u32 (!%p288_p3), %s1384_s21, 5  ;;  %v1363_v1 = vld [vmem:[%s1710_s1 + $0x8] sm:$0xff] (!%p288_p3)   ;;  %v1364_v2 = vld [vmem:[%s1710_s1 + $0x10] sm:$0xff] (!%p288_p3)  }
   0x7   : > { %291 = sbr.rel (%p288_p3) target bundleno = 285 (0x11d), region = 44  ;;  %p344_p4 = scmp.lt.s32.totalorder (!%p288_p3), %s1232_s27, 63  ;;  %1274 = vmatprep.subr.bf16.mxu0 (!%p288_p3), %v1362_v0  ;;  %1322 = vmatprep.subr.bf16.mxu1 (!%p288_p3), %v1362_v0  ;;  %v1365_v3 = vld [vmem:[%s1710_s1 + $0x18] sm:$0xff] (!%p288_p3)   ;;  %v1474_v6 = vld [vmem:[%s1711_s2] ss:$0 sm:$0xff] (!%p288_p3)  ;;  %v1367_v30 = vld [vmem:[%s1710_s1 + $0x28] sm:$0xff] (!%p288_p3)  }
   0x8   : > { %1275 = vmatpush3.bf16.msra.mxu0 (!%p288_p3), %v1362_v0  ;;  %1330 = vmatpush3.bf16.msra.mxu1 (!%p288_p3), %v1362_v0  ;;  %v1481_v9 = vld [vmem:[%s1712_s3] ss:$0 sm:$0xff] (!%p288_p3)  ;;  %v1368_v42 = vld [vmem:[%s1710_s1 + $0x30] sm:$0xff] (!%p288_p3)   ;;  %v1369_v60 = vld [vmem:[%s1710_s1 + $0x38] sm:$0xff] (!%p288_p3)  }
   0x9   : > { %1276 = vmatprep.subr.bf16.mxu0 (!%p288_p3), %v1363_v1  ;;  %1323 = vmatprep.subr.bf16.mxu1 (!%p288_p3), %v1363_v1  ;;  %v1366_v16 = vld [vmem:[%s1710_s1 + $0x20] sm:$0xff] (!%p288_p3)  }
   0xc   : > { %1277 = vmatpush3.bf16.msra.mxu0 (!%p288_p3), %v1363_v1  ;;  %1331 = vmatpush3.bf16.msra.mxu1 (!%p288_p3), %v1363_v1 }
   0xd   : > { %1278 = vmatprep.subr.bf16.mxu0 (!%p288_p3), %v1364_v2  ;;  %1324 = vmatprep.subr.bf16.mxu1 (!%p288_p3), %v1364_v2 }
   0xe   : > { %s1721_s27 = smov (!%p344_p4, %s1232_s27), 63 }
   0xf   : > { %s1233_s8 = sshll.u32 %s1721_s27, 3 }
  0x10   : > { %s1464_s11 = scalar_lea.vmem %s1709_s0, %s1233_s8  ;;  %1279 = vmatpush3.bf16.msra.mxu0 %v1364_v2  ;;  %1332 = vmatpush3.bf16.msra.mxu1 %v1364_v2  ;;  %s1610_s13 = scalar_lea.vmem %s1715_s6, %s1233_s8 }
  0x11   : > { %v419_v4 = vld [vmem:[%s1464_s11] sm:$0xff]  ;;  %v420_v5 = vld [vmem:[%s1464_s11 + $0x8] sm:$0xff]  ;;  %1280 = vmatprep.subr.bf16.mxu0 %v1365_v3  ;;  %1325 = vmatprep.subr.bf16.mxu1 %v1365_v3  ;;  %v421_v21 = vld [vmem:[%s1464_s11 + $0x10] sm:$0xff] }
  0x12   : > { %v458_v7 = vmul.f32 %v1474_v6, %v419_v4  ;;  %v459_v8 = vmul.f32 %v1474_v6, %v420_v5  ;;  %v435_v10 = vld [vmem:[%s1464_s11 + $0x80] sm:$0xff]  ;;  %v436_v11 = vld [vmem:[%s1464_s11 + $0x88] sm:$0xff]  ;;  %v422_v24 = vld [vmem:[%s1464_s11 + $0x18] sm:$0xff]  ;;  %v460_v32 = vmul.f32 %v1474_v6, %v421_v21 }
  0x13   : > { %v474_v12 = vmul.f32 %v1474_v6, %v435_v10  ;;  %v475_v13 = vmul.f32 %v1474_v6, %v436_v11  ;;  %v437_v25 = vld [vmem:[%s1464_s11 + $0x90] sm:$0xff]  ;;  %v438_v26 = vld [vmem:[%s1464_s11 + $0x98] sm:$0xff]  ;;  %v423_v28 = vld [vmem:[%s1464_s11 + $0x20] sm:$0xff]  ;;  %v461_v35 = vmul.f32 %v1474_v6, %v422_v24 }
  0x14   : > { %v497_v14 = vadd.f32 %v1481_v9, %v458_v7  ;;  %v498_v15 = vadd.f32 %v1481_v9, %v459_v8  ;;  %1281 = vmatpush3.bf16.msra.mxu0 %v1365_v3  ;;  %1333 = vmatpush3.bf16.msra.mxu1 %v1365_v3  ;;  %v424_v29 = vld [vmem:[%s1464_s11 + $0x28] sm:$0xff]  ;;  %v439_v33 = vld [vmem:[%s1464_s11 + $0xa0] sm:$0xff]  ;;  %v476_v36 = vmul.f32 %v1474_v6, %v437_v25  ;;  %v425_v44 = vld [vmem:[%s1464_s11 + $0x30] sm:$0xff] }
  0x15   : > { %v513_v17 = vadd.f32 %v1481_v9, %v474_v12  ;;  %v514_v18 = vadd.f32 %v1481_v9, %v475_v13  ;;  %1282 = vmatprep.subr.bf16.mxu0 %v1366_v16  ;;  %1326 = vmatprep.subr.bf16.mxu1 %v1366_v16  ;;  %v440_v34 = vld [vmem:[%s1464_s11 + $0xa8] sm:$0xff]  ;;  %v477_v37 = vmul.f32 %v1474_v6, %v438_v26  ;;  %v426_v48 = vld [vmem:[%s1464_s11 + $0x38] sm:$0xff]  ;;  %v441_v49 = vld [vmem:[%s1464_s11 + $0xb0] sm:$0xff] }
  0x16   : > { %v529_v19 = vmax.f32 %v497_v14, 0.0  ;;  %v530_v20 = vmax.f32 %v498_v15, 0.0  ;;  %v462_v38 = vmul.f32 %v1474_v6, %v423_v28  ;;  %v463_v39 = vmul.f32 %v1474_v6, %v424_v29  ;;  %v442_v50 = vld [vmem:[%s1464_s11 + $0xb8] sm:$0xff]  ;;  %v427_v53 = vld [vmem:[%s1464_s11 + $0x40] sm:$0xff]  ;;  %v428_v57 = vld [vmem:[%s1464_s11 + $0x48] sm:$0xff] }
  0x17   : > { %v545_v22 = vmax.f32 %v513_v17, 0.0  ;;  %v546_v23 = vmax.f32 %v514_v18, 0.0  ;;  %v478_v40 = vmul.f32 %v1474_v6, %v439_v33  ;;  %v479_v41 = vmul.f32 %v1474_v6, %v440_v34  ;;  %v443_v58 = vld [vmem:[%s1464_s11 + $0xc0] sm:$0xff]  ;;  %v444_v59 = vld [vmem:[%s1464_s11 + $0xc8] sm:$0xff]  ;;  %v430_v25 = vld [vmem:[%s1464_s11 + $0x58] sm:$0xff] }
  0x18   : > { %v593_v27 = vpack.c.bf16 %v530_v20, %v529_v19  ;;  %1283 = vmatpush3.bf16.msra.mxu0 %v1366_v16  ;;  %1334 = vmatpush3.bf16.msra.mxu1 %v1366_v16  ;;  %v499_v43 = vadd.f32 %v1481_v9, %v460_v32  ;;  %v500_v45 = vadd.f32 %v1481_v9, %v461_v35  ;;  %v429_v20 = vld [vmem:[%s1464_s11 + $0x50] sm:$0xff] }
  0x19   : > { %v601_v31 = vpack.c.bf16 %v546_v23, %v545_v22  ;;  %1284 = vmatprep.subr.bf16.mxu0 %v1367_v30  ;;  %1327 = vmatprep.subr.bf16.mxu1 %v1367_v30  ;;  %v515_v46 = vadd.f32 %v1481_v9, %v476_v36  ;;  %v516_v47 = vadd.f32 %v1481_v9, %v477_v37  ;;  %v445_v26 = vld [vmem:[%s1464_s11 + $0xd0] sm:$0xff]  ;;  %v432_v36 = vld [vmem:[%s1464_s11 + $0x68] sm:$0xff]  ;;  %v447_v37 = vld [vmem:[%s1464_s11 + $0xe0] sm:$0xff] }
  0x1a   : > { %1290 = vmatprep.mubr.bf16.mxu0 %v593_v27  ;;  %v501_v51 = vadd.f32 %v1481_v9, %v462_v38  ;;  %v502_v52 = vadd.f32 %v1481_v9, %v463_v39  ;;  %v517_v54 = vadd.f32 %v1481_v9, %v478_v40  ;;  %v518_v55 = vadd.f32 %v1481_v9, %v479_v41  ;;  %v446_v27 = vld [vmem:[%s1464_s11 + $0xd8] sm:$0xff]  ;;  %v448_v38 = vld [vmem:[%s1464_s11 + $0xe8] sm:$0xff] }
  0x1b   : > { %1306 = vmatprep.mubr.bf16.mxu1 %v601_v31  ;;  %v464_v56 = vmul.f32 %v1474_v6, %v425_v44  ;;  %v531_v61 = vmax.f32 %v499_v43, 0.0  ;;  %v465_v62 = vmul.f32 %v1474_v6, %v426_v48  ;;  %v480_v63 = vmul.f32 %v1474_v6, %v441_v49  ;;  %v431_v31 = vld [vmem:[%s1464_s11 + $0x60] sm:$0xff] }
  0x1c   : > { %1285 = vmatpush3.bf16.msra.mxu0 %v1367_v30  ;;  %1335 = vmatpush3.bf16.msra.mxu1 %v1367_v30  ;;  %v481_v0 = vmul.f32 %v1474_v6, %v442_v50  ;;  %v532_v1 = vmax.f32 %v500_v45, 0.0  ;;  %v547_v2 = vmax.f32 %v515_v46, 0.0  ;;  %v548_v3 = vmax.f32 %v516_v47, 0.0 }
  0x1d   : > { %1286 = vmatprep.subr.bf16.mxu0 %v1368_v42  ;;  %1328 = vmatprep.subr.bf16.mxu1 %v1368_v42  ;;  %v466_v4 = vmul.f32 %v1474_v6, %v427_v53  ;;  %v533_v5 = vmax.f32 %v501_v51, 0.0  ;;  %v467_v7 = vmul.f32 %v1474_v6, %v428_v57  ;;  %v482_v8 = vmul.f32 %v1474_v6, %v443_v58  ;;  %v433_v58 = vld [vmem:[%s1464_s11 + $0x70] sm:$0xff] }
  0x1e   : > { %v483_v10 = vmul.f32 %v1474_v6, %v444_v59  ;;  %v534_v11 = vmax.f32 %v502_v52, 0.0  ;;  %v549_v12 = vmax.f32 %v517_v54, 0.0  ;;  %v550_v13 = vmax.f32 %v518_v55, 0.0 }
  0x1f   : > { %v503_v14 = vadd.f32 %v1481_v9, %v464_v56  ;;  %v504_v15 = vadd.f32 %v1481_v9, %v465_v62  ;;  %v519_v16 = vadd.f32 %v1481_v9, %v480_v63  ;;  %v520_v17 = vadd.f32 %v1481_v9, %v481_v0  ;;  %v434_v63 = vld [vmem:[%s1464_s11 + $0x78] sm:$0xff]  ;;  %v449_v0 = vld [vmem:[%s1464_s11 + $0xf0] sm:$0xff] }
  0x20   : > { %1287 = vmatpush3.bf16.msra.mxu0 %v1368_v42  ;;  %1336 = vmatpush3.bf16.msra.mxu1 %v1368_v42  ;;  %v594_v18 = vpack.c.bf16 %v532_v1, %v531_v61  ;;  %v505_v19 = vadd.f32 %v1481_v9, %v466_v4  ;;  %v602_v21 = vpack.c.bf16 %v548_v3, %v547_v2  ;;  %v450_v1 = vld [vmem:[%s1464_s11 + $0xf8] sm:$0xff] }
  0x21   : > { %1288 = vmatprep.subr.bf16.mxu0 %v1369_v60  ;;  %1329 = vmatprep.subr.bf16.mxu1 %v1369_v60  ;;  %v506_v22 = vadd.f32 %v1481_v9, %v467_v7  ;;  %v521_v23 = vadd.f32 %v1481_v9, %v482_v8  ;;  %v522_v24 = vadd.f32 %v1481_v9, %v483_v10  ;;  %v535_v30 = vmax.f32 %v503_v14, 0.0 }
  0x22   : > { %v595_v28 = vpack.c.bf16 %v534_v11, %v533_v5  ;;  %v603_v29 = vpack.c.bf16 %v550_v13, %v549_v12  ;;  %v536_v32 = vmax.f32 %v504_v15, 0.0  ;;  %v551_v33 = vmax.f32 %v519_v16, 0.0 }
  0x23   : > { %v552_v34 = vmax.f32 %v520_v17, 0.0  ;;  %v468_v35 = vmul.f32 %v1474_v6, %v429_v20  ;;  %v537_v39 = vmax.f32 %v505_v19, 0.0  ;;  %v469_v40 = vmul.f32 %v1474_v6, %v430_v25 }
  0x24   : > { %1289 = vmatpush3.bf16.msra.mxu0 %v1369_v60  ;;  %1337 = vmatpush3.bf16.msra.mxu1 %v1369_v60  ;;  %v484_v41 = vmul.f32 %v1474_v6, %v445_v26  ;;  %v485_v42 = vmul.f32 %v1474_v6, %v446_v27  ;;  %v538_v43 = vmax.f32 %v506_v22, 0.0  ;;  %v553_v44 = vmax.f32 %v521_v23, 0.0 }
  0x25   : > { %v554_v45 = vmax.f32 %v522_v24, 0.0  ;;  %v470_v46 = vmul.f32 %v1474_v6, %v431_v31  ;;  %v471_v47 = vmul.f32 %v1474_v6, %v432_v36  ;;  %v486_v48 = vmul.f32 %v1474_v6, %v447_v37 }
  0x26   : > { %v487_v49 = vmul.f32 %v1474_v6, %v448_v38  ;;  %v507_v50 = vadd.f32 %v1481_v9, %v468_v35  ;;  %v508_v51 = vadd.f32 %v1481_v9, %v469_v40  ;;  %v523_v52 = vadd.f32 %v1481_v9, %v484_v41 }
  0x27   : > { %1291 = vmatmul.mubr.bf16.vlgmr.msra.gmra.mrb[0].mxu0 %v594_v18  ;;  %1307 = vmatmul.mubr.bf16.vlgmr.msra.gmra.mrb[0].mxu1 %v602_v21  ;;  %v524_v53 = vadd.f32 %v1481_v9, %v485_v42  ;;  %v596_v54 = vpack.c.bf16 %v536_v32, %v535_v30  ;;  %v604_v55 = vpack.c.bf16 %v552_v34, %v551_v33  ;;  %v1595_v30 = vld [vmem:[%s1714_s5] ss:$0 sm:$0xff] }
  0x28   : > { %1294 = vmatprep.mubr.bf16.mxu0 %v595_v28  ;;  %1310 = vmatprep.mubr.bf16.mxu1 %v603_v29  ;;  %v597_v56 = vpack.c.bf16 %v538_v43, %v537_v39  ;;  %v605_v57 = vpack.c.bf16 %v554_v45, %v553_v44  ;;  %v509_v59 = vadd.f32 %v1481_v9, %v470_v46  ;;  %v539_v2 = vmax.f32 %v507_v50, 0.0  ;;  %v1590_v29 = vld [vmem:[%s1713_s4] ss:$0 sm:$0xff] }
  0x29   : > { %v510_v60 = vadd.f32 %v1481_v9, %v471_v47  ;;  %v525_v61 = vadd.f32 %v1481_v9, %v486_v48  ;;  %v526_v62 = vadd.f32 %v1481_v9, %v487_v49  ;;  %v540_v3 = vmax.f32 %v508_v51, 0.0 }
  0x2a   : > { %v555_v4 = vmax.f32 %v523_v52, 0.0  ;;  %v556_v5 = vmax.f32 %v524_v53, 0.0  ;;  %v472_v7 = vmul.f32 %v1474_v6, %v433_v58  ;;  %v473_v8 = vmul.f32 %v1474_v6, %v434_v63 }
  0x2b   : > { %v488_v10 = vmul.f32 %v1474_v6, %v449_v0  ;;  %v489_v11 = vmul.f32 %v1474_v6, %v450_v1  ;;  %v541_v12 = vmax.f32 %v509_v59, 0.0  ;;  %v542_v13 = vmax.f32 %v510_v60, 0.0 }
  0x2c   : > { %v557_v14 = vmax.f32 %v525_v61, 0.0  ;;  %v558_v15 = vmax.f32 %v526_v62, 0.0  ;;  %v598_v16 = vpack.c.bf16 %v540_v3, %v539_v2  ;;  %v606_v17 = vpack.c.bf16 %v556_v5, %v555_v4 }
  0x2d   : > { %v511_v18 = vadd.f32 %v1481_v9, %v472_v7  ;;  %v512_v19 = vadd.f32 %v1481_v9, %v473_v8  ;;  %v527_v20 = vadd.f32 %v1481_v9, %v488_v10  ;;  %v528_v21 = vadd.f32 %v1481_v9, %v489_v11 }
  0x2e   : > { %v599_v22 = vpack.c.bf16 %v542_v13, %v541_v12  ;;  %v607_v23 = vpack.c.bf16 %v558_v15, %v557_v14 }
  0x2f   : > { %1295 = vmatmul.mubr.bf16.gmra.mrb[4].mxu0 %v596_v54  ;;  %1311 = vmatmul.mubr.bf16.gmra.mrb[4].mxu1 %v604_v55  ;;  %v543_v6 = vmax.f32 %v511_v18, 0.0  ;;  %v544_v24 = vmax.f32 %v512_v19, 0.0  ;;  %v559_v25 = vmax.f32 %v527_v20, 0.0  ;;  %v560_v26 = vmax.f32 %v528_v21, 0.0 }
  0x30   : > { %1298 = vmatprep.mubr.bf16.mxu0 %v597_v56  ;;  %1314 = vmatprep.mubr.bf16.mxu1 %v605_v57 }
  0x31   : > { %v600_v27 = vpack.c.bf16 %v544_v24, %v543_v6  ;;  %v608_v28 = vpack.c.bf16 %v560_v26, %v559_v25 }
  0x37   : > { %1299 = vmatmul.mubr.bf16.gmra.mrb[8].mxu0 %v598_v16  ;;  %1315 = vmatmul.mubr.bf16.gmra.mrb[8].mxu1 %v606_v17 }
  0x38   : > { %1302 = vmatprep.mubr.bf16.mxu0 %v599_v22  ;;  %1318 = vmatprep.mubr.bf16.mxu1 %v607_v23 }
  0x3f   : > { %1303 = vmatmul.mubr.bf16.gmra.mrb[12].mxu0 %v600_v27  ;;  %1319 = vmatmul.mubr.bf16.gmra.mrb[12].mxu1 %v608_v28 }
  0xfa   : > { %v1292_v9 = vpop.f32.mrb[0].mxu0  ;;  %v1308_v31 = vpop.f32.mrb[0].mxu1 }
  0xfb   : > { %v942_v32 = vmul.f32 %v1292_v9, %v1590_v29  ;;  %v958_v33 = vmul.f32 %v1308_v31, %v1590_v29  ;;  %v707_v34 = vpop.f32.mrb[1].mxu0  ;;  %v771_v35 = vpop.f32.mrb[1].mxu1 }
  0xfc   : > { %v940_v36 = vmul.f32 %v1590_v29, %v707_v34  ;;  %v956_v37 = vmul.f32 %v1590_v29, %v771_v35  ;;  %v1293_v38 = vpop.f32.mrb[2].mxu0  ;;  %v1309_v39 = vpop.f32.mrb[2].mxu1 }
  0xfd   : > { %v981_v40 = vadd.f32 %v1595_v30, %v942_v32  ;;  %v997_v41 = vadd.f32 %v1595_v30, %v958_v33  ;;  %v943_v42 = vmul.f32 %v1293_v38, %v1590_v29  ;;  %v959_v43 = vmul.f32 %v1309_v39, %v1590_v29  ;;  %v710_v44 = vpop.f32.mrb[3].mxu0  ;;  %v774_v45 = vpop.f32.mrb[3].mxu1 }
  0xfe   : > { %v979_v46 = vadd.f32 %v1595_v30, %v940_v36  ;;  %v995_v47 = vadd.f32 %v1595_v30, %v956_v37  ;;  %v941_v48 = vmul.f32 %v1590_v29, %v710_v44  ;;  %v957_v49 = vmul.f32 %v1590_v29, %v774_v45 }
  0xff   : > { %v1013_v50 = vmax.f32 %v981_v40, 0.0  ;;  %v1029_v51 = vmax.f32 %v997_v41, 0.0  ;;  %v982_v52 = vadd.f32 %v1595_v30, %v943_v42  ;;  %v998_v53 = vadd.f32 %v1595_v30, %v959_v43 }
 0x100   : > { %v1011_v54 = vmax.f32 %v979_v46, 0.0  ;;  %v1027_v55 = vmax.f32 %v995_v47, 0.0  ;;  %v980_v56 = vadd.f32 %v1595_v30, %v941_v48  ;;  %v996_v57 = vadd.f32 %v1595_v30, %v957_v49 }
 0x101   : > { %1045 = vst [vmem:[%s1610_s13 + $0x10] sm:$0xff] %v1013_v50  ;;  %1061 = vst [vmem:[%s1610_s13 + $0x90] sm:$0xff] %v1029_v51  ;;  %v1014_v58 = vmax.f32 %v982_v52, 0.0  ;;  %v1030_v59 = vmax.f32 %v998_v53, 0.0 }
 0x102   : > { %1043 = vst [vmem:[%s1610_s13] sm:$0xff] %v1011_v54  ;;  %1059 = vst [vmem:[%s1610_s13 + $0x80] sm:$0xff] %v1027_v55  ;;  %v1012_v60 = vmax.f32 %v980_v56, 0.0  ;;  %v1028_v61 = vmax.f32 %v996_v57, 0.0  ;;  %v1296_v62 = vpop.f32.mrb[4].mxu0  ;;  %v1312_v63 = vpop.f32.mrb[4].mxu1 }
 0x103   : > { %1046 = vst [vmem:[%s1610_s13 + $0x18] sm:$0xff] %v1014_v58  ;;  %1062 = vst [vmem:[%s1610_s13 + $0x98] sm:$0xff] %v1030_v59  ;;  %v946_v0 = vmul.f32 %v1296_v62, %v1590_v29  ;;  %v962_v1 = vmul.f32 %v1312_v63, %v1590_v29  ;;  %v723_v2 = vpop.f32.mrb[5].mxu0  ;;  %v787_v3 = vpop.f32.mrb[5].mxu1 }
 0x104   : > { %1044 = vst [vmem:[%s1610_s13 + $0x8] sm:$0xff] %v1012_v60  ;;  %1060 = vst [vmem:[%s1610_s13 + $0x88] sm:$0xff] %v1028_v61  ;;  %v944_v4 = vmul.f32 %v1590_v29, %v723_v2  ;;  %v960_v5 = vmul.f32 %v1590_v29, %v787_v3  ;;  %v1297_v7 = vpop.f32.mrb[6].mxu0  ;;  %v1313_v8 = vpop.f32.mrb[6].mxu1 }
 0x105   : > { %v985_v10 = vadd.f32 %v1595_v30, %v946_v0  ;;  %v1001_v11 = vadd.f32 %v1595_v30, %v962_v1  ;;  %v947_v12 = vmul.f32 %v1297_v7, %v1590_v29  ;;  %v963_v13 = vmul.f32 %v1313_v8, %v1590_v29  ;;  %v726_v14 = vpop.f32.mrb[7].mxu0  ;;  %v790_v15 = vpop.f32.mrb[7].mxu1 }
 0x106   : > { %v983_v16 = vadd.f32 %v1595_v30, %v944_v4  ;;  %v999_v17 = vadd.f32 %v1595_v30, %v960_v5  ;;  %v945_v18 = vmul.f32 %v1590_v29, %v726_v14  ;;  %v961_v19 = vmul.f32 %v1590_v29, %v790_v15 }
 0x107   : > { %v1017_v20 = vmax.f32 %v985_v10, 0.0  ;;  %v1033_v21 = vmax.f32 %v1001_v11, 0.0  ;;  %v986_v22 = vadd.f32 %v1595_v30, %v947_v12  ;;  %v1002_v23 = vadd.f32 %v1595_v30, %v963_v13 }
 0x108   : > { %v1015_v6 = vmax.f32 %v983_v16, 0.0  ;;  %v1031_v24 = vmax.f32 %v999_v17, 0.0  ;;  %v984_v25 = vadd.f32 %v1595_v30, %v945_v18  ;;  %v1000_v26 = vadd.f32 %v1595_v30, %v961_v19 }
 0x109   : > { %1049 = vst [vmem:[%s1610_s13 + $0x30] sm:$0xff] %v1017_v20  ;;  %1065 = vst [vmem:[%s1610_s13 + $0xb0] sm:$0xff] %v1033_v21  ;;  %v1018_v27 = vmax.f32 %v986_v22, 0.0  ;;  %v1034_v28 = vmax.f32 %v1002_v23, 0.0 }
 0x10a   : > { %1047 = vst [vmem:[%s1610_s13 + $0x20] sm:$0xff] %v1015_v6  ;;  %1063 = vst [vmem:[%s1610_s13 + $0xa0] sm:$0xff] %v1031_v24  ;;  %v1016_v9 = vmax.f32 %v984_v25, 0.0  ;;  %v1032_v31 = vmax.f32 %v1000_v26, 0.0  ;;  %v1300_v32 = vpop.f32.mrb[8].mxu0  ;;  %v1316_v33 = vpop.f32.mrb[8].mxu1 }
 0x10b   : > { %1050 = vst [vmem:[%s1610_s13 + $0x38] sm:$0xff] %v1018_v27  ;;  %1066 = vst [vmem:[%s1610_s13 + $0xb8] sm:$0xff] %v1034_v28  ;;  %v950_v34 = vmul.f32 %v1300_v32, %v1590_v29  ;;  %v966_v35 = vmul.f32 %v1316_v33, %v1590_v29  ;;  %v739_v36 = vpop.f32.mrb[9].mxu0  ;;  %v803_v37 = vpop.f32.mrb[9].mxu1 }
 0x10c   : > { %1048 = vst [vmem:[%s1610_s13 + $0x28] sm:$0xff] %v1016_v9  ;;  %1064 = vst [vmem:[%s1610_s13 + $0xa8] sm:$0xff] %v1032_v31  ;;  %v948_v38 = vmul.f32 %v1590_v29, %v739_v36  ;;  %v964_v39 = vmul.f32 %v1590_v29, %v803_v37  ;;  %v1301_v40 = vpop.f32.mrb[10].mxu0  ;;  %v1317_v41 = vpop.f32.mrb[10].mxu1 }
 0x10d   : > { %v989_v42 = vadd.f32 %v1595_v30, %v950_v34  ;;  %v1005_v43 = vadd.f32 %v1595_v30, %v966_v35  ;;  %v951_v44 = vmul.f32 %v1301_v40, %v1590_v29  ;;  %v967_v45 = vmul.f32 %v1317_v41, %v1590_v29  ;;  %v742_v46 = vpop.f32.mrb[11].mxu0  ;;  %v806_v47 = vpop.f32.mrb[11].mxu1 }
 0x10e   : > { %v987_v48 = vadd.f32 %v1595_v30, %v948_v38  ;;  %v1003_v49 = vadd.f32 %v1595_v30, %v964_v39  ;;  %v949_v50 = vmul.f32 %v1590_v29, %v742_v46  ;;  %v965_v51 = vmul.f32 %v1590_v29, %v806_v47 }
 0x10f   : > { %v1021_v52 = vmax.f32 %v989_v42, 0.0  ;;  %v1037_v53 = vmax.f32 %v1005_v43, 0.0  ;;  %v990_v54 = vadd.f32 %v1595_v30, %v951_v44  ;;  %v1006_v55 = vadd.f32 %v1595_v30, %v967_v45 }
 0x110   : > { %v1019_v56 = vmax.f32 %v987_v48, 0.0  ;;  %v1035_v57 = vmax.f32 %v1003_v49, 0.0  ;;  %v988_v58 = vadd.f32 %v1595_v30, %v949_v50  ;;  %v1004_v59 = vadd.f32 %v1595_v30, %v965_v51 }
 0x111   : > { %1053 = vst [vmem:[%s1610_s13 + $0x50] sm:$0xff] %v1021_v52  ;;  %1069 = vst [vmem:[%s1610_s13 + $0xd0] sm:$0xff] %v1037_v53  ;;  %v1022_v60 = vmax.f32 %v990_v54, 0.0  ;;  %v1038_v61 = vmax.f32 %v1006_v55, 0.0 }
 0x112   : > { %1051 = vst [vmem:[%s1610_s13 + $0x40] sm:$0xff] %v1019_v56  ;;  %1067 = vst [vmem:[%s1610_s13 + $0xc0] sm:$0xff] %v1035_v57  ;;  %v1020_v62 = vmax.f32 %v988_v58, 0.0  ;;  %v1036_v63 = vmax.f32 %v1004_v59, 0.0  ;;  %v1304_v0 = vpop.f32.mrb[12].mxu0  ;;  %v1320_v1 = vpop.f32.mrb[12].mxu1 }
 0x113   : > { %1054 = vst [vmem:[%s1610_s13 + $0x58] sm:$0xff] %v1022_v60  ;;  %1070 = vst [vmem:[%s1610_s13 + $0xd8] sm:$0xff] %v1038_v61  ;;  %v954_v2 = vmul.f32 %v1304_v0, %v1590_v29  ;;  %v970_v3 = vmul.f32 %v1320_v1, %v1590_v29  ;;  %v755_v4 = vpop.f32.mrb[13].mxu0  ;;  %v819_v5 = vpop.f32.mrb[13].mxu1 }
 0x114   : > { %1052 = vst [vmem:[%s1610_s13 + $0x48] sm:$0xff] %v1020_v62  ;;  %1068 = vst [vmem:[%s1610_s13 + $0xc8] sm:$0xff] %v1036_v63  ;;  %v952_v7 = vmul.f32 %v1590_v29, %v755_v4  ;;  %v968_v8 = vmul.f32 %v1590_v29, %v819_v5  ;;  %v1305_v10 = vpop.f32.mrb[14].mxu0  ;;  %v1321_v11 = vpop.f32.mrb[14].mxu1 }
 0x115   : > { %v993_v12 = vadd.f32 %v1595_v30, %v954_v2  ;;  %v1009_v13 = vadd.f32 %v1595_v30, %v970_v3  ;;  %v955_v14 = vmul.f32 %v1305_v10, %v1590_v29  ;;  %v971_v15 = vmul.f32 %v1321_v11, %v1590_v29  ;;  %v758_v16 = vpop.f32.mrb[15].mxu0  ;;  %v822_v17 = vpop.f32.mrb[15].mxu1 }
 0x116   : > { %v991_v18 = vadd.f32 %v1595_v30, %v952_v7  ;;  %v1007_v19 = vadd.f32 %v1595_v30, %v968_v8  ;;  %v953_v20 = vmul.f32 %v1590_v29, %v758_v16  ;;  %v969_v21 = vmul.f32 %v1590_v29, %v822_v17 }
 0x117   : > { %v1025_v22 = vmax.f32 %v993_v12, 0.0  ;;  %v1041_v23 = vmax.f32 %v1009_v13, 0.0  ;;  %v994_v6 = vadd.f32 %v1595_v30, %v955_v14  ;;  %v1010_v24 = vadd.f32 %v1595_v30, %v971_v15 }
 0x118   : > { %v1023_v25 = vmax.f32 %v991_v18, 0.0  ;;  %v1039_v26 = vmax.f32 %v1007_v19, 0.0  ;;  %v992_v27 = vadd.f32 %v1595_v30, %v953_v20  ;;  %v1008_v28 = vadd.f32 %v1595_v30, %v969_v21 }
 0x119   : > { %1057 = vst [vmem:[%s1610_s13 + $0x70] sm:$0xff] %v1025_v22  ;;  %1073 = vst [vmem:[%s1610_s13 + $0xf0] sm:$0xff] %v1041_v23  ;;  %v1026_v9 = vmax.f32 %v994_v6, 0.0  ;;  %v1042_v29 = vmax.f32 %v1010_v24, 0.0 }
 0x11a   : > { %1055 = vst [vmem:[%s1610_s13 + $0x60] sm:$0xff] %v1023_v25  ;;  %1071 = vst [vmem:[%s1610_s13 + $0xe0] sm:$0xff] %v1039_v26  ;;  %v1024_v31 = vmax.f32 %v992_v27, 0.0  ;;  %v1040_v32 = vmax.f32 %v1008_v28, 0.0 }
 0x11b   : > { %1058 = vst [vmem:[%s1610_s13 + $0x78] sm:$0xff] %v1026_v9  ;;  %1074 = vst [vmem:[%s1610_s13 + $0xf8] sm:$0xff] %v1042_v29 }
 0x11c   : > { %1056 = vst [vmem:[%s1610_s13 + $0x68] sm:$0xff] %v1024_v31  ;;  %1072 = vst [vmem:[%s1610_s13 + $0xe8] sm:$0xff] %v1040_v32 }
 0x11d PF: > { %s16_s23 = sadd.s32 1, %s1392_s23   ;;  %s1716_s21 = smov %s1388_s22 }
 0x11e   : > { %p13_p5 = scmp.ge.s32.totalorder %s16_s23, 4   ;;  %s1717_s22 = smov %s1719_s24 }
 0x120   :  { %15 = sbr.rel (!%p13_p5) target bundleno = 2 (0x2), region = 97 }

// kernel: _lambda_.5
= control target key start
LH: loop header
LB: loop body
LE: loop exit
PB: predicated region body
PF: predicated region fallthrough
CT: control target
= control target key end

     0   :  { %s6076_s27 = smov 0   ;;  %s7009_s0 = inlined_call_operand.vmem [shape: f32[2,18,18,128], index: 0, kind: input, shape index: {}]   ;;  %s7010_s1 = inlined_call_operand.vmem [shape: bf16[9,128,128], index: 1, kind: input, shape index: {}]   ;;  %s7011_s2 = inlined_call_operand.vmem [shape: f32[1,128], index: 2, kind: input, shape index: {}]   ;;  %s7012_s3 = inlined_call_operand.vmem [shape: f32[1,128], index: 3, kind: input, shape index: {}]   ;;  %s7013_s4 = inlined_call_operand.vmem [shape: bf16[128,128], index: 4, kind: input, shape index: {}]   ;;  %s7014_s5 = inlined_call_operand.vmem [shape: bf16[128,128], index: 5, kind: input, shape index: {}]   ;;  %s7015_s6 = inlined_call_operand.vmem [shape: bf16[128,128], index: 6, kind: input, shape index: {}]   ;;  %s7016_s7 = inlined_call_operand.vmem [shape: f32[2,256,128], index: 7, kind: output, shape index: {0}]   ;;  %s7017_s8 = inlined_call_operand.vmem [shape: f32[2,1,128], index: 8, kind: output, shape index: {1}]  }
   0x1 LB: > { %s4430_s28 = sadd.s32 4294967295, %s6027_s27   ;;  %p4434_p0 = scmp.ge.s32.totalorder %s6027_s27, 1  ;;  %s6027_s27 = sphi %s6076_s27, %s19_s27  }
   0x2   : > { %p265_p1 = scmp.lt.s32.totalorder %s6027_s27, 3 }
   0x4   : > { %p266_p2 = pnand %p4434_p0, %p265_p1 }
   0x6   : > { %269 = sbr.rel (%p266_p2) target bundleno = 1340 (0x53c), region = 48 }
   0xd   : > { %v5921_v0 = vld [vmem:[%s7010_s1 + $0xc0] sm:$0xff]   ;;  %p302_p3 = scmp.lt.s32.totalorder %s4430_s28, 1  ;;  %v5922_v1 = vld [vmem:[%s7010_s1 + $0xc8] sm:$0xff]   ;;  %v5923_v2 = vld [vmem:[%s7010_s1 + $0xd0] sm:$0xff]   ;;  %vm6030_vm0 = vmmov 0  }
   0xe   : > { %5262 = vmatprep.subr.bf16.mxu0 %v5921_v0  ;;  %v5927_v3 = vld [vmem:[%s7010_s1] sm:$0xff]   ;;  %v5924_v4 = vld [vmem:[%s7010_s1 + $0xd8] sm:$0xff]   ;;  %v5929_v5 = vld [vmem:[%s7010_s1 + $0x8] sm:$0xff]  }
   0xf   : > { %s7023_s28 = smov (!%p302_p3, %s4430_s28), 1  ;;  %5263 = vmatpush3.bf16.msra.mxu0 %v5921_v0  ;;  %5118 = vmatprep.subr.bf16.mxu1 %v5927_v3  ;;  %v5931_v6 = vld [vmem:[%s7010_s1 + $0x10] sm:$0xff]   ;;  %v5925_v9 = vld [vmem:[%s7010_s1 + $0xe0] sm:$0xff]   ;;  %v5933_v11 = vld [vmem:[%s7010_s1 + $0x18] sm:$0xff]  }
  0x10   : > { %5264 = vmatprep.subr.bf16.mxu0 %v5922_v1  ;;  %s5910_s13 = smul.u32 432, %s7023_s28  ;;  %5119 = vmatpush3.bf16.msra.mxu1 %v5927_v3  ;;  %v5926_v12 = vld [vmem:[%s7010_s1 + $0xe8] sm:$0xff]   ;;  %v5934_v13 = vld [vmem:[%s7010_s1 + $0x20] sm:$0xff]   ;;  %v5928_v14 = vld [vmem:[%s7010_s1 + $0xf0] sm:$0xff]   ;;  %s4859_s17 = sshll.u32 %s7023_s28, 8 }
  0x11   : > { %5120 = vmatprep.subr.bf16.mxu1 %v5929_v5  ;;  %v5936_v15 = vld [vmem:[%s7010_s1 + $0x28] sm:$0xff]   ;;  %v5930_v18 = vld [vmem:[%s7010_s1 + $0xf8] sm:$0xff]   ;;  %v5937_v21 = vld [vmem:[%s7010_s1 + $0x30] sm:$0xff]   ;;  %s6935_s20 = scalar_lea.vmem %s7016_s7, %s4859_s17  ;;  %s314_s19 = scalar_lea.vmem %s7017_s8, %s7023_s28 }
  0x12   : > { %s6108_s22 = scalar_lea.vmem %s7009_s0, %s5910_s13  ;;  %v5932_v23 = vld [vmem:[%s7010_s1 + $0x100] sm:$0xff]   ;;  %v5939_v27 = vld [vmem:[%s7010_s1 + $0x38] sm:$0xff]   ;;  %v5935_v29 = vld [vmem:[%s7010_s1 + $0x108] sm:$0xff]  }
  0x13   : > { %5265 = vmatpush3.bf16.msra.mxu0 %v5922_v1  ;;  %v4494_v7 = vld [vmem:[%s6108_s22 + $0x18] sm:$0xff]  ;;  %v4495_v8 = vld [vmem:[%s6108_s22 + $0x20] sm:$0xff]  ;;  %v349_v17 = vld [vmem:[%s6108_s22 + $0x8] sm:$0xff] }
  0x14   : > { %5266 = vmatprep.subr.bf16.mxu0 %v5923_v2  ;;  %v1522_v10 = vpack.c.bf16 %v4495_v8, %v4494_v7  ;;  %5121 = vmatpush3.bf16.msra.mxu1 %v5929_v5  ;;  %v348_v16 = vld [vmem:[%s6108_s22] sm:$0xff]  ;;  %v4496_v20 = vld [vmem:[%s6108_s22 + $0x30] sm:$0xff]  ;;  %v4497_v22 = vld [vmem:[%s6108_s22 + $0x38] sm:$0xff] }
  0x15   : > { %5122 = vmatprep.subr.bf16.mxu1 %v5931_v6  ;;  %v412_v19 = vpack.c.bf16 %v349_v17, %v348_v16  ;;  %v4498_v24 = vld [vmem:[%s6108_s22 + $0x48] sm:$0xff]  ;;  %v4499_v25 = vld [vmem:[%s6108_s22 + $0x50] sm:$0xff]  ;;  %v1523_v26 = vpack.c.bf16 %v4497_v22, %v4496_v20  ;;  %v4500_v30 = vld [vmem:[%s6108_s22 + $0x60] sm:$0xff] }
  0x16   : > { %5278 = vmatprep.mubr.bf16.mxu0 %v1522_v10  ;;  %v1524_v28 = vpack.c.bf16 %v4499_v25, %v4498_v24  ;;  %v4501_v31 = vld [vmem:[%s6108_s22 + $0x68] sm:$0xff]  ;;  %v4502_v32 = vld [vmem:[%s6108_s22 + $0x78] sm:$0xff]  ;;  %v5944_v33 = vld [vmem:[%s7010_s1 + $0x40] sm:$0xff]  }
  0x17   : > { %5267 = vmatpush3.bf16.msra.mxu0 %v5923_v2  ;;  %5134 = vmatprep.mubr.bf16.mxu1 %v412_v19  ;;  %v4503_v34 = vld [vmem:[%s6108_s22 + $0x80] sm:$0xff]  ;;  %v5938_v35 = vld [vmem:[%s7010_s1 + $0x110] sm:$0xff]   ;;  %v1525_v36 = vpack.c.bf16 %v4501_v31, %v4500_v30  ;;  %v5946_v37 = vld [vmem:[%s7010_s1 + $0x48] sm:$0xff]  }
  0x18   : > { %5268 = vmatprep.subr.bf16.mxu0 %v5924_v4  ;;  %5123 = vmatpush3.bf16.msra.mxu1 %v5931_v6  ;;  %v1526_v38 = vpack.c.bf16 %v4503_v34, %v4502_v32  ;;  %v5940_v39 = vld [vmem:[%s7010_s1 + $0x118] sm:$0xff]   ;;  %v4504_v40 = vld [vmem:[%s6108_s22 + $0x90] sm:$0xff]  ;;  %v4506_v43 = vld [vmem:[%s6108_s22 + $0xa8] sm:$0xff] }
  0x19   : > { %5124 = vmatprep.subr.bf16.mxu1 %v5933_v11  ;;  %v5947_v41 = vld [vmem:[%s7010_s1 + $0x50] sm:$0xff]   ;;  %v4505_v42 = vld [vmem:[%s6108_s22 + $0x98] sm:$0xff]  ;;  %v5941_v45 = vld [vmem:[%s7010_s1 + $0x120] sm:$0xff]  }
  0x1a   : > { %v4507_v44 = vld [vmem:[%s6108_s22 + $0xb0] sm:$0xff]  ;;  %v1527_v46 = vpack.c.bf16 %v4505_v42, %v4504_v40  ;;  %v5949_v47 = vld [vmem:[%s7010_s1 + $0x58] sm:$0xff]   ;;  %v5942_v49 = vld [vmem:[%s7010_s1 + $0x128] sm:$0xff]  }
  0x1b   : > { %5269 = vmatpush3.bf16.msra.mxu0 %v5924_v4  ;;  %v1528_v48 = vpack.c.bf16 %v4507_v44, %v4506_v43  ;;  %v4508_v50 = vld [vmem:[%s6108_s22 + $0xc0] sm:$0xff]  ;;  %v4509_v52 = vld [vmem:[%s6108_s22 + $0xc8] sm:$0xff]  ;;  %v4510_v53 = vld [vmem:[%s6108_s22 + $0xd8] sm:$0xff] }
  0x1c   : > { %5270 = vmatprep.subr.bf16.mxu0 %v5925_v9  ;;  %5125 = vmatpush3.bf16.msra.mxu1 %v5933_v11  ;;  %v5950_v51 = vld [vmem:[%s7010_s1 + $0x60] sm:$0xff]   ;;  %v5943_v55 = vld [vmem:[%s7010_s1 + $0x130] sm:$0xff]   ;;  %v1529_v56 = vpack.c.bf16 %v4509_v52, %v4508_v50  ;;  %v5952_v57 = vld [vmem:[%s7010_s1 + $0x68] sm:$0xff]  }
  0x1d   : > { %5126 = vmatprep.subr.bf16.mxu1 %v5934_v13  ;;  %v4511_v54 = vld [vmem:[%s6108_s22 + $0xe0] sm:$0xff]  ;;  %v5945_v59 = vld [vmem:[%s7010_s1 + $0x138] sm:$0xff]   ;;  %v4512_v60 = vld [vmem:[%s6108_s22 + $0xf0] sm:$0xff] }
  0x1e   : > { %v1530_v58 = vpack.c.bf16 %v4511_v54, %v4510_v53  ;;  %v4513_v61 = vld [vmem:[%s6108_s22 + $0xf8] sm:$0xff]  ;;  %v4514_v62 = vld [vmem:[%s6108_s22 + $0x108] sm:$0xff]  ;;  %v5953_v63 = vld [vmem:[%s7010_s1 + $0x70] sm:$0xff]  }
  0x1f   : > { %5271 = vmatpush3.bf16.msra.mxu0 %v5925_v9  ;;  %v4515_v0 = vld [vmem:[%s6108_s22 + $0x110] sm:$0xff]  ;;  %v5948_v1 = vld [vmem:[%s7010_s1 + $0x140] sm:$0xff]   ;;  %v1531_v2 = vpack.c.bf16 %v4513_v61, %v4512_v60  ;;  %v5955_v3 = vld [vmem:[%s7010_s1 + $0x78] sm:$0xff]  }
  0x20   : > { %5272 = vmatprep.subr.bf16.mxu0 %v5926_v12  ;;  %5127 = vmatpush3.bf16.msra.mxu1 %v5934_v13  ;;  %v1532_v4 = vpack.c.bf16 %v4515_v0, %v4514_v62  ;;  %v4516_v5 = vld [vmem:[%s6108_s22 + $0x120] sm:$0xff]  ;;  %v4517_v6 = vld [vmem:[%s6108_s22 + $0x128] sm:$0xff]  ;;  %v4518_v8 = vld [vmem:[%s6108_s22 + $0x138] sm:$0xff] }
  0x21   : > { %5128 = vmatprep.subr.bf16.mxu1 %v5936_v15  ;;  %v5960_v7 = vld [vmem:[%s7010_s1 + $0x80] sm:$0xff]   ;;  %v4521_v13 = vld [vmem:[%s6108_s22 + $0x158] sm:$0xff]  ;;  %v4525_v19 = vld [vmem:[%s6108_s22 + $0x188] sm:$0xff] }
  0x22   : > { %v4519_v9 = vld [vmem:[%s6108_s22 + $0x140] sm:$0xff]  ;;  %v4552_v24 = vld [vmem:[%s6108_s22 + $0x31] sm:$0xff]  ;;  %v5951_v32 = vld [vmem:[%s7010_s1 + $0x148] sm:$0xff]  }
  0x23   : > { %5273 = vmatpush3.bf16.msra.mxu0 %v5926_v12  ;;  %v1534_v11 = vpack.c.bf16 %v4519_v9, %v4518_v8  ;;  %v4520_v12 = vld [vmem:[%s6108_s22 + $0x150] sm:$0xff]  ;;  %v4550_v20 = vld [vmem:[%s6108_s22 + $0x19] sm:$0xff]  ;;  %v4556_v34 = vld [vmem:[%s6108_s22 + $0x61] sm:$0xff] }
  0x24   : > { %5274 = vmatprep.subr.bf16.mxu0 %v5928_v14  ;;  %5129 = vmatpush3.bf16.msra.mxu1 %v5936_v15  ;;  %v4523_v15 = vld [vmem:[%s6108_s22 + $0x170] sm:$0xff]  ;;  %v1535_v16 = vpack.c.bf16 %v4521_v13, %v4520_v12  ;;  %v4553_v25 = vld [vmem:[%s6108_s22 + $0x39] sm:$0xff]  ;;  %v4564_v53 = vld [vmem:[%s6108_s22 + $0xc1] sm:$0xff] }
  0x25   : > { %5130 = vmatprep.subr.bf16.mxu1 %v5937_v21  ;;  %v1893_v31 = vpack.c.bf16 %v4553_v25, %v4552_v24  ;;  %v4560_v43 = vld [vmem:[%s6108_s22 + $0x91] sm:$0xff]  ;;  %v4561_v44 = vld [vmem:[%s6108_s22 + $0x99] sm:$0xff]  ;;  %v4565_v54 = vld [vmem:[%s6108_s22 + $0xc9] sm:$0xff] }
  0x26   : > { %v6271_v50 = vpack.c.bf16 %v4561_v44, %v4560_v43  ;;  %v6294_v60 = vpack.c.bf16 %v4565_v54, %v4564_v53  ;;  %v5961_v61 = vld [vmem:[%s7010_s1 + $0x178] sm:$0xff]   ;;  %v4572_v8 = vld [vmem:[%s6108_s22 + $0x121] sm:$0xff]  ;;  %v4573_v9 = vld [vmem:[%s6108_s22 + $0x129] sm:$0xff] }
  0x27   : > { %5275 = vmatpush3.bf16.msra.mxu0 %v5928_v14  ;;  %v4522_v14 = vld [vmem:[%s6108_s22 + $0x168] sm:$0xff]  ;;  %v4569_v0 = vld [vmem:[%s6108_s22 + $0xf9] sm:$0xff]  ;;  %v6330_v12 = vpack.c.bf16 %v4573_v9, %v4572_v8  ;;  %v5970_v43 = vld [vmem:[%s7010_s1 + $0x190] sm:$0xff]  }
  0x28   : > { %5276 = vmatprep.subr.bf16.mxu0 %v5930_v18  ;;  %5131 = vmatpush3.bf16.msra.mxu1 %v5937_v21  ;;  %v1536_v17 = vpack.c.bf16 %v4523_v15, %v4522_v14  ;;  %v4551_v21 = vld [vmem:[%s6108_s22 + $0x21] sm:$0xff]  ;;  %v4576_v14 = vld [vmem:[%s6108_s22 + $0x151] sm:$0xff]  ;;  %v4577_v15 = vld [vmem:[%s6108_s22 + $0x159] sm:$0xff] }
  0x29   : > { %5132 = vmatprep.subr.bf16.mxu1 %v5939_v27  ;;  %v4618_v53 = vld [vmem:[%s6108_s22 + $0xaa] sm:$0xff]  ;;  %v4619_v54 = vld [vmem:[%s6108_s22 + $0xb2] sm:$0xff] }
  0x2a   : > { %v5976_v9 = vld [vmem:[%s7010_s1 + $0x1b8] sm:$0xff]  }
  0x2b   : > { %5277 = vmatpush3.bf16.msra.mxu0 %v5930_v18  ;;  %v4524_v18 = vld [vmem:[%s6108_s22 + $0x180] sm:$0xff] }
  0x2c   : > { %5310 = vmatprep.subr.bf16.mxu0 %v5932_v23  ;;  %5133 = vmatpush3.bf16.msra.mxu1 %v5939_v27  ;;  %v1537_v22 = vpack.c.bf16 %v4525_v19, %v4524_v18  ;;  %v718_v27 = vld [vmem:[%s6108_s22 + $0x9] sm:$0xff]  ;;  %v6342_v18 = vpack.c.bf16 %v4577_v15, %v4576_v14  ;;  %v4625_v14 = vld [vmem:[%s6108_s22 + $0xfa] sm:$0xff] }
  0x2d   : > { %5166 = vmatprep.subr.bf16.mxu1 %v5944_v33  ;;  %v4626_v15 = vld [vmem:[%s6108_s22 + $0x10a] sm:$0xff] }
  0x2e   : > { %5279 = vmatmul.mubr.bf16.vlgmr.msra.gmra.mrb[0].mxu0 %v1523_v26 }
  0x2f   : > { %5311 = vmatpush3.bf16.msra.mxu0 %v5932_v23  ;;  %5282 = vmatprep.mubr.bf16.mxu0 %v1524_v28  ;;  %v1892_v23 = vpack.c.bf16 %v4551_v21, %v4550_v20  ;;  %v4580_v20 = vld [vmem:[%s6108_s22 + $0x181] sm:$0xff]  ;;  %v4581_v21 = vld [vmem:[%s6108_s22 + $0x189] sm:$0xff] }
  0x30   : > { %5312 = vmatprep.subr.bf16.mxu0 %v5935_v29  ;;  %5135 = vmatmul.mubr.bf16.vlgmr.msra.gmra.mrb[0].mxu1 %v1522_v10  ;;  %v1533_v10 = vpack.c.bf16 %v4517_v6, %v4516_v5  ;;  %v5971_v6 = vld [vmem:[%s7010_s1 + $0xb8] sm:$0xff]   ;;  %v6354_v24 = vpack.c.bf16 %v4581_v21, %v4580_v20 }
  0x31   : > { %5138 = vmatprep.mubr.bf16.mxu1 %v1523_v26  ;;  %5167 = vmatpush3.bf16.msra.mxu1 %v5944_v33  ;;  %v717_v26 = vld [vmem:[%s6108_s22 + $0x1] sm:$0xff]  ;;  %v6488_v21 = vld [vmem:[%s7010_s1 + $0x238] sm:$0xff]  }
  0x32   : > { %5168 = vmatprep.subr.bf16.mxu1 %v5946_v37  ;;  %v781_v30 = vpack.c.bf16 %v718_v27, %v717_v26  ;;  %v1087_v26 = vld [vmem:[%s6108_s22 + $0x2] sm:$0xff]  ;;  %v1088_v27 = vld [vmem:[%s6108_s22 + $0xa] sm:$0xff] }
  0x33   : > { %5313 = vmatpush3.bf16.msra.mxu0 %v5935_v29  ;;  %v4555_v29 = vld [vmem:[%s6108_s22 + $0x51] sm:$0xff] }
  0x34   : > { %5314 = vmatprep.subr.bf16.mxu0 %v5938_v35 }
  0x35   : > { %5169 = vmatpush3.bf16.msra.mxu1 %v5946_v37  ;;  %v4559_v37 = vld [vmem:[%s6108_s22 + $0x81] sm:$0xff] }
  0x36   : > { %5283 = vmatmul.mubr.bf16.gmra.mrb[4].mxu0 %v1525_v36  ;;  %5170 = vmatprep.subr.bf16.mxu1 %v5947_v41 }
  0x37   : > { %5286 = vmatprep.mubr.bf16.mxu0 %v1526_v38  ;;  %5315 = vmatpush3.bf16.msra.mxu0 %v5938_v35  ;;  %v4557_v35 = vld [vmem:[%s6108_s22 + $0x69] sm:$0xff] }
  0x38   : > { %5316 = vmatprep.subr.bf16.mxu0 %v5940_v39  ;;  %5139 = vmatmul.mubr.bf16.gmra.mrb[4].mxu1 %v1524_v28  ;;  %v4554_v28 = vld [vmem:[%s6108_s22 + $0x49] sm:$0xff]  ;;  %v1895_v40 = vpack.c.bf16 %v4557_v35, %v4556_v34  ;;  %v1151_v34 = vpack.c.bf16 %v1088_v27, %v1087_v26  ;;  %v4630_v26 = vld [vmem:[%s6108_s22 + $0x13a] sm:$0xff] }
  0x39   : > { %5142 = vmatprep.mubr.bf16.mxu1 %v1525_v36  ;;  %5171 = vmatpush3.bf16.msra.mxu1 %v5947_v41  ;;  %v6239_v33 = vpack.c.bf16 %v4555_v29, %v4554_v28  ;;  %v4558_v36 = vld [vmem:[%s6108_s22 + $0x79] sm:$0xff]  ;;  %v4631_v27 = vld [vmem:[%s6108_s22 + $0x142] sm:$0xff] }
  0x3a   : > { %5172 = vmatprep.subr.bf16.mxu1 %v5949_v47  ;;  %v5956_v41 = vld [vmem:[%s7010_s1 + $0x158] sm:$0xff]   ;;  %v6255_v42 = vpack.c.bf16 %v4559_v37, %v4558_v36  ;;  %v6364_v28 = vld [vmem:[%s7010_s1 + $0x200] sm:$0xff]   ;;  %v5967_v37 = vld [vmem:[%s7010_s1 + $0x188] sm:$0xff]  }
  0x3b   : > { %5317 = vmatpush3.bf16.msra.mxu0 %v5940_v39  ;;  %v5962_v39 = vld [vmem:[%s7010_s1 + $0x88] sm:$0xff]   ;;  %v4608_v29 = vld [vmem:[%s6108_s22 + $0x32] sm:$0xff] }
  0x3c   : > { %5318 = vmatprep.subr.bf16.mxu0 %v5941_v45 }
  0x3d   : > { %5173 = vmatpush3.bf16.msra.mxu1 %v5949_v47  ;;  %v4563_v47 = vld [vmem:[%s6108_s22 + $0xb1] sm:$0xff] }
  0x3e   : > { %5287 = vmatmul.mubr.bf16.gmra.mrb[8].mxu0 %v1527_v46  ;;  %5174 = vmatprep.subr.bf16.mxu1 %v5950_v51 }
  0x3f   : > { %5290 = vmatprep.mubr.bf16.mxu0 %v1528_v48  ;;  %5319 = vmatpush3.bf16.msra.mxu0 %v5941_v45  ;;  %v4562_v45 = vld [vmem:[%s6108_s22 + $0xa9] sm:$0xff] }
  0x40   : > { %5320 = vmatprep.subr.bf16.mxu0 %v5942_v49  ;;  %5143 = vmatmul.mubr.bf16.gmra.mrb[8].mxu1 %v1526_v38  ;;  %v5954_v38 = vld [vmem:[%s7010_s1 + $0x150] sm:$0xff]   ;;  %v6276_v52 = vpack.c.bf16 %v4563_v47, %v4562_v45  ;;  %v6393_v45 = vld [vmem:[%s7010_s1 + $0x208] sm:$0xff]   ;;  %v5972_v47 = vld [vmem:[%s7010_s1 + $0x198] sm:$0xff]  }
  0x41   : > { %5146 = vmatprep.mubr.bf16.mxu1 %v1527_v46  ;;  %5175 = vmatpush3.bf16.msra.mxu1 %v5950_v51  ;;  %v5963_v46 = vld [vmem:[%s7010_s1 + $0x90] sm:$0xff]   ;;  %v5958_v51 = vld [vmem:[%s7010_s1 + $0x168] sm:$0xff]  }
  0x42   : > { %5176 = vmatprep.subr.bf16.mxu1 %v5952_v57 }
  0x43   : > { %5321 = vmatpush3.bf16.msra.mxu0 %v5942_v49  ;;  %v5965_v49 = vld [vmem:[%s7010_s1 + $0x98] sm:$0xff]  }
  0x44   : > { %5322 = vmatprep.subr.bf16.mxu0 %v5943_v55 }
  0x45   : > { %5177 = vmatpush3.bf16.msra.mxu1 %v5952_v57  ;;  %v4567_v57 = vld [vmem:[%s6108_s22 + $0xe1] sm:$0xff] }
  0x46   : > { %5291 = vmatmul.mubr.bf16.gmra.mrb[12].mxu0 %v1529_v56  ;;  %5178 = vmatprep.subr.bf16.mxu1 %v5953_v63 }
  0x47   : > { %5294 = vmatprep.mubr.bf16.mxu0 %v1530_v58  ;;  %5323 = vmatpush3.bf16.msra.mxu0 %v5943_v55  ;;  %v4566_v55 = vld [vmem:[%s6108_s22 + $0xd9] sm:$0xff] }
  0x48   : > { %5324 = vmatprep.subr.bf16.mxu0 %v5945_v59  ;;  %5147 = vmatmul.mubr.bf16.gmra.mrb[12].mxu1 %v1528_v48  ;;  %v5957_v48 = vld [vmem:[%s7010_s1 + $0x160] sm:$0xff]   ;;  %v6299_v62 = vpack.c.bf16 %v4567_v57, %v4566_v55  ;;  %v6424_v57 = vld [vmem:[%s7010_s1 + $0x218] sm:$0xff]  }
  0x49   : > { %5150 = vmatprep.mubr.bf16.mxu1 %v1529_v56  ;;  %5179 = vmatpush3.bf16.msra.mxu1 %v5953_v63  ;;  %v5966_v56 = vld [vmem:[%s7010_s1 + $0xa0] sm:$0xff]   ;;  %v4568_v63 = vld [vmem:[%s6108_s22 + $0xf1] sm:$0xff] }
  0x4a   : > { %5180 = vmatprep.subr.bf16.mxu1 %v5955_v3  ;;  %v6315_v5 = vpack.c.bf16 %v4569_v0, %v4568_v63  ;;  %v5973_v55 = vld [vmem:[%s7010_s1 + $0x1a0] sm:$0xff]   ;;  %v4621_v0 = vld [vmem:[%s6108_s22 + $0xca] sm:$0xff] }
  0x4b   : > { %5325 = vmatpush3.bf16.msra.mxu0 %v5945_v59  ;;  %v5968_v59 = vld [vmem:[%s7010_s1 + $0xa8] sm:$0xff]  }
  0x4c   : > { %5358 = vmatprep.subr.bf16.mxu0 %v5948_v1  ;;  %v4620_v63 = vld [vmem:[%s6108_s22 + $0xc2] sm:$0xff] }
  0x4d   : > { %5181 = vmatpush3.bf16.msra.mxu1 %v5955_v3  ;;  %v4571_v3 = vld [vmem:[%s6108_s22 + $0x111] sm:$0xff] }
  0x4e   : > { %5295 = vmatmul.mubr.bf16.gmra.mrb[16].mxu0 %v1531_v2  ;;  %5214 = vmatprep.subr.bf16.mxu1 %v5960_v7 }
  0x4f   : > { %5298 = vmatprep.mubr.bf16.mxu0 %v1532_v4 }
  0x50   : > { %5151 = vmatmul.mubr.bf16.gmra.mrb[16].mxu1 %v1530_v58  ;;  %v5959_v58 = vld [vmem:[%s7010_s1 + $0x170] sm:$0xff]  }
  0x51   : > { %5154 = vmatprep.mubr.bf16.mxu1 %v1531_v2  ;;  %v4570_v2 = vld [vmem:[%s6108_s22 + $0x109] sm:$0xff] }
  0x56   : > { %5299 = vmatmul.mubr.bf16.gmra.mrb[20].mxu0 %v1533_v10 }
  0x57   : > { %5302 = vmatprep.mubr.bf16.mxu0 %v1534_v11 }
  0x58   : > { %5155 = vmatmul.mubr.bf16.gmra.mrb[20].mxu1 %v1532_v4  ;;  %v5964_v4 = vld [vmem:[%s7010_s1 + $0x180] sm:$0xff]  }
  0x59   : > { %5158 = vmatprep.mubr.bf16.mxu1 %v1533_v10  ;;  %v4574_v10 = vld [vmem:[%s6108_s22 + $0x139] sm:$0xff] }
  0x5e   : > { %5303 = vmatmul.mubr.bf16.gmra.mrb[24].mxu0 %v1535_v16 }
  0x5f   : > { %5306 = vmatprep.mubr.bf16.mxu0 %v1536_v17 }
  0x60   : > { %5159 = vmatmul.mubr.bf16.gmra.mrb[24].mxu1 %v1534_v11  ;;  %v4575_v11 = vld [vmem:[%s6108_s22 + $0x141] sm:$0xff] }
  0x61   : > { %5162 = vmatprep.mubr.bf16.mxu1 %v1535_v16  ;;  %v6332_v13 = vpack.c.bf16 %v4575_v11, %v4574_v10  ;;  %v4578_v16 = vld [vmem:[%s6108_s22 + $0x169] sm:$0xff]  ;;  %v4624_v11 = vld [vmem:[%s6108_s22 + $0xf2] sm:$0xff] }
  0x62   : > { %v6471_v10 = vld [vmem:[%s7010_s1 + $0x230] sm:$0xff]   ;;  %v6482_v20 = vpack.c.bf16 %v4625_v14, %v4624_v11  ;;  %v4671_v11 = vld [vmem:[%s6108_s22 + $0x98] sm:$0xff] }
  0x63   : > { %v5979_v14 = vld [vmem:[%s7010_s1 + $0x1d0] sm:$0xff]  }
  0x66   : > { %5307 = vmatmul.mubr.bf16.gmra.mrb[28].mxu0 %v1537_v22  ;;  %v4606_v22 = vld [vmem:[%s6108_s22 + $0x1a] sm:$0xff] }
  0x67   : > { %5326 = vmatprep.mubr.bf16.mxu0 %v1892_v23 }
  0x68   : > { %5163 = vmatmul.mubr.bf16.gmra.mrb[28].mxu1 %v1536_v17  ;;  %v4579_v17 = vld [vmem:[%s6108_s22 + $0x171] sm:$0xff] }
  0x69   : > { %5182 = vmatprep.mubr.bf16.mxu1 %v781_v30  ;;  %v6344_v19 = vpack.c.bf16 %v4579_v17, %v4578_v16  ;;  %v4609_v30 = vld [vmem:[%s6108_s22 + $0x3a] sm:$0xff]  ;;  %v4627_v16 = vld [vmem:[%s6108_s22 + $0x112] sm:$0xff] }
  0x6a   : > { %v6371_v35 = vpack.c.bf16 %v4609_v30, %v4608_v29  ;;  %v5977_v17 = vld [vmem:[%s7010_s1 + $0x1c0] sm:$0xff]   ;;  %v6505_v30 = vpack.c.bf16 %v4631_v27, %v4630_v26  ;;  %v4675_v26 = vld [vmem:[%s6108_s22 + $0xc8] sm:$0xff] }
  0x6b   : > { %v5981_v27 = vld [vmem:[%s7010_s1 + $0x1e0] sm:$0xff]  }
  0x6e   : > { %5327 = vmatmul.mubr.bf16.vlgmr.msra.gmra.mrb[0].mxu0 %v1893_v31 }
  0x6f   : > { %5359 = vmatpush3.bf16.msra.mxu0 %v5948_v1  ;;  %5330 = vmatprep.mubr.bf16.mxu0 %v6239_v33  ;;  %v5969_v1 = vld [vmem:[%s7010_s1 + $0xb0] sm:$0xff]  }
  0x70   : > { %5360 = vmatprep.subr.bf16.mxu0 %v5951_v32  ;;  %5183 = vmatmul.mubr.bf16.vlgmr.msra.gmra.mrb[0].mxu1 %v1892_v23  ;;  %v4607_v23 = vld [vmem:[%s6108_s22 + $0x22] sm:$0xff] }
  0x71   : > { %5186 = vmatprep.mubr.bf16.mxu1 %v1893_v31  ;;  %5215 = vmatpush3.bf16.msra.mxu1 %v5960_v7  ;;  %v6320_v7 = vpack.c.bf16 %v4571_v3, %v4570_v2  ;;  %v2262_v25 = vpack.c.bf16 %v4607_v23, %v4606_v22  ;;  %v4610_v31 = vld [vmem:[%s6108_s22 + $0x4a] sm:$0xff]  ;;  %v4623_v2 = vld [vmem:[%s6108_s22 + $0xe2] sm:$0xff]  ;;  %v6490_v22 = vpack.c.bf16 %v4627_v16, %v4626_v15 }
  0x72   : > { %5216 = vmatprep.subr.bf16.mxu1 %v5962_v39  ;;  %v5975_v3 = vld [vmem:[%s7010_s1 + $0x1b0] sm:$0xff]   ;;  %v4628_v23 = vld [vmem:[%s6108_s22 + $0x122] sm:$0xff] }
  0x73   : > { %5361 = vmatpush3.bf16.msra.mxu0 %v5951_v32  ;;  %v4611_v32 = vld [vmem:[%s6108_s22 + $0x52] sm:$0xff] }
  0x74   : > { %5362 = vmatprep.subr.bf16.mxu0 %v5954_v38  ;;  %v6373_v36 = vpack.c.bf16 %v4611_v32, %v4610_v31  ;;  %v4632_v31 = vld [vmem:[%s6108_s22 + $0x152] sm:$0xff]  ;;  %v4633_v32 = vld [vmem:[%s6108_s22 + $0x15a] sm:$0xff] }
  0x75   : > { %5217 = vmatpush3.bf16.msra.mxu1 %v5962_v39  ;;  %v4613_v39 = vld [vmem:[%s6108_s22 + $0x6a] sm:$0xff] }
  0x76   : > { %5331 = vmatmul.mubr.bf16.gmra.mrb[4].mxu0 %v1895_v40  ;;  %5218 = vmatprep.subr.bf16.mxu1 %v5963_v46 }
  0x77   : > { %5334 = vmatprep.mubr.bf16.mxu0 %v6255_v42  ;;  %5363 = vmatpush3.bf16.msra.mxu0 %v5954_v38  ;;  %v4612_v38 = vld [vmem:[%s6108_s22 + $0x62] sm:$0xff] }
  0x78   : > { %5364 = vmatprep.subr.bf16.mxu0 %v5956_v41  ;;  %5187 = vmatmul.mubr.bf16.gmra.mrb[4].mxu1 %v6239_v33  ;;  %v6388_v44 = vpack.c.bf16 %v4613_v39, %v4612_v38  ;;  %v6515_v38 = vpack.c.bf16 %v4633_v32, %v4632_v31  ;;  %v4676_v32 = vld [vmem:[%s6108_s22 + $0xd8] sm:$0xff] }
  0x79   : > { %5190 = vmatprep.mubr.bf16.mxu1 %v1895_v40  ;;  %5219 = vmatpush3.bf16.msra.mxu1 %v5963_v46  ;;  %v4614_v40 = vld [vmem:[%s6108_s22 + $0x7a] sm:$0xff] }
  0x7a   : > { %5220 = vmatprep.subr.bf16.mxu1 %v5965_v49 }
  0x7b   : > { %5365 = vmatpush3.bf16.msra.mxu0 %v5956_v41  ;;  %v4615_v41 = vld [vmem:[%s6108_s22 + $0x82] sm:$0xff] }
  0x7c   : > { %5366 = vmatprep.subr.bf16.mxu0 %v5957_v48  ;;  %v6395_v46 = vpack.c.bf16 %v4615_v41, %v4614_v40  ;;  %v4636_v40 = vld [vmem:[%s6108_s22 + $0x182] sm:$0xff]  ;;  %v4637_v41 = vld [vmem:[%s6108_s22 + $0x18a] sm:$0xff] }
  0x7d   : > { %5221 = vmatpush3.bf16.msra.mxu1 %v5965_v49  ;;  %v4616_v49 = vld [vmem:[%s6108_s22 + $0x92] sm:$0xff] }
  0x7e   : > { %5335 = vmatmul.mubr.bf16.gmra.mrb[8].mxu0 %v6271_v50  ;;  %5222 = vmatprep.subr.bf16.mxu1 %v5966_v56 }
  0x7f   : > { %5338 = vmatprep.mubr.bf16.mxu0 %v6276_v52  ;;  %5367 = vmatpush3.bf16.msra.mxu0 %v5957_v48  ;;  %v6407_v48 = vld [vmem:[%s7010_s1 + $0x210] sm:$0xff]  }
  0x80   : > { %5368 = vmatprep.subr.bf16.mxu0 %v5958_v51  ;;  %5191 = vmatmul.mubr.bf16.gmra.mrb[8].mxu1 %v6255_v42 }
  0x81   : > { %5194 = vmatprep.mubr.bf16.mxu1 %v6271_v50  ;;  %5223 = vmatpush3.bf16.msra.mxu1 %v5966_v56 }
  0x82   : > { %5224 = vmatprep.subr.bf16.mxu1 %v5968_v59 }
  0x83   : > { %5369 = vmatpush3.bf16.msra.mxu0 %v5958_v51  ;;  %v4617_v51 = vld [vmem:[%s6108_s22 + $0x9a] sm:$0xff] }
  0x84   : > { %5370 = vmatprep.subr.bf16.mxu0 %v5959_v58  ;;  %v6418_v56 = vpack.c.bf16 %v4617_v51, %v4616_v49  ;;  %v6527_v49 = vpack.c.bf16 %v4637_v41, %v4636_v40  ;;  %v4679_v40 = vld [vmem:[%s6108_s22 + $0xf8] sm:$0xff]  ;;  %v5983_v41 = vld [vmem:[%s7010_s1 + $0x1f0] sm:$0xff]  }
  0x85   : > { %5225 = vmatpush3.bf16.msra.mxu1 %v5968_v59  ;;  %v5974_v59 = vld [vmem:[%s7010_s1 + $0x1a8] sm:$0xff]  }
  0x86   : > { %5339 = vmatmul.mubr.bf16.gmra.mrb[12].mxu0 %v6294_v60  ;;  %5226 = vmatprep.subr.bf16.mxu1 %v5969_v1 }
  0x87   : > { %5342 = vmatprep.mubr.bf16.mxu0 %v6299_v62  ;;  %5371 = vmatpush3.bf16.msra.mxu0 %v5959_v58  ;;  %v6426_v58 = vpack.c.bf16 %v4619_v54, %v4618_v53  ;;  %v4664_v53 = vld [vmem:[%s6108_s22 + $0x48] sm:$0xff]  ;;  %v4665_v54 = vld [vmem:[%s6108_s22 + $0x50] sm:$0xff] }
  0x88   : > { %5372 = vmatprep.subr.bf16.mxu0 %v5961_v61  ;;  %5195 = vmatmul.mubr.bf16.gmra.mrb[12].mxu1 %v6276_v52 }
  0x89   : > { %5198 = vmatprep.mubr.bf16.mxu1 %v6294_v60  ;;  %5227 = vmatpush3.bf16.msra.mxu1 %v5969_v1  ;;  %v4622_v1 = vld [vmem:[%s6108_s22 + $0xda] sm:$0xff] }
  0x8a   : > { %5228 = vmatprep.subr.bf16.mxu1 %v5971_v6  ;;  %v6458_v8 = vpack.c.bf16 %v4623_v2, %v4622_v1  ;;  %v5978_v1 = vld [vmem:[%s7010_s1 + $0x1c8] sm:$0xff]   ;;  %v4668_v2 = vld [vmem:[%s6108_s22 + $0x78] sm:$0xff] }
  0x8b   : > { %5373 = vmatpush3.bf16.msra.mxu0 %v5961_v61  ;;  %v6439_v61 = vld [vmem:[%s7010_s1 + $0x220] sm:$0xff]  }
  0x8c   : > { %5406 = vmatprep.subr.bf16.mxu0 %v5964_v4 }
  0x8d   : > { %5229 = vmatpush3.bf16.msra.mxu1 %v5971_v6  ;;  %v6456_v6 = vld [vmem:[%s7010_s1 + $0x228] sm:$0xff]  }
  0x8e   : > { %5343 = vmatmul.mubr.bf16.gmra.mrb[16].mxu0 %v6315_v5  ;;  %5638 = vmatprep.subr.bf16.mxu1 %v6364_v28 }
  0x8f   : > { %5346 = vmatprep.mubr.bf16.mxu0 %v6320_v7 }
  0x90   : > { %5199 = vmatmul.mubr.bf16.gmra.mrb[16].mxu1 %v6299_v62 }
  0x91   : > { %5202 = vmatprep.mubr.bf16.mxu1 %v6315_v5 }
  0x96   : > { %5347 = vmatmul.mubr.bf16.gmra.mrb[20].mxu0 %v6330_v12 }
  0x97   : > { %5350 = vmatprep.mubr.bf16.mxu0 %v6332_v13 }
  0x98   : > { %5203 = vmatmul.mubr.bf16.gmra.mrb[20].mxu1 %v6320_v7 }
  0x99   : > { %5206 = vmatprep.mubr.bf16.mxu1 %v6330_v12 }
  0x9e   : > { %5351 = vmatmul.mubr.bf16.gmra.mrb[24].mxu0 %v6342_v18 }
  0x9f   : > { %5354 = vmatprep.mubr.bf16.mxu0 %v6344_v19 }
  0xa0   : > { %5207 = vmatmul.mubr.bf16.gmra.mrb[24].mxu1 %v6332_v13 }
  0xa1   : > { %5210 = vmatprep.mubr.bf16.mxu1 %v6342_v18 }
  0xa6   : > { %5355 = vmatmul.mubr.bf16.gmra.mrb[28].mxu0 %v6354_v24 }
  0xa7   : > { %5374 = vmatprep.mubr.bf16.mxu0 %v2262_v25 }
  0xa8   : > { %5211 = vmatmul.mubr.bf16.gmra.mrb[28].mxu1 %v6344_v19 }
  0xa9   : > { %5230 = vmatprep.mubr.bf16.mxu1 %v1151_v34  ;;  %v4634_v34 = vld [vmem:[%s6108_s22 + $0x16a] sm:$0xff] }
  0xae   : > { %5375 = vmatmul.mubr.bf16.vlgmr.msra.gmra.mrb[0].mxu0 %v6371_v35 }
  0xaf   : > { %5407 = vmatpush3.bf16.msra.mxu0 %v5964_v4  ;;  %5378 = vmatprep.mubr.bf16.mxu0 %v6373_v36  ;;  %v6450_v4 = vpack.c.bf16 %v4621_v0, %v4620_v63  ;;  %v2634_v63 = vpack.c.bf16 %v4665_v54, %v4664_v53  ;;  %v4682_v53 = vld [vmem:[%s6108_s22 + $0x120] sm:$0xff]  ;;  %v4683_v54 = vld [vmem:[%s6108_s22 + $0x128] sm:$0xff] }
  0xb0   : > { %5408 = vmatprep.subr.bf16.mxu0 %v5967_v37  ;;  %5231 = vmatmul.mubr.bf16.vlgmr.msra.gmra.mrb[0].mxu1 %v2262_v25  ;;  %v4629_v25 = vld [vmem:[%s6108_s22 + $0x12a] sm:$0xff] }
  0xb1   : > { %5234 = vmatprep.mubr.bf16.mxu1 %v6371_v35  ;;  %5646 = vmatpush3.bf16.msra.mxu1 %v6364_v28  ;;  %v6503_v29 = vpack.c.bf16 %v4629_v25, %v4628_v23  ;;  %v4673_v23 = vld [vmem:[%s6108_s22 + $0xb0] sm:$0xff]  ;;  %v4674_v25 = vld [vmem:[%s6108_s22 + $0xc0] sm:$0xff] }
  0xb2   : > { %5639 = vmatprep.subr.bf16.mxu1 %v6393_v45 }
  0xb3   : > { %5409 = vmatpush3.bf16.msra.mxu0 %v5967_v37  ;;  %v4635_v37 = vld [vmem:[%s6108_s22 + $0x172] sm:$0xff] }
  0xb4   : > { %5410 = vmatprep.subr.bf16.mxu0 %v5970_v43  ;;  %v6517_v39 = vpack.c.bf16 %v4635_v37, %v4634_v34  ;;  %v4677_v34 = vld [vmem:[%s6108_s22 + $0xe0] sm:$0xff]  ;;  %v4678_v37 = vld [vmem:[%s6108_s22 + $0xf0] sm:$0xff] }
  0xb5   : > { %5647 = vmatpush3.bf16.msra.mxu1 %v6393_v45 }
  0xb6   : > { %5379 = vmatmul.mubr.bf16.gmra.mrb[4].mxu0 %v6388_v44  ;;  %5640 = vmatprep.subr.bf16.mxu1 %v6407_v48 }
  0xb7   : > { %5382 = vmatprep.mubr.bf16.mxu0 %v6395_v46  ;;  %5411 = vmatpush3.bf16.msra.mxu0 %v5970_v43  ;;  %v4662_v43 = vld [vmem:[%s6108_s22 + $0x30] sm:$0xff] }
  0xb8   : > { %5412 = vmatprep.subr.bf16.mxu0 %v5972_v47  ;;  %5235 = vmatmul.mubr.bf16.gmra.mrb[4].mxu1 %v6373_v36 }
  0xb9   : > { %5238 = vmatprep.mubr.bf16.mxu1 %v6388_v44  ;;  %5648 = vmatpush3.bf16.msra.mxu1 %v6407_v48 }
  0xba   : > { %5641 = vmatprep.subr.bf16.mxu1 %v6424_v57 }
  0xbb   : > { %5413 = vmatpush3.bf16.msra.mxu0 %v5972_v47  ;;  %v4663_v47 = vld [vmem:[%s6108_s22 + $0x38] sm:$0xff] }
  0xbc   : > { %5414 = vmatprep.subr.bf16.mxu0 %v5973_v55  ;;  %v2633_v51 = vpack.c.bf16 %v4663_v47, %v4662_v43  ;;  %v2640_v43 = vpack.c.bf16 %v4677_v34, %v4676_v32  ;;  %v4680_v47 = vld [vmem:[%s6108_s22 + $0x108] sm:$0xff] }
  0xbd   : > { %5649 = vmatpush3.bf16.msra.mxu1 %v6424_v57 }
  0xbe   : > { %5383 = vmatmul.mubr.bf16.gmra.mrb[8].mxu0 %v6418_v56  ;;  %5642 = vmatprep.subr.bf16.mxu1 %v6439_v61 }
  0xbf   : > { %5386 = vmatprep.mubr.bf16.mxu0 %v6426_v58  ;;  %5415 = vmatpush3.bf16.msra.mxu0 %v5973_v55  ;;  %v4666_v55 = vld [vmem:[%s6108_s22 + $0x60] sm:$0xff] }
  0xc0   : > { %5416 = vmatprep.subr.bf16.mxu0 %v5974_v59  ;;  %5239 = vmatmul.mubr.bf16.gmra.mrb[8].mxu1 %v6395_v46 }
  0xc1   : > { %5242 = vmatprep.mubr.bf16.mxu1 %v6418_v56  ;;  %5650 = vmatpush3.bf16.msra.mxu1 %v6439_v61 }
  0xc2   : > { %5643 = vmatprep.subr.bf16.mxu1 %v6456_v6 }
  0xc3   : > { %5417 = vmatpush3.bf16.msra.mxu0 %v5974_v59  ;;  %v4667_v59 = vld [vmem:[%s6108_s22 + $0x68] sm:$0xff] }
  0xc4   : > { %5418 = vmatprep.subr.bf16.mxu0 %v5975_v3  ;;  %v2635_v0 = vpack.c.bf16 %v4667_v59, %v4666_v55  ;;  %v2643_v59 = vpack.c.bf16 %v4683_v54, %v4682_v53 }
  0xc5   : > { %5651 = vmatpush3.bf16.msra.mxu1 %v6456_v6 }
  0xc6   : > { %5387 = vmatmul.mubr.bf16.gmra.mrb[12].mxu0 %v6450_v4  ;;  %5644 = vmatprep.subr.bf16.mxu1 %v6471_v10 }
  0xc7   : > { %5390 = vmatprep.mubr.bf16.mxu0 %v6458_v8  ;;  %5419 = vmatpush3.bf16.msra.mxu0 %v5975_v3  ;;  %v4669_v3 = vld [vmem:[%s6108_s22 + $0x80] sm:$0xff] }
  0xc8   : > { %5420 = vmatprep.subr.bf16.mxu0 %v5976_v9  ;;  %5243 = vmatmul.mubr.bf16.gmra.mrb[12].mxu1 %v6426_v58  ;;  %v2636_v15 = vpack.c.bf16 %v4669_v3, %v4668_v2  ;;  %v4687_v2 = vld [vmem:[%s6108_s22 + $0x158] sm:$0xff] }
  0xc9   : > { %5246 = vmatprep.mubr.bf16.mxu1 %v6450_v4  ;;  %5652 = vmatpush3.bf16.msra.mxu1 %v6471_v10 }
  0xca   : > { %5645 = vmatprep.subr.bf16.mxu1 %v6488_v21 }
  0xcb   : > { %5421 = vmatpush3.bf16.msra.mxu0 %v5976_v9  ;;  %v4670_v9 = vld [vmem:[%s6108_s22 + $0x90] sm:$0xff] }
  0xcc   : > { %5454 = vmatprep.subr.bf16.mxu0 %v5977_v17  ;;  %v2637_v16 = vpack.c.bf16 %v4671_v11, %v4670_v9  ;;  %v4689_v11 = vld [vmem:[%s6108_s22 + $0x170] sm:$0xff] }
  0xcd   : > { %5653 = vmatpush3.bf16.msra.mxu1 %v6488_v21 }
  0xce   : > { %5391 = vmatmul.mubr.bf16.gmra.mrb[16].mxu0 %v6482_v20 }
  0xcf   : > { %5394 = vmatprep.mubr.bf16.mxu0 %v6490_v22 }
  0xd0   : > { %5247 = vmatmul.mubr.bf16.gmra.mrb[16].mxu1 %v6458_v8 }
  0xd1   : > { %5250 = vmatprep.mubr.bf16.mxu1 %v6482_v20 }
  0xd6   : > { %5395 = vmatmul.mubr.bf16.gmra.mrb[20].mxu0 %v6503_v29 }
  0xd7   : > { %5398 = vmatprep.mubr.bf16.mxu0 %v6505_v30 }
  0xd8   : > { %5251 = vmatmul.mubr.bf16.gmra.mrb[20].mxu1 %v6490_v22 }
  0xd9   : > { %5254 = vmatprep.mubr.bf16.mxu1 %v6503_v29 }
  0xde   : > { %5399 = vmatmul.mubr.bf16.gmra.mrb[24].mxu0 %v6515_v38 }
  0xdf   : > { %5402 = vmatprep.mubr.bf16.mxu0 %v6517_v39 }
  0xe0   : > { %5255 = vmatmul.mubr.bf16.gmra.mrb[24].mxu1 %v6505_v30 }
  0xe1   : > { %5258 = vmatprep.mubr.bf16.mxu1 %v6515_v38 }
  0xe6   : > { %5403 = vmatmul.mubr.bf16.gmra.mrb[28].mxu0 %v6527_v49 }
  0xe7   : > { %5422 = vmatprep.mubr.bf16.mxu0 %v2633_v51  ;;  %v4681_v51 = vld [vmem:[%s6108_s22 + $0x110] sm:$0xff] }
  0xe8   : > { %5259 = vmatmul.mubr.bf16.gmra.mrb[28].mxu1 %v6517_v39  ;;  %v2642_v55 = vpack.c.bf16 %v4681_v51, %v4680_v47  ;;  %v5996_v47 = vld [vmem:[%s7013_s4 + $0x18] sm:$0xff]   ;;  %v5997_v51 = vld [vmem:[%s7013_s4 + $0x20] sm:$0xff]  }
  0xe9   : > { %5530 = vmatprep.mubr.bf16.mxu1 %v6450_v4  ;;  %v5980_v4 = vld [vmem:[%s7010_s1 + $0x1d8] sm:$0xff]  }
  0xee   : > { %5423 = vmatmul.mubr.bf16.vlgmr.msra.gmra.mrb[0].mxu0 %v2634_v63  ;;  %v4684_v63 = vld [vmem:[%s6108_s22 + $0x138] sm:$0xff] }
  0xef   : > { %5455 = vmatpush3.bf16.msra.mxu0 %v5977_v17  ;;  %5426 = vmatprep.mubr.bf16.mxu0 %v2635_v0  ;;  %v4672_v17 = vld [vmem:[%s6108_s22 + $0xa8] sm:$0xff]  ;;  %v4685_v0 = vld [vmem:[%s6108_s22 + $0x140] sm:$0xff] }
  0xf0   : > { %5456 = vmatprep.subr.bf16.mxu0 %v5978_v1  ;;  %5531 = vmatmul.mubr.bf16.vlgmr.msra.gmra.mrb[32].mxu1 %v6458_v8  ;;  %v2638_v31 = vpack.c.bf16 %v4673_v23, %v4672_v17  ;;  %v2639_v8 = vpack.c.bf16 %v4675_v26, %v4674_v25  ;;  %v2644_v9 = vpack.c.bf16 %v4685_v0, %v4684_v63  ;;  %v4692_v17 = vld [vmem:[%s6108_s22 + $0x198] sm:$0xff]  ;;  %v4693_v23 = vld [vmem:[%s6108_s22 + $0x1a0] sm:$0xff] }
  0xf1   : > { %5534 = vmatprep.mubr.bf16.mxu1 %v6482_v20  ;;  %v5982_v20 = vld [vmem:[%s7010_s1 + $0x1e8] sm:$0xff]   ;;  %v4718_v25 = vld [vmem:[%s6108_s22 + $0x31] sm:$0xff]  ;;  %v4719_v26 = vld [vmem:[%s6108_s22 + $0x39] sm:$0xff] }
  0xf3   : > { %5457 = vmatpush3.bf16.msra.mxu0 %v5978_v1  ;;  %v4686_v1 = vld [vmem:[%s6108_s22 + $0x150] sm:$0xff] }
  0xf4   : > { %5458 = vmatprep.subr.bf16.mxu0 %v5979_v14 }
  0xf6   : > { %5427 = vmatmul.mubr.bf16.gmra.mrb[4].mxu0 %v2636_v15  ;;  %v4691_v15 = vld [vmem:[%s6108_s22 + $0x188] sm:$0xff] }
  0xf7   : > { %5430 = vmatprep.mubr.bf16.mxu0 %v2637_v16  ;;  %5459 = vmatpush3.bf16.msra.mxu0 %v5979_v14  ;;  %v4690_v14 = vld [vmem:[%s6108_s22 + $0x180] sm:$0xff] }
  0xf8   : > { %5460 = vmatprep.subr.bf16.mxu0 %v5980_v4  ;;  %5535 = vmatmul.mubr.bf16.gmra.mrb[36].mxu1 %v6490_v22  ;;  %v2641_v22 = vpack.c.bf16 %v4679_v40, %v4678_v37  ;;  %v5994_v37 = vld [vmem:[%s7013_s4 + $0x8] sm:$0xff]   ;;  %v5995_v40 = vld [vmem:[%s7013_s4 + $0x10] sm:$0xff]  }
  0xf9   : > { %5538 = vmatprep.mubr.bf16.mxu1 %v6503_v29  ;;  %v5984_v29 = vld [vmem:[%s7010_s1 + $0x1f8] sm:$0xff]  }
  0xfb   : > { %5461 = vmatpush3.bf16.msra.mxu0 %v5980_v4  ;;  %v2647_v4 = vpack.c.bf16 %v4691_v15, %v4690_v14 }
  0xfc   : > { %5462 = vmatprep.subr.bf16.mxu0 %v5981_v27 }
  0xfe   : > { %5431 = vmatmul.mubr.bf16.gmra.mrb[8].mxu0 %v2638_v31  ;;  %v3003_v31 = vpack.c.bf16 %v4719_v26, %v4718_v25 }
  0xff   : > { %5434 = vmatprep.mubr.bf16.mxu0 %v2639_v8  ;;  %5463 = vmatpush3.bf16.msra.mxu0 %v5981_v27  ;;  %v2648_v27 = vpack.c.bf16 %v4693_v23, %v4692_v17  ;;  %v4722_v8 = vld [vmem:[%s6108_s22 + $0x61] sm:$0xff] }
 0x100   : > { %5464 = vmatprep.subr.bf16.mxu0 %v5982_v20  ;;  %5539 = vmatmul.mubr.bf16.gmra.mrb[40].mxu1 %v6505_v30  ;;  %v4804_v30 = vld [vmem:[%s6108_s22 + $0x19a] sm:$0xff] }
 0x101   : > { %5542 = vmatprep.mubr.bf16.mxu1 %v6515_v38  ;;  %v4805_v38 = vld [vmem:[%s6108_s22 + $0x1a2] sm:$0xff] }
 0x102   : > { %v3388_v3 = vpack.c.bf16 %v4805_v38, %v4804_v30  ;;  %v5998_v30 = vld [vmem:[%s7013_s4 + $0x28] sm:$0xff]   ;;  %v5999_v38 = vld [vmem:[%s7013_s4 + $0x30] sm:$0xff]  }
 0x103   : > { %5465 = vmatpush3.bf16.msra.mxu0 %v5982_v20  ;;  %v4723_v20 = vld [vmem:[%s6108_s22 + $0x69] sm:$0xff] }
 0x104   : > { %5466 = vmatprep.subr.bf16.mxu0 %v5983_v41  ;;  %v3005_v32 = vpack.c.bf16 %v4723_v20, %v4722_v8 }
 0x106   : > { %5435 = vmatmul.mubr.bf16.gmra.mrb[12].mxu0 %v2640_v43 }
 0x107   : > { %5438 = vmatprep.mubr.bf16.mxu0 %v2641_v22  ;;  %5467 = vmatpush3.bf16.msra.mxu0 %v5983_v41 }
 0x108   : > { %5468 = vmatprep.subr.bf16.mxu0 %v5984_v29  ;;  %5543 = vmatmul.mubr.bf16.gmra.mrb[44].mxu1 %v6517_v39  ;;  %v2645_v39 = vpack.c.bf16 %v4687_v2, %v4686_v1 }
 0x109   : > { %5546 = vmatprep.mubr.bf16.mxu1 %v6527_v49  ;;  %v4688_v49 = vld [vmem:[%s6108_s22 + $0x168] sm:$0xff] }
 0x10a   : > { %v2646_v16 = vpack.c.bf16 %v4689_v11, %v4688_v49 }
 0x10b   : > { %5469 = vmatpush3.bf16.msra.mxu0 %v5984_v29 }
 0x10c   : > { %5502 = vmatprep.subr.bf16.mxu0 %v6364_v28 }
 0x10e   : > { %5439 = vmatmul.mubr.bf16.gmra.mrb[16].mxu0 %v2642_v55 }
 0x10f   : > { %5442 = vmatprep.mubr.bf16.mxu0 %v2643_v59 }
 0x110   : > { %5547 = vmatmul.mubr.bf16.gmra.mrb[48].mxu1 %v3388_v3  ;;  %v6000_v3 = vld [vmem:[%s7013_s4 + $0x38] sm:$0xff]  }
 0x116   : > { %5443 = vmatmul.mubr.bf16.gmra.mrb[20].mxu0 %v2644_v9 }
 0x117   : > { %5446 = vmatprep.mubr.bf16.mxu0 %v2645_v39 }
 0x11e   : > { %5447 = vmatmul.mubr.bf16.gmra.mrb[24].mxu0 %v2646_v16 }
 0x11f   : > { %5450 = vmatprep.mubr.bf16.mxu0 %v2647_v4 }
 0x126   : > { %5451 = vmatmul.mubr.bf16.gmra.mrb[28].mxu0 %v2648_v27 }
 0x127   : > { %5470 = vmatprep.mubr.bf16.mxu0 %v3003_v31 }
 0x12e   : > { %5471 = vmatmul.mubr.bf16.vlgmr.msra.gmra.mrb[0].mxu0 %v6239_v33  ;;  %v4748_v33 = vld [vmem:[%s6108_s22 + $0x199] sm:$0xff] }
 0x12f   : > { %5503 = vmatpush3.bf16.msra.mxu0 %v6364_v28  ;;  %5474 = vmatprep.mubr.bf16.mxu0 %v3005_v32 }
 0x130   : > { %5504 = vmatprep.subr.bf16.mxu0 %v6393_v45 }
 0x133   : > { %5505 = vmatpush3.bf16.msra.mxu0 %v6393_v45 }
 0x134   : > { %5506 = vmatprep.subr.bf16.mxu0 %v6407_v48 }
 0x136   : > { %5475 = vmatmul.mubr.bf16.gmra.mrb[4].mxu0 %v6255_v42  ;;  %v4749_v42 = vld [vmem:[%s6108_s22 + $0x1a1] sm:$0xff] }
 0x137   : > { %5478 = vmatprep.mubr.bf16.mxu0 %v6271_v50  ;;  %5507 = vmatpush3.bf16.msra.mxu0 %v6407_v48  ;;  %v3018_v50 = vpack.c.bf16 %v4749_v42, %v4748_v33 }
 0x138   : > { %5508 = vmatprep.subr.bf16.mxu0 %v6424_v57 }
 0x13b   : > { %5509 = vmatpush3.bf16.msra.mxu0 %v6424_v57 }
 0x13c   : > { %5510 = vmatprep.subr.bf16.mxu0 %v6439_v61 }
 0x13e   : > { %5479 = vmatmul.mubr.bf16.gmra.mrb[8].mxu0 %v6276_v52 }
 0x13f   : > { %5482 = vmatprep.mubr.bf16.mxu0 %v6294_v60  ;;  %5511 = vmatpush3.bf16.msra.mxu0 %v6439_v61  ;;  %v5993_v61 = vld [vmem:[%s7013_s4] sm:$0xff]  }
 0x140   : > { %5512 = vmatprep.subr.bf16.mxu0 %v6456_v6  ;;  %5550 = vmatprep.subr.bf16.mxu1 %v5993_v61 }
 0x141   : > { %5551 = vmatpush3.bf16.msra.mxu1 %v5993_v61 }
 0x142   : > { %5552 = vmatprep.subr.bf16.mxu1 %v5994_v37 }
 0x143   : > { %5513 = vmatpush3.bf16.msra.mxu0 %v6456_v6 }
 0x144   : > { %5514 = vmatprep.subr.bf16.mxu0 %v6471_v10 }
 0x145   : > { %5553 = vmatpush3.bf16.msra.mxu1 %v5994_v37  ;;  %v6753_v37 = vld [vmem:[%s7011_s2] ss:$0 sm:$0xff] }
 0x146   : > { %5483 = vmatmul.mubr.bf16.gmra.mrb[12].mxu0 %v6299_v62  ;;  %5554 = vmatprep.subr.bf16.mxu1 %v5995_v40 }
 0x147   : > { %5486 = vmatprep.mubr.bf16.mxu0 %v6315_v5  ;;  %5515 = vmatpush3.bf16.msra.mxu0 %v6471_v10 }
 0x148   : > { %5516 = vmatprep.subr.bf16.mxu0 %v6488_v21 }
 0x149   : > { %5555 = vmatpush3.bf16.msra.mxu1 %v5995_v40 }
 0x14a   : > { %5556 = vmatprep.subr.bf16.mxu1 %v5996_v47 }
 0x14b   : > { %5517 = vmatpush3.bf16.msra.mxu0 %v6488_v21 }
 0x14d   : > { %5557 = vmatpush3.bf16.msra.mxu1 %v5996_v47 }
 0x14e   : > { %5487 = vmatmul.mubr.bf16.gmra.mrb[16].mxu0 %v6320_v7  ;;  %5558 = vmatprep.subr.bf16.mxu1 %v5997_v51 }
 0x14f   : > { %5490 = vmatprep.mubr.bf16.mxu0 %v6330_v12 }
 0x151   : > { %5559 = vmatpush3.bf16.msra.mxu1 %v5997_v51 }
 0x152   : > { %5560 = vmatprep.subr.bf16.mxu1 %v5998_v30 }
 0x155   : > { %5561 = vmatpush3.bf16.msra.mxu1 %v5998_v30  ;;  %v6759_v30 = vld [vmem:[%s7012_s3] ss:$0 sm:$0xff] }
 0x156   : > { %5491 = vmatmul.mubr.bf16.gmra.mrb[20].mxu0 %v6332_v13  ;;  %5562 = vmatprep.subr.bf16.mxu1 %v5999_v38 }
 0x157   : > { %5494 = vmatprep.mubr.bf16.mxu0 %v6342_v18 }
 0x159   : > { %5563 = vmatpush3.bf16.msra.mxu1 %v5999_v38 }
 0x15a   : > { %5564 = vmatprep.subr.bf16.mxu1 %v6000_v3 }
 0x15d   : > { %5565 = vmatpush3.bf16.msra.mxu1 %v6000_v3 }
 0x15e   : > { %5495 = vmatmul.mubr.bf16.gmra.mrb[24].mxu0 %v6344_v19 }
 0x15f   : > { %5498 = vmatprep.mubr.bf16.mxu0 %v6354_v24 }
 0x166   : > { %5499 = vmatmul.mubr.bf16.gmra.mrb[28].mxu0 %v3018_v50 }
 0x167   : > { %5518 = vmatprep.mubr.bf16.mxu0 %v6371_v35 }
 0x16e   : > { %5519 = vmatmul.mubr.bf16.vlgmr.msra.gmra.mrb[0].mxu0 %v6373_v36 }
 0x16f   : > { %5522 = vmatprep.mubr.bf16.mxu0 %v6388_v44 }
 0x176   : > { %5523 = vmatmul.mubr.bf16.gmra.mrb[4].mxu0 %v6395_v46 }
 0x177   : > { %5526 = vmatprep.mubr.bf16.mxu0 %v6418_v56 }
 0x17e   : > { %5527 = vmatmul.mubr.bf16.gmra.mrb[8].mxu0 %v6426_v58 }
 0x183   : > { %v6636_v52 = vpop.f32.mrb[0].mxu1 }
 0x184   : > { %v6638_v60 = vpop.f32.mrb[1].mxu1 }
 0x185   : > { %v6640_v62 = vpop.f32.mrb[2].mxu1 }
 0x186   : > { %v6642_v5 = vpop.f32.mrb[3].mxu1 }
 0x18b   : > { %v6644_v7 = vpop.f32.mrb[4].mxu1 }
 0x18c   : > { %v6646_v12 = vpop.f32.mrb[5].mxu1 }
 0x18d   : > { %v6648_v13 = vpop.f32.mrb[6].mxu1 }
 0x18e   : > { %v6650_v18 = vpop.f32.mrb[7].mxu1 }
 0x193   : > { %v6652_v19 = vpop.f32.mrb[8].mxu1 }
 0x194   : > { %v6654_v24 = vpop.f32.mrb[9].mxu1 }
 0x195   : > { %v6656_v28 = vpop.f32.mrb[10].mxu1 }
 0x196   : > { %7018 = vst [vmem:[#allocation3_spill] sm:$0xff] %v6656_v28  ;;  %v6658_v35 = vpop.f32.mrb[11].mxu1 }
 0x197   : > { %7019 = vst [vmem:[#allocation4_spill] sm:$0xff] %v6658_v35 }
 0x19b   : > { %v6660_v36 = vpop.f32.mrb[12].mxu1 }
 0x19c   : > { %v6662_v44 = vpop.f32.mrb[13].mxu1 }
 0x19d   : > { %v6664_v45 = vpop.f32.mrb[14].mxu1 }
 0x19e   : > { %v6666_v46 = vpop.f32.mrb[15].mxu1 }
 0x1a3   : > { %v6668_v48 = vpop.f32.mrb[16].mxu1 }
 0x1a4   : > { %v6670_v56 = vpop.f32.mrb[17].mxu1 }
 0x1a5   : > { %v6672_v57 = vpop.f32.mrb[18].mxu1 }
 0x1a6   : > { %v6674_v58 = vpop.f32.mrb[19].mxu1 }
 0x1ab   : > { %v6679_v6 = vpop.f32.mrb[20].mxu1 }
 0x1ac   : > { %v6681_v10 = vpop.f32.mrb[21].mxu1 }
 0x1ad   : > { %v6683_v21 = vpop.f32.mrb[22].mxu1 }
 0x1ae   : > { %v6685_v34 = vpop.f32.mrb[23].mxu1 }
 0x1b3   : > { %v6693_v41 = vpop.f32.mrb[24].mxu1 }
 0x1b4   : > { %v6695_v43 = vpop.f32.mrb[25].mxu1 }
 0x1b5   : > { %v6697_v22 = vpop.f32.mrb[26].mxu1 }
 0x1b6   : > { %v6699_v29 = vpop.f32.mrb[27].mxu1 }
 0x1bb   : > { %v6707_v53 = vpop.f32.mrb[28].mxu1 }
 0x1bc   : > { %v6709_v54 = vpop.f32.mrb[29].mxu1 }
 0x1bd   : > { %v6711_v55 = vpop.f32.mrb[30].mxu1 }
 0x1be   : > { %v6713_v59 = vpop.f32.mrb[31].mxu1 }
 0x1c3   : > { %v5532_v63 = vpop.f32.mrb[32].mxu1 }
 0x1c4   : > { %v3536_v0 = vpop.f32.mrb[33].mxu1 }
 0x1c5   : > { %v5533_v1 = vpop.f32.mrb[34].mxu1 }
 0x1c6   : > { %v3539_v2 = vpop.f32.mrb[35].mxu1 }
 0x1cb   : > { %v5536_v9 = vpop.f32.mrb[36].mxu1 }
 0x1cc   : > { %v3552_v39 = vpop.f32.mrb[37].mxu1 }
 0x1cd   : > { %v5537_v49 = vpop.f32.mrb[38].mxu1 }
 0x1ce   : > { %v3555_v11 = vpop.f32.mrb[39].mxu1 }
 0x1d3   : > { %v6724_v14 = vpop.f32.mrb[40].mxu1 }
 0x1d4   : > { %v6726_v15 = vpop.f32.mrb[41].mxu1 }
 0x1d5   : > { %v6728_v16 = vpop.f32.mrb[42].mxu1 }
 0x1d6   : > { %v6730_v4 = vpop.f32.mrb[43].mxu1 }
 0x1db   : > { %v6732_v17 = vpop.f32.mrb[44].mxu1 }
 0x1dc   : > { %v6734_v23 = vpop.f32.mrb[45].mxu1 }
 0x1dd   : > { %v6736_v25 = vpop.f32.mrb[46].mxu1 }
 0x1de   : > { %v6738_v26 = vpop.f32.mrb[47].mxu1 }
 0x1e3   : > { %v6740_v27 = vpop.f32.mrb[48].mxu1 }
 0x1e4   : > { %v6742_v31 = vpop.f32.mrb[49].mxu1 }
 0x1e5   : > { %v6744_v8 = vpop.f32.mrb[50].mxu1 }
 0x1e6   : > { %v6746_v20 = vpop.f32.mrb[51].mxu1 }
 0x219   : > { %v5484_v32 = vpop.f32.mrb[12].mxu0 }
 0x21a   : > { %v5666_v33 = vadd.f32 %v5484_v32, %v6660_v36  ;;  %v3166_v42 = vpop.f32.mrb[13].mxu0 }
 0x21b   : > { %v5668_v50 = vadd.f32 %v3166_v42, %v6662_v44  ;;  %v5485_v61 = vpop.f32.mrb[14].mxu0 }
 0x21c   : > { %v5670_v40 = vadd.f32 %v5485_v61, %v6664_v45  ;;  %v5667_v47 = vadd.f32 %v5666_v33, %v5532_v63  ;;  %v3169_v51 = vpop.f32.mrb[15].mxu0 }
 0x21d   : > { %v5672_v36 = vadd.f32 %v3169_v51, %v6666_v46  ;;  %v5669_v38 = vadd.f32 %v5668_v50, %v3536_v0 }
 0x21e   : > { %v3732_v44 = vmul.f32 %v5667_v47, %v6753_v37  ;;  %v5671_v3 = vadd.f32 %v5670_v40, %v5533_v1 }
 0x21f   : > { %v3730_v32 = vmul.f32 %v5669_v38, %v6753_v37  ;;  %v5673_v42 = vadd.f32 %v5672_v36, %v3539_v2 }
 0x220   : > { %v3771_v35 = vadd.f32 %v6759_v30, %v3732_v44  ;;  %v3733_v45 = vmul.f32 %v5671_v3, %v6753_v37 }
 0x221   : > { %v3769_v63 = vadd.f32 %v6759_v30, %v3730_v32  ;;  %v3731_v33 = vmul.f32 %v5673_v42, %v6753_v37  ;;  %v5488_v61 = vpop.f32.mrb[16].mxu0 }
 0x222   : > { %v3772_v28 = vadd.f32 %v6759_v30, %v3733_v45  ;;  %v5674_v46 = vadd.f32 %v5488_v61, %v6668_v48  ;;  %v3182_v0 = vpop.f32.mrb[17].mxu0  ;;  %v3803_v2 = vmax.f32 %v3771_v35, 0.0 }
 0x223   : > { %v3770_v50 = vadd.f32 %v6759_v30, %v3731_v33  ;;  %v5676_v1 = vadd.f32 %v3182_v0, %v6670_v56  ;;  %v5489_v40 = vpop.f32.mrb[18].mxu0  ;;  %v3801_v44 = vmax.f32 %v3769_v63, 0.0 }
 0x224   : > { %v3804_v47 = vmax.f32 %v3772_v28, 0.0  ;;  %v5678_v51 = vadd.f32 %v5489_v40, %v6672_v57  ;;  %v5675_v36 = vadd.f32 %v5674_v46, %v5536_v9  ;;  %v3185_v38 = vpop.f32.mrb[19].mxu0 }
 0x225   : > { %v3802_v3 = vmax.f32 %v3770_v50, 0.0  ;;  %v5680_v32 = vadd.f32 %v3185_v38, %v6674_v58  ;;  %v5677_v42 = vadd.f32 %v5676_v1, %v3552_v39 }
 0x226   : > { %v3736_v45 = vmul.f32 %v5675_v36, %v6753_v37  ;;  %v5679_v48 = vadd.f32 %v5678_v51, %v5537_v49  ;;  %v6775_v61 = vpack.c.bf16 %v3804_v47, %v3803_v2 }
 0x227   : > { %v3734_v33 = vmul.f32 %v5677_v42, %v6753_v37  ;;  %v5681_v56 = vadd.f32 %v5680_v32, %v3555_v11  ;;  %v6778_v0 = vpack.c.bf16 %v3802_v3, %v3801_v44 }
 0x228   : > { %v3775_v28 = vadd.f32 %v6759_v30, %v3736_v45  ;;  %v3737_v35 = vmul.f32 %v5679_v48, %v6753_v37 }
 0x229   : > { %v3773_v57 = vadd.f32 %v6759_v30, %v3734_v33  ;;  %v3735_v9 = vmul.f32 %v5681_v56, %v6753_v37  ;;  %v5492_v58 = vpop.f32.mrb[20].mxu0 }
 0x22a   : > { %v3776_v39 = vadd.f32 %v6759_v30, %v3737_v35  ;;  %v5682_v49 = vadd.f32 %v5492_v58, %v6679_v6  ;;  %v3198_v63 = vpop.f32.mrb[21].mxu0  ;;  %v3807_v1 = vmax.f32 %v3775_v28, 0.0 }
 0x22b   : > { %v3774_v46 = vadd.f32 %v6759_v30, %v3735_v9  ;;  %v5684_v11 = vadd.f32 %v3198_v63, %v6681_v10  ;;  %v5493_v50 = vpop.f32.mrb[22].mxu0  ;;  %v3805_v36 = vmax.f32 %v3773_v57, 0.0 }
 0x22c   : > { %v3808_v40 = vmax.f32 %v3776_v39, 0.0  ;;  %v5686_v2 = vadd.f32 %v5493_v50, %v6683_v21  ;;  %v5683_v47 = vadd.f32 %v5682_v49, %v6724_v14  ;;  %v3201_v51 = vpop.f32.mrb[23].mxu0 }
 0x22d   : > { %v3806_v38 = vmax.f32 %v3774_v46, 0.0  ;;  %v5688_v44 = vadd.f32 %v3201_v51, %v6685_v34  ;;  %v5685_v3 = vadd.f32 %v5684_v11, %v6726_v15 }
 0x22e   : > { %v3740_v6 = vmul.f32 %v5683_v47, %v6753_v37  ;;  %v5687_v32 = vadd.f32 %v5686_v2, %v6728_v16  ;;  %v6794_v42 = vpack.c.bf16 %v3808_v40, %v3807_v1 }
 0x22f   : > { %v3738_v10 = vmul.f32 %v5685_v3, %v6753_v37  ;;  %v5689_v45 = vadd.f32 %v5688_v44, %v6730_v4  ;;  %v6798_v21 = vpack.c.bf16 %v3806_v38, %v3805_v36 }
 0x230   : > { %v3779_v14 = vadd.f32 %v6759_v30, %v3740_v6  ;;  %v3741_v48 = vmul.f32 %v5687_v32, %v6753_v37 }
 0x231   : > { %v3777_v34 = vadd.f32 %v6759_v30, %v3738_v10  ;;  %v3739_v15 = vmul.f32 %v5689_v45, %v6753_v37  ;;  %v5496_v33 = vpop.f32.mrb[24].mxu0 }
 0x232   : > { %v3780_v56 = vadd.f32 %v6759_v30, %v3741_v48  ;;  %v5690_v16 = vadd.f32 %v5496_v33, %v6693_v41  ;;  %v3214_v28 = vpop.f32.mrb[25].mxu0  ;;  %v3811_v9 = vmax.f32 %v3779_v14, 0.0 }
 0x233   : > { %v3778_v35 = vadd.f32 %v6759_v30, %v3739_v15  ;;  %v5692_v4 = vadd.f32 %v3214_v28, %v6695_v43  ;;  %v5497_v57 = vpop.f32.mrb[26].mxu0  ;;  %v3809_v46 = vmax.f32 %v3777_v34, 0.0 }
 0x234   : > { %v3812_v58 = vmax.f32 %v3780_v56, 0.0  ;;  %v5694_v39 = vadd.f32 %v5497_v57, %v6697_v22  ;;  %v5691_v49 = vadd.f32 %v5690_v16, %v6732_v17  ;;  %v3217_v63 = vpop.f32.mrb[27].mxu0 }
 0x235   : > { %v3810_v11 = vmax.f32 %v3778_v35, 0.0  ;;  %v5696_v50 = vadd.f32 %v3217_v63, %v6699_v29  ;;  %v5693_v1 = vadd.f32 %v5692_v4, %v6734_v23 }
 0x236   : > { %v3744_v41 = vmul.f32 %v5691_v49, %v6753_v37  ;;  %v5695_v40 = vadd.f32 %v5694_v39, %v6736_v25  ;;  %v6814_v2 = vpack.c.bf16 %v3812_v58, %v3811_v9 }
 0x237   : > { %v3742_v43 = vmul.f32 %v5693_v1, %v6753_v37  ;;  %v5697_v47 = vadd.f32 %v5696_v50, %v6738_v26  ;;  %v6818_v22 = vpack.c.bf16 %v3810_v11, %v3809_v46 }
 0x238   : > { %v3783_v17 = vadd.f32 %v6759_v30, %v3744_v41  ;;  %v3745_v51 = vmul.f32 %v5695_v40, %v6753_v37 }
 0x239   : > { %v3781_v29 = vadd.f32 %v6759_v30, %v3742_v43  ;;  %v3743_v23 = vmul.f32 %v5697_v47, %v6753_v37  ;;  %v5500_v36 = vpop.f32.mrb[28].mxu0 }
 0x23a   : > { %v3784_v38 = vadd.f32 %v6759_v30, %v3745_v51  ;;  %v5698_v25 = vadd.f32 %v5500_v36, %v6707_v53  ;;  %v3230_v44 = vpop.f32.mrb[29].mxu0  ;;  %v3815_v32 = vmax.f32 %v3783_v17, 0.0 }
 0x23b   : > { %v3782_v3 = vadd.f32 %v6759_v30, %v3743_v23  ;;  %v5700_v26 = vadd.f32 %v3230_v44, %v6709_v54  ;;  %v5501_v6 = vpop.f32.mrb[30].mxu0  ;;  %v3813_v34 = vmax.f32 %v3781_v29, 0.0 }
 0x23c   : > { %v3816_v10 = vmax.f32 %v3784_v38, 0.0  ;;  %v5702_v45 = vadd.f32 %v5501_v6, %v6711_v55  ;;  %v5699_v14 = vadd.f32 %v5698_v25, %v6740_v27  ;;  %v3233_v48 = vpop.f32.mrb[31].mxu0 }
 0x23d   : > { %v3814_v15 = vmax.f32 %v3782_v3, 0.0  ;;  %v5704_v33 = vadd.f32 %v3233_v48, %v6713_v59  ;;  %v5701_v56 = vadd.f32 %v5700_v26, %v6742_v31 }
 0x23e   : > { %v3748_v53 = vmul.f32 %v5699_v14, %v6753_v37  ;;  %v5703_v16 = vadd.f32 %v5702_v45, %v6744_v8  ;;  %v6834_v28 = vpack.c.bf16 %v3816_v10, %v3815_v32 }
 0x23f   : > { %v3746_v54 = vmul.f32 %v5701_v56, %v6753_v37  ;;  %v5705_v35 = vadd.f32 %v5704_v33, %v6746_v20  ;;  %v6838_v55 = vpack.c.bf16 %v3814_v15, %v3813_v34 }
 0x240   : > { %v3787_v27 = vadd.f32 %v6759_v30, %v3748_v53  ;;  %v3749_v4 = vmul.f32 %v5703_v16, %v6753_v37 }
 0x241   : > { %v3785_v59 = vadd.f32 %v6759_v30, %v3746_v54  ;;  %v3747_v31 = vmul.f32 %v5705_v35, %v6753_v37  ;;  %v5520_v57 = vpop.f32.mrb[0].mxu0 }
 0x242   : > { %v3788_v9 = vadd.f32 %v6759_v30, %v3749_v4  ;;  %v5654_v8 = vadd.f32 %v5520_v57, %v6636_v52  ;;  %v3488_v58 = vpop.f32.mrb[1].mxu0  ;;  %v3819_v63 = vmax.f32 %v3787_v27, 0.0 }
 0x243   : > { %v3786_v39 = vadd.f32 %v6759_v30, %v3747_v31  ;;  %v5655_v20 = vadd.f32 %v3488_v58, %v6638_v60  ;;  %v5521_v49 = vpop.f32.mrb[2].mxu0  ;;  %v3817_v41 = vmax.f32 %v3785_v59, 0.0 }
 0x244   : > { %v3820_v46 = vmax.f32 %v3788_v9, 0.0  ;;  %v3720_v11 = vmul.f32 %v5654_v8, %v6753_v37  ;;  %v5656_v50 = vadd.f32 %v5521_v49, %v6640_v62  ;;  %v3491_v1 = vpop.f32.mrb[3].mxu0 }
 0x245   : > { %v3818_v40 = vmax.f32 %v3786_v39, 0.0  ;;  %v3718_v43 = vmul.f32 %v5655_v20, %v6753_v37  ;;  %v5657_v47 = vadd.f32 %v3491_v1, %v6642_v5  ;;  %v7020_v39 = vld [vmem:[#allocation3_spill] sm:$0xff] }
 0x246   : > { %v3759_v52 = vadd.f32 %v6759_v30, %v3720_v11  ;;  %v3721_v17 = vmul.f32 %v5656_v50, %v6753_v37  ;;  %v6854_v51 = vpack.c.bf16 %v3820_v46, %v3819_v63  ;;  %v7021_v11 = vld [vmem:[#allocation4_spill] sm:$0xff] }
 0x247   : > { %v3757_v60 = vadd.f32 %v6759_v30, %v3718_v43  ;;  %v3719_v29 = vmul.f32 %v5657_v47, %v6753_v37  ;;  %v6858_v23 = vpack.c.bf16 %v3818_v40, %v3817_v41 }
 0x248   : > { %v3760_v62 = vadd.f32 %v6759_v30, %v3721_v17  ;;  %v3791_v25 = vmax.f32 %v3759_v52, 0.0 }
 0x249   : > { %v3758_v36 = vadd.f32 %v6759_v30, %v3719_v29  ;;  %v5524_v38 = vpop.f32.mrb[4].mxu0  ;;  %v3789_v26 = vmax.f32 %v3757_v60, 0.0 }
 0x24a   : > { %v3792_v44 = vmax.f32 %v3760_v62, 0.0  ;;  %v5658_v5 = vadd.f32 %v5524_v38, %v6644_v7  ;;  %v3504_v3 = vpop.f32.mrb[5].mxu0 }
 0x24b   : > { %v3790_v6 = vmax.f32 %v3758_v36, 0.0  ;;  %v5659_v32 = vadd.f32 %v3504_v3, %v6646_v12  ;;  %v5525_v10 = vpop.f32.mrb[6].mxu0 }
 0x24c   : > { %v3822_v45 = vpack.c.bf16 %v3792_v44, %v3791_v25  ;;  %v3724_v14 = vmul.f32 %v5658_v5, %v6753_v37  ;;  %v5660_v48 = vadd.f32 %v5525_v10, %v6648_v13  ;;  %v3507_v34 = vpop.f32.mrb[7].mxu0 }
 0x24d   : > { %v3722_v15 = vmul.f32 %v5659_v32, %v6753_v37  ;;  %v5661_v33 = vadd.f32 %v3507_v34, %v6650_v18  ;;  %v3821_v56 = vpack.c.bf16 %v3790_v6, %v3789_v26 }
 0x24e   : > { %v3763_v53 = vadd.f32 %v6759_v30, %v3724_v14  ;;  %v3725_v7 = vmul.f32 %v5660_v48, %v6753_v37 }
 0x24f   : > { %v3761_v16 = vadd.f32 %v6759_v30, %v3722_v15  ;;  %v3723_v12 = vmul.f32 %v5661_v33, %v6753_v37  ;;  %5566 = vmatprep.mubr.bf16.mxu1 %v3821_v56 }
 0x250   : > { %v3764_v54 = vadd.f32 %v6759_v30, %v3725_v7  ;;  %5567 = vmatmul.mubr.bf16.vlgmr.msra.gmra.mrb[52].mxu1 %v3822_v45  ;;  %v3795_v27 = vmax.f32 %v3763_v53, 0.0 }
 0x251   : > { %v3762_v13 = vadd.f32 %v6759_v30, %v3723_v12  ;;  %v5528_v35 = vpop.f32.mrb[8].mxu0  ;;  %v3793_v31 = vmax.f32 %v3761_v16, 0.0 }
 0x252   : > { %v3796_v4 = vmax.f32 %v3764_v54, 0.0  ;;  %v5662_v18 = vadd.f32 %v5528_v35, %v6652_v19  ;;  %v3520_v59 = vpop.f32.mrb[9].mxu0 }
 0x253   : > { %v3794_v57 = vmax.f32 %v3762_v13, 0.0  ;;  %v5663_v9 = vadd.f32 %v3520_v59, %v6654_v24  ;;  %v5529_v8 = vpop.f32.mrb[10].mxu0 }
 0x254   : > { %v3728_v58 = vmul.f32 %v5662_v18, %v6753_v37  ;;  %v5664_v20 = vadd.f32 %v5529_v8, %v7020_v39  ;;  %v3523_v49 = vpop.f32.mrb[11].mxu0  ;;  %v3824_v63 = vpack.c.bf16 %v3796_v4, %v3795_v27 }
 0x255   : > { %v3726_v46 = vmul.f32 %v5663_v9, %v6753_v37  ;;  %v5665_v50 = vadd.f32 %v3523_v49, %v7021_v11  ;;  %v3823_v1 = vpack.c.bf16 %v3794_v57, %v3793_v31 }
 0x256   : > { %v3767_v41 = vadd.f32 %v6759_v30, %v3728_v58  ;;  %v3729_v19 = vmul.f32 %v5664_v20, %v6753_v37 }
 0x257   : > { %v3765_v40 = vadd.f32 %v6759_v30, %v3726_v46  ;;  %v3727_v24 = vmul.f32 %v5665_v50, %v6753_v37  ;;  %5570 = vmatprep.mubr.bf16.mxu1 %v3823_v1  ;;  %v6029_v37 = vmov 0.0  }
 0x258   : > { %v3768_v43 = vadd.f32 %v6759_v30, %v3729_v19  ;;  %5571 = vmatmul.mubr.bf16.gmra.mrb[56].mxu1 %v3824_v63  ;;  %v3799_v52 = vmax.f32 %v3767_v41, 0.0  ;;  %5598 = vmatprep.subr.bf16.mxu1 %v6029_v37 }
 0x259   : > { %v3766_v47 = vadd.f32 %v6759_v30, %v3727_v24  ;;  %v3797_v60 = vmax.f32 %v3765_v40, 0.0  ;;  %v6001_v30 = vld [vmem:[%s7014_s5] sm:$0xff]  }
 0x25a   : > { %v3800_v17 = vmax.f32 %v3768_v43, 0.0  ;;  %5599 = vmatpush3.bf16.msra.mxu1 %v6001_v30 }
 0x25b   : > { %v3798_v29 = vmax.f32 %v3766_v47, 0.0  ;;  %5600 = vmatprep.subr.bf16.mxu1 %v6029_v37 }
 0x25c   : > { %v3826_v62 = vpack.c.bf16 %v3800_v17, %v3799_v52 }
 0x25d   : > { %v3825_v36 = vpack.c.bf16 %v3798_v29, %v3797_v60 }
 0x25f   : > { %5574 = vmatprep.mubr.bf16.mxu1 %v3825_v36 }
 0x260   : > { %5575 = vmatmul.mubr.bf16.gmra.mrb[60].mxu1 %v3826_v62 }
 0x261   : > { %5578 = vmatprep.mubr.bf16.mxu1 %v6778_v0  ;;  %v6003_v0 = vld [vmem:[%s7014_s5 + $0x10] sm:$0xff]  }
 0x268   : > { %5579 = vmatmul.mubr.bf16.gmra.mrb[64].mxu1 %v6775_v61  ;;  %v6002_v61 = vld [vmem:[%s7014_s5 + $0x8] sm:$0xff]  }
 0x269   : > { %5582 = vmatprep.mubr.bf16.mxu1 %v6798_v21  ;;  %5601 = vmatpush3.bf16.msra.mxu1 %v6002_v61  ;;  %v6005_v21 = vld [vmem:[%s7014_s5 + $0x20] sm:$0xff]  }
 0x26a   : > { %5602 = vmatprep.subr.bf16.mxu1 %v6029_v37 }
 0x26d   : > { %5603 = vmatpush3.bf16.msra.mxu1 %v6003_v0 }
 0x26e   : > { %5604 = vmatprep.subr.bf16.mxu1 %v6029_v37 }
 0x270   : > { %5583 = vmatmul.mubr.bf16.gmra.mrb[68].mxu1 %v6794_v42  ;;  %v6004_v42 = vld [vmem:[%s7014_s5 + $0x18] sm:$0xff]  }
 0x271   : > { %5586 = vmatprep.mubr.bf16.mxu1 %v6818_v22  ;;  %5605 = vmatpush3.bf16.msra.mxu1 %v6004_v42  ;;  %v6007_v22 = vld [vmem:[%s7014_s5 + $0x30] sm:$0xff]  }
 0x272   : > { %5606 = vmatprep.subr.bf16.mxu1 %v6029_v37 }
 0x275   : > { %5607 = vmatpush3.bf16.msra.mxu1 %v6005_v21 }
 0x276   : > { %5608 = vmatprep.subr.bf16.mxu1 %v6029_v37 }
 0x278   : > { %5587 = vmatmul.mubr.bf16.gmra.mrb[72].mxu1 %v6814_v2  ;;  %v6006_v2 = vld [vmem:[%s7014_s5 + $0x28] sm:$0xff]  }
 0x279   : > { %5590 = vmatprep.mubr.bf16.mxu1 %v6838_v55  ;;  %5609 = vmatpush3.bf16.msra.mxu1 %v6006_v2 }
 0x27a   : > { %5610 = vmatprep.subr.bf16.mxu1 %v6029_v37 }
 0x27d   : > { %5611 = vmatpush3.bf16.msra.mxu1 %v6007_v22 }
 0x27e   : > { %5612 = vmatprep.subr.bf16.mxu1 %v6029_v37 }
 0x280   : > { %5591 = vmatmul.mubr.bf16.gmra.mrb[76].mxu1 %v6834_v28  ;;  %v6008_v28 = vld [vmem:[%s7014_s5 + $0x38] sm:$0xff]  }
 0x281   : > { %5594 = vmatprep.mubr.bf16.mxu1 %v6858_v23  ;;  %5613 = vmatpush3.bf16.msra.mxu1 %v6008_v28 }
 0x282   : > { %5618 = vmatprep.subr.bf16.mxu1 %v6029_v37 }
 0x288   : > { %5595 = vmatmul.mubr.bf16.gmra.mrb[80].mxu1 %v6854_v51 }
 0x289   : > { %5614 = vmatprep.mubr.msk.bf16.mxu1 %vm6030_vm0, %v6029_v37 }
 0x323   : > { %v5568_v55 = vpop.f32.mrb[52].mxu1 }
 0x324   : > { %4064 = vst [vmem:[%s6935_s20 + $0x10] sm:$0xff] %v5568_v55  ;;  %v3935_v51 = vpop.f32.mrb[53].mxu1 }
 0x325   : > { %4062 = vst [vmem:[%s6935_s20] sm:$0xff] %v3935_v51  ;;  %v5569_v23 = vpop.f32.mrb[54].mxu1 }
 0x326   : > { %4065 = vst [vmem:[%s6935_s20 + $0x18] sm:$0xff] %v5569_v23  ;;  %v3938_v38 = vpop.f32.mrb[55].mxu1 }
 0x327   : > { %4063 = vst [vmem:[%s6935_s20 + $0x8] sm:$0xff] %v3938_v38  ;;  %v4094_v25 = vadd.f32 %v3938_v38, %v3935_v51 }
 0x329   : > { %v4095_v44 = vadd.f32 %v5568_v55, %v4094_v25 }
 0x32b   : > { %v5572_v5 = vpop.f32.mrb[56].mxu1  ;;  %v4096_v3 = vadd.f32 %v5569_v23, %v4095_v44 }
 0x32c   : > { %4068 = vst [vmem:[%s6935_s20 + $0x30] sm:$0xff] %v5572_v5  ;;  %v3951_v26 = vpop.f32.mrb[57].mxu1 }
 0x32d   : > { %4066 = vst [vmem:[%s6935_s20 + $0x20] sm:$0xff] %v3951_v26  ;;  %v4097_v6 = vadd.f32 %v4096_v3, %v3951_v26  ;;  %v5573_v32 = vpop.f32.mrb[58].mxu1  ;;  %v6009_v3 = vld [vmem:[%s7015_s6] sm:$0xff]  }
 0x32e   : > { %4069 = vst [vmem:[%s6935_s20 + $0x38] sm:$0xff] %v5573_v32  ;;  %v3954_v10 = vpop.f32.mrb[59].mxu1 }
 0x32f   : > { %4067 = vst [vmem:[%s6935_s20 + $0x28] sm:$0xff] %v3954_v10  ;;  %v4098_v45 = vadd.f32 %v4097_v6, %v3954_v10  ;;  %v6010_v6 = vld [vmem:[%s7015_s6 + $0x8] sm:$0xff]   ;;  %v6012_v10 = vld [vmem:[%s7015_s6 + $0x18] sm:$0xff]  }
 0x331   : > { %v4099_v14 = vadd.f32 %v5572_v5, %v4098_v45  ;;  %v6013_v45 = vld [vmem:[%s7015_s6 + $0x20] sm:$0xff]  }
 0x333   : > { %v5576_v48 = vpop.f32.mrb[60].mxu1  ;;  %v4100_v34 = vadd.f32 %v5573_v32, %v4099_v14  ;;  %v6011_v32 = vld [vmem:[%s7015_s6 + $0x10] sm:$0xff]   ;;  %v6014_v14 = vld [vmem:[%s7015_s6 + $0x28] sm:$0xff]  }
 0x334   : > { %4072 = vst [vmem:[%s6935_s20 + $0x50] sm:$0xff] %v5576_v48  ;;  %v3967_v15 = vpop.f32.mrb[61].mxu1 }
 0x335   : > { %4070 = vst [vmem:[%s6935_s20 + $0x40] sm:$0xff] %v3967_v15  ;;  %v4101_v33 = vadd.f32 %v4100_v34, %v3967_v15  ;;  %v5577_v56 = vpop.f32.mrb[62].mxu1  ;;  %v6016_v34 = vld [vmem:[%s7015_s6 + $0x38] sm:$0xff]  }
 0x336   : > { %4073 = vst [vmem:[%s6935_s20 + $0x58] sm:$0xff] %v5577_v56  ;;  %v3970_v53 = vpop.f32.mrb[63].mxu1 }
 0x337   : > { %4071 = vst [vmem:[%s6935_s20 + $0x48] sm:$0xff] %v3970_v53  ;;  %v4102_v7 = vadd.f32 %v4101_v33, %v3970_v53 }
 0x339   : > { %v4103_v16 = vadd.f32 %v5576_v48, %v4102_v7  ;;  %v6015_v48 = vld [vmem:[%s7015_s6 + $0x30] sm:$0xff]  }
 0x33b   : > { %v5580_v12 = vpop.f32.mrb[64].mxu1  ;;  %v4104_v54 = vadd.f32 %v5577_v56, %v4103_v16 }
 0x33c   : > { %4076 = vst [vmem:[%s6935_s20 + $0x70] sm:$0xff] %v5580_v12  ;;  %v3983_v13 = vpop.f32.mrb[65].mxu1 }
 0x33d   : > { %4074 = vst [vmem:[%s6935_s20 + $0x60] sm:$0xff] %v3983_v13  ;;  %v4105_v35 = vadd.f32 %v4104_v54, %v3983_v13  ;;  %v5581_v27 = vpop.f32.mrb[66].mxu1 }
 0x33e   : > { %4077 = vst [vmem:[%s6935_s20 + $0x78] sm:$0xff] %v5581_v27  ;;  %v3986_v4 = vpop.f32.mrb[67].mxu1 }
 0x33f   : > { %4075 = vst [vmem:[%s6935_s20 + $0x68] sm:$0xff] %v3986_v4  ;;  %v4106_v18 = vadd.f32 %v4105_v35, %v3986_v4 }
 0x341   : > { %v4107_v59 = vadd.f32 %v5580_v12, %v4106_v18 }
 0x343   : > { %v5584_v31 = vpop.f32.mrb[68].mxu1  ;;  %v4108_v57 = vadd.f32 %v5581_v27, %v4107_v59 }
 0x344   : > { %4080 = vst [vmem:[%s6935_s20 + $0x90] sm:$0xff] %v5584_v31  ;;  %v3999_v9 = vpop.f32.mrb[69].mxu1 }
 0x345   : > { %4078 = vst [vmem:[%s6935_s20 + $0x80] sm:$0xff] %v3999_v9  ;;  %v4109_v8 = vadd.f32 %v4108_v57, %v3999_v9  ;;  %v5585_v58 = vpop.f32.mrb[70].mxu1 }
 0x346   : > { %4081 = vst [vmem:[%s6935_s20 + $0x98] sm:$0xff] %v5585_v58  ;;  %v4002_v39 = vpop.f32.mrb[71].mxu1 }
 0x347   : > { %4079 = vst [vmem:[%s6935_s20 + $0x88] sm:$0xff] %v4002_v39  ;;  %v4110_v20 = vadd.f32 %v4109_v8, %v4002_v39 }
 0x349   : > { %v4111_v49 = vadd.f32 %v5584_v31, %v4110_v20 }
 0x34b   : > { %v5588_v63 = vpop.f32.mrb[72].mxu1  ;;  %v4112_v46 = vadd.f32 %v5585_v58, %v4111_v49 }
 0x34c   : > { %4084 = vst [vmem:[%s6935_s20 + $0xb0] sm:$0xff] %v5588_v63  ;;  %v4015_v11 = vpop.f32.mrb[73].mxu1 }
 0x34d   : > { %4082 = vst [vmem:[%s6935_s20 + $0xa0] sm:$0xff] %v4015_v11  ;;  %v4113_v50 = vadd.f32 %v4112_v46, %v4015_v11  ;;  %v5589_v1 = vpop.f32.mrb[74].mxu1 }
 0x34e   : > { %4085 = vst [vmem:[%s6935_s20 + $0xb8] sm:$0xff] %v5589_v1  ;;  %v4018_v41 = vpop.f32.mrb[75].mxu1 }
 0x34f   : > { %4083 = vst [vmem:[%s6935_s20 + $0xa8] sm:$0xff] %v4018_v41  ;;  %v4114_v19 = vadd.f32 %v4113_v50, %v4018_v41 }
 0x351   : > { %v4115_v40 = vadd.f32 %v5588_v63, %v4114_v19 }
 0x353   : > { %v5592_v24 = vpop.f32.mrb[76].mxu1  ;;  %v4116_v43 = vadd.f32 %v5589_v1, %v4115_v40 }
 0x354   : > { %4088 = vst [vmem:[%s6935_s20 + $0xd0] sm:$0xff] %v5592_v24  ;;  %v4031_v47 = vpop.f32.mrb[77].mxu1 }
 0x355   : > { %4086 = vst [vmem:[%s6935_s20 + $0xc0] sm:$0xff] %v4031_v47  ;;  %v4117_v52 = vadd.f32 %v4116_v43, %v4031_v47  ;;  %v5593_v17 = vpop.f32.mrb[78].mxu1 }
 0x356   : > { %4089 = vst [vmem:[%s6935_s20 + $0xd8] sm:$0xff] %v5593_v17  ;;  %v4034_v60 = vpop.f32.mrb[79].mxu1 }
 0x357   : > { %4087 = vst [vmem:[%s6935_s20 + $0xc8] sm:$0xff] %v4034_v60  ;;  %v4118_v29 = vadd.f32 %v4117_v52, %v4034_v60 }
 0x359   : > { %v4119_v62 = vadd.f32 %v5592_v24, %v4118_v29 }
 0x35b   : > { %v5596_v36 = vpop.f32.mrb[80].mxu1  ;;  %v4120_v30 = vadd.f32 %v5593_v17, %v4119_v62 }
 0x35c   : > { %4092 = vst [vmem:[%s6935_s20 + $0xf0] sm:$0xff] %v5596_v36  ;;  %v4047_v61 = vpop.f32.mrb[81].mxu1 }
 0x35d   : > { %4090 = vst [vmem:[%s6935_s20 + $0xe0] sm:$0xff] %v4047_v61  ;;  %v4121_v0 = vadd.f32 %v4120_v30, %v4047_v61  ;;  %v5597_v42 = vpop.f32.mrb[82].mxu1 }
 0x35e   : > { %4093 = vst [vmem:[%s6935_s20 + $0xf8] sm:$0xff] %v5597_v42  ;;  %v4050_v21 = vpop.f32.mrb[83].mxu1 }
 0x35f   : > { %4091 = vst [vmem:[%s6935_s20 + $0xe8] sm:$0xff] %v4050_v21  ;;  %v4122_v2 = vadd.f32 %v4121_v0, %v4050_v21 }
 0x361   : > { %v4123_v22 = vadd.f32 %v5596_v36, %v4122_v2 }
 0x363   : > { %v4124_v28 = vadd.f32 %v5597_v42, %v4123_v22 }
 0x365   : > { %v4125_v55 = vrot.slane %v4124_v28, 4 }
 0x367   : > { %v4126_v51 = vadd.f32 %v4125_v55, %v4124_v28 }
 0x369   : > { %v4127_v23 = vrot.slane %v4126_v51, 2 }
 0x36b   : > { %v4128_v38 = vadd.f32 %v4127_v23, %v4126_v51 }
 0x36d   : > { %v4129_v25 = vrot.slane %v4128_v38, 1 }
 0x36f   : > { %v4130_v44 = vadd.f32 %v4129_v25, %v4128_v38 }
 0x371   : > { %v4131_v5 = vmul.f32 0.00390625, %v4130_v44 }
 0x373   : > { %v4132_v26 = vpack.c.bf16 %v4131_v5, %v4131_v5 }
 0x375   : > { %5615 = vmatmul.mubr.bf16.vlgmr.msra.gmra.mrb[84].mxu1 %v4132_v26 }
 0x376   : > { %5619 = vmatpush3.bf16.msra.mxu1 %v6009_v3  ;;  %5634 = vmatprep.mubr.msk.bf16.mxu1 %vm6030_vm0, %v6029_v37 }
 0x377   : > { %5620 = vmatprep.subr.bf16.mxu1 %v6029_v37 }
 0x37a   : > { %5621 = vmatpush3.bf16.msra.mxu1 %v6010_v6 }
 0x37b   : > { %5622 = vmatprep.subr.bf16.mxu1 %v6029_v37 }
 0x37e   : > { %5623 = vmatpush3.bf16.msra.mxu1 %v6011_v32 }
 0x37f   : > { %5624 = vmatprep.subr.bf16.mxu1 %v6029_v37 }
 0x382   : > { %5625 = vmatpush3.bf16.msra.mxu1 %v6012_v10 }
 0x383   : > { %5626 = vmatprep.subr.bf16.mxu1 %v6029_v37 }
 0x386   : > { %5627 = vmatpush3.bf16.msra.mxu1 %v6013_v45 }
 0x387   : > { %5628 = vmatprep.subr.bf16.mxu1 %v6029_v37 }
 0x38a   : > { %5629 = vmatpush3.bf16.msra.mxu1 %v6014_v14 }
 0x38b   : > { %5630 = vmatprep.subr.bf16.mxu1 %v6029_v37 }
 0x38e   : > { %5631 = vmatpush3.bf16.msra.mxu1 %v6015_v48 }
 0x38f   : > { %5632 = vmatprep.subr.bf16.mxu1 %v6029_v37 }
 0x392   : > { %5633 = vmatpush3.bf16.msra.mxu1 %v6016_v34 }
 0x448   : > { %v4231_v15 = vpop.f32.mrb[84].mxu1 }
 0x449   : > { %v4237_v33 = vmax.f32 %v4231_v15, 0.0  ;;  %v5616_v56 = vpop.f32.mrb[85].mxu1 }
 0x44a   : > { %v4234_v53 = vpop.f32.mrb[86].mxu1 }
 0x44b   : > { %v4238_v7 = vpack.c.bf16 %v4237_v33, %v4237_v33  ;;  %v5617_v16 = vpop.f32.mrb[87].mxu1 }
 0x44d   : > { %5635 = vmatmul.mubr.bf16.vlgmr.msra.gmra.mrb[88].mxu1 %v4238_v7 }
 0x520   : > { %v4337_v12 = vpop.f32.mrb[88].mxu1 }
 0x521   : > { %v4856_v54 = vmul.f32 -1.442695, %v4337_v12  ;;  %v5636_v13 = vpop.f32.mrb[89].mxu1 }
 0x522   : > { %v4340_v35 = vpop.f32.mrb[90].mxu1 }
 0x523   : > { %6017 = vpow2.f32 %v4856_v54  ;;  %v5637_v27 = vpop.f32.mrb[91].mxu1 }
 0x52d   : > { %v6018_v37 = vpop.eup %6017 }
 0x52e   : > { %v4346_v4 = vadd.f32 1.0, %v6018_v37 }
 0x530   : > { %6019 = vrcp.f32 %v4346_v4 }
 0x53a   : > { %v6020_v18 = vpop.eup %6019 }
 0x53b   : > { %4349 = vst [vmem:[%s314_s19] sm:$0x1] %v6020_v18 }
 0x53c PF: > { %s19_s27 = sadd.s32 1, %s6027_s27  }
 0x53d   : > { %p16_p4 = scmp.ge.s32.totalorder %s19_s27, 4  }
 0x53f   :  { %18 = sbr.rel (!%p16_p4) target bundleno = 1 (0x1), region = 100 }

</bundles_post_ra>
